<compile_context>
chip_gen: v7x
topology: tpu7x:2x2x1
jax: 0.10.0
libtpu: 0.0.40
codegen_flags: <defaults>
</compile_context>

<pallas_src>
import functools

import jax
import jax.numpy as jnp
from jax.experimental import pallas as pl
from jax.experimental.pallas import tpu as pltpu

_SQRT_2_INV = 0.7071067811865476
_PAD_L = 8  # left zero-pad columns in the conv scratch (sublane-aligned store)


def _cparams(n_axes):
    return pltpu.CompilerParams(
        dimension_semantics=("parallel",) * n_axes,
        vmem_limit_bytes=32 * 1024 * 1024)


def _row_tile(n):
    for t in (512, 256, 128, 64, 32, 16, 8):
        if n % t == 0:
            return t
    return n


def _erf_f32(x):
    # TODO(synk): exact lax.erf has no guaranteed Mosaic lowering; use the
    # Abramowitz & Stegun 7.1.26 polynomial (|abs err| < 1.5e-7, f32-accurate).
    a1, a2, a3, a4, a5 = 0.254829592, -0.284496736, 1.421413741, -1.453152027, 1.061405429
    p = 0.3275911
    sign = jnp.where(x >= 0.0, 1.0, -1.0)
    ax = jnp.abs(x)
    t = 1.0 / (1.0 + p * ax)
    poly = ((((a5 * t + a4) * t + a3) * t + a2) * t + a1) * t
    return sign * (1.0 - poly * jnp.exp(-ax * ax))


# ----------------------------------------------------------------------------
# Kernels
# ----------------------------------------------------------------------------
def _ln_matmul_kernel(x_ref, w_ref, b_ref, wmat_ref, o_ref):
    # Fused LayerNorm (eps=1e-5, affine) + 1x1 conv (matmul over channels).
    x = x_ref[...]
    mean = jnp.mean(x, axis=-1, keepdims=True)
    xc = x - mean
    var = jnp.mean(xc * xc, axis=-1, keepdims=True)
    xn = xc * jax.lax.rsqrt(var + 1e-5) * w_ref[...] + b_ref[...]
    o_ref[...] = jnp.dot(xn, wmat_ref[...], preferred_element_type=jnp.float32)


def _dw3x3_accumulate(pad_ref, src_ref, w_ref, acc):
    # Store src into the (already zero-bordered) scratch at an aligned offset,
    # then accumulate the 9 shifted taps.  Weight tile loaded once.
    H, W, C = src_ref.shape
    pad_ref[1:H + 1, _PAD_L:_PAD_L + W, :] = src_ref[...]
    wv = w_ref[...]
    for ky in range(3):
        for kx in range(3):
            tap = ky * 3 + kx
            xs = pad_ref[ky:ky + H, _PAD_L - 1 + kx:_PAD_L - 1 + kx + W, :]
            acc = acc + xs * jnp.reshape(wv[tap:tap + 1, :], (1, 1, C))
    return acc


def _dwconv3x3_kernel(x_ref, w_ref, o_ref, pad_ref):
    # Depthwise 3x3, padding folded into a VMEM scratch (no HBM pad copy).
    pad_ref[...] = jnp.zeros_like(pad_ref)
    acc = jnp.zeros(o_ref.shape, jnp.float32)
    o_ref[...] = _dw3x3_accumulate(pad_ref, x_ref, w_ref, acc)


def _gdfn_groupconv_kernel(xa_ref, xb_ref, wa_ref, wb_ref, o_ref, pad_ref):
    # GDFN grouped 3x3 conv (groups=hidden, 2-in/2-out) as two depthwise
    # accumulations over weight-permuted inputs, in a single kernel.
    pad_ref[...] = jnp.zeros_like(pad_ref)
    acc = jnp.zeros(o_ref.shape, jnp.float32)
    acc = _dw3x3_accumulate(pad_ref, xa_ref, wa_ref, acc)
    acc = _dw3x3_accumulate(pad_ref, xb_ref, wb_ref, acc)   # borders stay zero
    o_ref[...] = acc


def _mdta_ln_gdfn1_kernel(scale_ref, qkv_ref, lnw_ref, lnb_ref, w3_ref,
                          w1a_ref, w1b_ref, x2_ref, xa_ref, xb_ref, *,
                          num_heads):
    # Per-batch: MDTA attention (all heads) + output 1x1 projection +
    # LayerNorm1 (reference reuses layernorm1; layernorm2 is unused; MDTA has
    # no residual) + GDFN conv1 with pre-permuted weights.
    HW, C3 = qkv_ref.shape
    C = C3 // 3
    d = C // num_heads
    qkv = qkv_ref[...]                       # (HW, 3C), pixel-major
    w3 = w3_ref[...]                         # (C, C)
    proj = jnp.zeros((HW, C), jnp.float32)
    for h in range(num_heads):
        q = qkv[:, h * d:(h + 1) * d]                       # (HW, d)
        k = qkv[:, C + h * d:C + (h + 1) * d]
        v = qkv[:, 2 * C + h * d:2 * C + (h + 1) * d]
        # F.normalize(dim=-1) over HW:  x / max(||x||_2, 1e-12)
        qn = q * jax.lax.rsqrt(jnp.maximum(jnp.sum(q * q, axis=0, keepdims=True), 1e-24))
        kn = k * jax.lax.rsqrt(jnp.maximum(jnp.sum(k * k, axis=0, keepdims=True), 1e-24))
        # s[i, j] = sum_hw qn[hw, i] * kn[hw, j]   (contract over HW)
        s = jax.lax.dot_general(qn, kn, (((0,), (0,)), ((), ())),
                                preferred_element_type=jnp.float32)
        s = s * scale_ref[h]
        s = s - jnp.max(s, axis=-1, keepdims=True)
        p = jnp.exp(s)
        attn = p * pl.reciprocal(jnp.sum(p, axis=-1, keepdims=True), approx=False)
        # out[hw, i] = sum_j v[hw, j] * attn[i, j]   -> pixel-major (HW, d)
        o = jax.lax.dot_general(v, attn, (((1,), (1,)), ((), ())),
                                preferred_element_type=jnp.float32)
        # fused MDTA conv3 projection, accumulated per head
        proj = proj + jnp.dot(o, w3[h * d:(h + 1) * d, :],
                              preferred_element_type=jnp.float32)
    # LayerNorm1 again (per reference), then GDFN conv1 (permuted columns).
    mean = jnp.mean(proj, axis=-1, keepdims=True)
    pc = proj - mean
    var = jnp.mean(pc * pc, axis=-1, keepdims=True)
    x2 = pc * jax.lax.rsqrt(var + 1e-5) * lnw_ref[...] + lnb_ref[...]
    x2_ref[...] = x2
    xa_ref[...] = jnp.dot(x2, w1a_ref[...], preferred_element_type=jnp.float32)
    xb_ref[...] = jnp.dot(x2, w1b_ref[...], preferred_element_type=jnp.float32)


def _gdfn_gate_proj_kernel(h_ref, w3_ref, res_ref, o_ref):
    # out = (gelu(x2) * x1) @ W3 + residual
    hid = w3_ref.shape[0]
    h = h_ref[...]
    x1 = h[:, :hid]
    x2 = h[:, hid:]
    gated = (0.5 * x2 * (1.0 + _erf_f32(x2 * _SQRT_2_INV))) * x1
    o_ref[...] = jnp.dot(gated, w3_ref[...],
                         preferred_element_type=jnp.float32) + res_ref[...]


# ----------------------------------------------------------------------------
# pallas_call wrappers
# ----------------------------------------------------------------------------
def ln_matmul(x2d, ln_w, ln_b, w):
    N, C = x2d.shape
    Cout = w.shape[1]
    rt = _row_tile(N)
    return pl.pallas_call(
        _ln_matmul_kernel,
        out_shape=jax.ShapeDtypeStruct((N, Cout), jnp.float32),
        grid=(N // rt,),
        in_specs=[pl.BlockSpec((rt, C), lambda i: (i, 0)),
                  pl.BlockSpec((1, C), lambda i: (0, 0)),
                  pl.BlockSpec((1, C), lambda i: (0, 0)),
                  pl.BlockSpec((C, Cout), lambda i: (0, 0))],
        out_specs=pl.BlockSpec((rt, Cout), lambda i: (i, 0)),
        compiler_params=_cparams(1),
    )(x2d, ln_w, ln_b, w)


def dwconv3x3(x_nhwc, w9c):
    B, H, W, C = x_nhwc.shape
    return pl.pallas_call(
        _dwconv3x3_kernel,
        out_shape=jax.ShapeDtypeStruct((B, H, W, C), jnp.float32),
        grid=(B,),
        in_specs=[pl.BlockSpec((None, H, W, C), lambda b: (b, 0, 0, 0)),
                  pl.BlockSpec((9, C), lambda b: (0, 0))],
        out_specs=pl.BlockSpec((None, H, W, C), lambda b: (b, 0, 0, 0)),
        scratch_shapes=[pltpu.VMEM((H + 2, W + _PAD_L + 1, C), jnp.float32)],
        compiler_params=_cparams(1),
    )(x_nhwc, w9c)


def mdta_attention_block(qkv, scale, ln_w, ln_b, w3, w1a, w1b, num_heads):
    B, HW, C3 = qkv.shape
    C = C3 // 3
    hid2 = w1a.shape[1]
    kern = functools.partial(_mdta_ln_gdfn1_kernel, num_heads=num_heads)
    return pl.pallas_call(
        kern,
        out_shape=(jax.ShapeDtypeStruct((B, HW, C), jnp.float32),
                   jax.ShapeDtypeStruct((B, HW, hid2), jnp.float32),
                   jax.ShapeDtypeStruct((B, HW, hid2), jnp.float32)),
        grid=(B,),
        in_specs=[pl.BlockSpec(memory_space=pltpu.MemorySpace.SMEM),
                  pl.BlockSpec((None, HW, C3), lambda b: (b, 0, 0)),
                  pl.BlockSpec((1, C), lambda b: (0, 0)),
                  pl.BlockSpec((1, C), lambda b: (0, 0)),
                  pl.BlockSpec((C, C), lambda b: (0, 0)),
                  pl.BlockSpec((C, hid2), lambda b: (0, 0)),
                  pl.BlockSpec((C, hid2), lambda b: (0, 0))],
        out_specs=(pl.BlockSpec((None, HW, C), lambda b: (b, 0, 0)),
                   pl.BlockSpec((None, HW, hid2), lambda b: (b, 0, 0)),
                   pl.BlockSpec((None, HW, hid2), lambda b: (b, 0, 0))),
        compiler_params=_cparams(1),
    )(scale, qkv, ln_w, ln_b, w3, w1a, w1b)


def gdfn_grouped_conv(xa, xb, wa, wb):
    B, H, W, C = xa.shape
    return pl.pallas_call(
        _gdfn_groupconv_kernel,
        out_shape=jax.ShapeDtypeStruct((B, H, W, C), jnp.float32),
        grid=(B,),
        in_specs=[pl.BlockSpec((None, H, W, C), lambda b: (b, 0, 0, 0)),
                  pl.BlockSpec((None, H, W, C), lambda b: (b, 0, 0, 0)),
                  pl.BlockSpec((9, C), lambda b: (0, 0)),
                  pl.BlockSpec((9, C), lambda b: (0, 0))],
        out_specs=pl.BlockSpec((None, H, W, C), lambda b: (b, 0, 0, 0)),
        scratch_shapes=[pltpu.VMEM((H + 2, W + _PAD_L + 1, C), jnp.float32)],
        compiler_params=_cparams(1),
    )(xa, xb, wa, wb)


def gdfn_gate_proj(conv2_2d, w3, res2d):
    N, hid2 = conv2_2d.shape
    hid = hid2 // 2
    C = w3.shape[1]
    rt = _row_tile(N)
    return pl.pallas_call(
        _gdfn_gate_proj_kernel,
        out_shape=jax.ShapeDtypeStruct((N, C), jnp.float32),
        grid=(N // rt,),
        in_specs=[pl.BlockSpec((rt, hid2), lambda i: (i, 0)),
                  pl.BlockSpec((hid, C), lambda i: (0, 0)),
                  pl.BlockSpec((rt, C), lambda i: (i, 0))],
        out_specs=pl.BlockSpec((rt, C), lambda i: (i, 0)),
        compiler_params=_cparams(1),
    )(conv2_2d, w3, res2d)


# ----------------------------------------------------------------------------
# TransformerBlock forward (glue is only free reshapes + the two NCHW<->pixel
# transposes that the PyTorch reference also performs)
# ----------------------------------------------------------------------------
def transformer_block(x_nchw, params, *, num_heads):
    B, C, H, W = x_nchw.shape
    HW = H * W
    hid = params["gdfn_w3"].shape[0]

    ln_w = params["ln1_w"].reshape(1, C)
    ln_b = params["ln1_b"].reshape(1, C)

    # (B, C, H, W) -> (B*HW, C) pixel-major (same transpose the reference does).
    x_seq = jnp.transpose(x_nchw.reshape(B, C, HW), (0, 2, 1)).reshape(B * HW, C)

    # ---- fused LayerNorm1 + qkv 1x1 projection (tiled over pixels) ----
    qkv = ln_matmul(x_seq, ln_w, ln_b, params["mdta_w1"])          # (B*HW, 3C)

    # ---- depthwise 3x3 on qkv (padding folded into the kernel) ----
    qkv_dw = dwconv3x3(qkv.reshape(B, H, W, 3 * C), params["mdta_w2"])

    # ---- MDTA attention + conv3 projection + LayerNorm1 (again, per the
    #      reference; no MDTA residual) + GDFN conv1, fused per batch ----
    # GDFN grouped conv (groups=hidden, 2-in/2-out): pre-permute conv1 columns
    # so the two per-group inputs come out directly (no activation gather).
    cols = jnp.arange(2 * hid)
    w1a = params["gdfn_w1"][:, 2 * (cols // 2)]        # input chan 2*(o//2)
    w1b = params["gdfn_w1"][:, 2 * (cols // 2) + 1]    # input chan 2*(o//2)+1
    x2, xa, xb = mdta_attention_block(
        qkv_dw.reshape(B, HW, 3 * C), params["mdta_scale"], ln_w, ln_b,
        params["mdta_w3"], w1a, w1b, num_heads)

    # ---- GDFN grouped 3x3 conv (two depthwise accumulations, one kernel) ----
    conv2_out = gdfn_grouped_conv(xa.reshape(B, H, W, 2 * hid),
                                  xb.reshape(B, H, W, 2 * hid),
                                  params["gdfn_w2a"], params["gdfn_w2b"])

    # ---- gelu gate + 1x1 projection + residual (residual = GDFN input x2) ----
    y = gdfn_gate_proj(conv2_out.reshape(B * HW, 2 * hid), params["gdfn_w3"],
                       x2.reshape(B * HW, C))

    return jnp.transpose(y.reshape(B, HW, C), (0, 2, 1)).reshape(B, C, H, W)


# ----------------------------------------------------------------------------
# Deterministic parameter init (shapes follow the PyTorch module __init__)
# ----------------------------------------------------------------------------
def init_params(key, channels, num_heads, expansion_factor):
    hidden = int(channels * expansion_factor)
    ks = jax.random.split(key, 10)
    n = lambda k, shape, s=0.1: jax.random.normal(k, shape, jnp.float32) * s
    return dict(
        # LayerNorm(channels)  (layernorm2 exists in the module but is unused)
        ln1_w=1.0 + n(ks[0], (channels,)),
        ln1_b=n(ks[1], (channels,)),
        # MDTA: scaling_param (heads,1,1) -> (heads,); 1x1 conv weights stored
        # as (Cin, Cout); depthwise taps as (9, C).
        mdta_scale=1.0 + n(ks[2], (num_heads,)),
        mdta_w1=n(ks[3], (channels, 3 * channels)),
        mdta_w2=n(ks[4], (9, 3 * channels)),
        mdta_w3=n(ks[5], (channels, channels)),
        # GDFN
        gdfn_w1=n(ks[6], (channels, 2 * hidden)),
        gdfn_w2a=n(ks[7], (9, 2 * hidden)),   # PyTorch conv2.weight[:, 0, ky, kx]
        gdfn_w2b=n(ks[8], (9, 2 * hidden)),   # PyTorch conv2.weight[:, 1, ky, kx]
        gdfn_w3=n(ks[9], (hidden, channels)),
    )


# ----------------------------------------------------------------------------
# Pure-JAX reference (mirrors the PyTorch forward) for a numerical self-check
# ----------------------------------------------------------------------------
def transformer_block_reference(x, params, *, num_heads):
    B, C, H, W = x.shape
    HW = H * W
    hid = params["gdfn_w3"].shape[0]
    d = C // num_heads
    P = jax.lax.Precision.HIGHEST

    def ln(t):
        m = jnp.mean(t, axis=-1, keepdims=True)
        v = jnp.mean((t - m) ** 2, axis=-1, keepdims=True)
        return (t - m) / jnp.sqrt(v + 1e-5) * params["ln1_w"] + params["ln1_b"]

    def dw3x3(t, w9c):
        tp = jnp.pad(t, ((0, 0), (1, 1), (1, 1), (0, 0)))
        out = jnp.zeros_like(t)
        for ky in range(3):
            for kx in range(3):
                out = out + tp[:, ky:ky + H, kx:kx + W, :] * w9c[ky * 3 + kx]
        return out

    x_seq = jnp.transpose(x.reshape(B, C, HW), (0, 2, 1))
    x1 = ln(x_seq)
    qkv = jnp.einsum("bnc,cd->bnd", x1, params["mdta_w1"], precision=P)
    qkv = dw3x3(qkv.reshape(B, H, W, 3 * C), params["mdta_w2"]).reshape(B, HW, 3 * C)

    def heads(t):
        return jnp.transpose(t, (0, 2, 1)).reshape(B, num_heads, d, HW)

    q = heads(qkv[..., :C])
    k = heads(qkv[..., C:2 * C])
    v = heads(qkv[..., 2 * C:])
    q = q / jnp.maximum(jnp.linalg.norm(q, axis=-1, keepdims=True), 1e-12)
    k = k / jnp.maximum(jnp.linalg.norm(k, axis=-1, keepdims=True), 1e-12)
    s = jnp.einsum("bhiw,bhjw->bhij", q, k, precision=P)
    s = s * params["mdta_scale"][None, :, None, None]
    attn = jax.nn.softmax(s, axis=-1)
    o = jnp.einsum("bhij,bhjw->bhiw", attn, v, precision=P)
    o = jnp.transpose(o.reshape(B, C, HW), (0, 2, 1))
    mdta_out = jnp.einsum("bnc,cd->bnd", o, params["mdta_w3"], precision=P)

    x2 = ln(mdta_out)
    h12 = jnp.einsum("bnc,cd->bnd", x2, params["gdfn_w1"], precision=P)
    h12 = h12.reshape(B, H, W, 2 * hid)
    xa = jnp.repeat(h12[..., 0::2], 2, axis=-1)
    xb = jnp.repeat(h12[..., 1::2], 2, axis=-1)
    conv2 = (dw3x3(xa, params["gdfn_w2a"]) +
             dw3x3(xb, params["gdfn_w2b"])).reshape(B, HW, 2 * hid)
    x1g, x2g = conv2[..., :hid], conv2[..., hid:]
    gated = jax.nn.gelu(x2g, approximate=False) * x1g
    y = jnp.einsum("bnh,hc->bnc", gated, params["gdfn_w3"], precision=P) + x2
    return jnp.transpose(y, (0, 2, 1)).reshape(B, C, H, W)


if __name__ == "__main__":
    B, C, H, W = 2, 8, 8, 8
    num_heads, expansion_factor = 2, 2.0

    root = jax.random.PRNGKey(0)
    k_params, k_input = jax.random.split(root)
    params = init_params(k_params, C, num_heads, expansion_factor)
    x = jax.random.normal(k_input, (B, C, H, W), jnp.float32)

    fwd = jax.jit(functools.partial(transformer_block, num_heads=num_heads))
    out = jax.block_until_ready(fwd(x, params))
    assert out.shape == (B, C, H, W)
    assert bool(jnp.all(jnp.isfinite(out)))

    ref = jax.block_until_ready(
        transformer_block_reference(x, params, num_heads=num_heads))
    assert bool(jnp.allclose(out, ref, rtol=2e-2, atol=2e-2)), (
        "max abs diff vs reference: %e" % float(jnp.max(jnp.abs(out - ref))))

    print("KERNEL_OK")
</pallas_src>

<mosaic_0001>
module attributes {stable_mosaic.version = 11 : i64} {
  func.func @_ln_matmul_kernel(%arg0: i32, %arg1: memref<128x8xf32, #tpu.memory_space<vmem>>, %arg2: memref<1x8xf32, #tpu.memory_space<vmem>>, %arg3: memref<1x8xf32, #tpu.memory_space<vmem>>, %arg4: memref<8x24xf32, #tpu.memory_space<vmem>>, %arg5: memref<128x24xf32, #tpu.memory_space<vmem>>) attributes {dimension_semantics = [#tpu.dimension_semantics<parallel>], iteration_bounds = array<i64: 1>, scalar_prefetch = 0 : i64, scratch_operands = 0 : i64, tpu.core_type = #tpu.core_type<tc>, window_params = [{transform_indices = @transform_0, window_bounds = array<i64: 128, 8>}, {pipeline_mode = #tpu.pipeline_mode<synchronous>, transform_indices = @transform_1, window_bounds = array<i64: 1, 8>}, {pipeline_mode = #tpu.pipeline_mode<synchronous>, transform_indices = @transform_2, window_bounds = array<i64: 1, 8>}, {pipeline_mode = #tpu.pipeline_mode<synchronous>, transform_indices = @transform_3, window_bounds = array<i64: 8, 24>}, {transform_indices = @transform_4, window_bounds = array<i64: 128, 24>}]} {
    %c0 = arith.constant 0 : index
    %c0_0 = arith.constant 0 : index
    %0 = vector.load %arg1[%c0, %c0_0] : memref<128x8xf32, #tpu.memory_space<vmem>>, vector<128x8xf32>
    %cst = arith.constant dense<0.000000e+00> : vector<128xf32>
    %1 = vector.multi_reduction <add>, %0, %cst [1] : vector<128x8xf32> to vector<128xf32>
    %2 = vector.shape_cast %1 : vector<128xf32> to vector<128x1xf32>
    %cst_1 = arith.constant 8.000000e+00 : f32
    %3 = vector.broadcast %cst_1 : f32 to vector<128x1xf32>
    %4 = arith.divf %2, %3 : vector<128x1xf32>
    %5 = vector.broadcast %4 : vector<128x1xf32> to vector<128x8xf32>
    %6 = arith.subf %0, %5 : vector<128x8xf32>
    %7 = arith.mulf %6, %6 : vector<128x8xf32>
    %cst_2 = arith.constant dense<0.000000e+00> : vector<128xf32>
    %8 = vector.multi_reduction <add>, %7, %cst_2 [1] : vector<128x8xf32> to vector<128xf32>
    %9 = vector.shape_cast %8 : vector<128xf32> to vector<128x1xf32>
    %cst_3 = arith.constant 8.000000e+00 : f32
    %10 = vector.broadcast %cst_3 : f32 to vector<128x1xf32>
    %11 = arith.divf %9, %10 : vector<128x1xf32>
    %cst_4 = arith.constant 9.99999974E-6 : f32
    %12 = vector.broadcast %cst_4 : f32 to vector<128x1xf32>
    %13 = arith.addf %11, %12 : vector<128x1xf32>
    %14 = math.rsqrt %13 : vector<128x1xf32>
    %15 = vector.broadcast %14 : vector<128x1xf32> to vector<128x8xf32>
    %16 = arith.mulf %6, %15 : vector<128x8xf32>
    %c0_5 = arith.constant 0 : index
    %c0_6 = arith.constant 0 : index
    %17 = vector.load %arg2[%c0_5, %c0_6] : memref<1x8xf32, #tpu.memory_space<vmem>>, vector<1x8xf32>
    %18 = vector.broadcast %17 : vector<1x8xf32> to vector<128x8xf32>
    %19 = arith.mulf %16, %18 : vector<128x8xf32>
    %c0_7 = arith.constant 0 : index
    %c0_8 = arith.constant 0 : index
    %20 = vector.load %arg3[%c0_7, %c0_8] : memref<1x8xf32, #tpu.memory_space<vmem>>, vector<1x8xf32>
    %21 = vector.broadcast %20 : vector<1x8xf32> to vector<128x8xf32>
    %22 = arith.addf %19, %21 : vector<128x8xf32>
    %c0_9 = arith.constant 0 : index
    %c0_10 = arith.constant 0 : index
    %23 = vector.load %arg4[%c0_9, %c0_10] : memref<8x24xf32, #tpu.memory_space<vmem>>, vector<8x24xf32>
    %cst_11 = arith.constant dense<0.000000e+00> : vector<128x24xf32>
    %24 = tpu.matmul %22, %23, %cst_11 {dimension_numbers = #tpu.dot_dimension_numbers<[1], [0], [0], [1], [0, 0, 1, 1], [], []>} : vector<128x8xf32>, vector<8x24xf32>, vector<128x24xf32> -> vector<128x24xf32>
    %c0_12 = arith.constant 0 : index
    %c0_13 = arith.constant 0 : index
    %25 = vector.load %arg5[%c0_12, %c0_13] : memref<128x24xf32, #tpu.memory_space<vmem>>, vector<128x24xf32>
    tpu.vector_store %arg5[%c0_12, %c0_13], %24 {strides = array<i32>} : memref<128x24xf32, #tpu.memory_space<vmem>>, vector<128x24xf32>,
    return
  }
  func.func @transform_0(%arg0: i32) -> (i32, i32) {
    %c0_i32 = arith.constant 0 : i32
    %c0_i32_0 = arith.constant 0 : i32
    return %arg0, %c0_i32 : i32, i32
  }
  func.func @transform_1(%arg0: i32) -> (i32, i32) {
    %c0_i32 = arith.constant 0 : i32
    %c0_i32_0 = arith.constant 0 : i32
    %c0_i32_1 = arith.constant 0 : i32
    return %c0_i32, %c0_i32_0 : i32, i32
  }
  func.func @transform_2(%arg0: i32) -> (i32, i32) {
    %c0_i32 = arith.constant 0 : i32
    %c0_i32_0 = arith.constant 0 : i32
    %c0_i32_1 = arith.constant 0 : i32
    return %c0_i32, %c0_i32_0 : i32, i32
  }
  func.func @transform_3(%arg0: i32) -> (i32, i32) {
    %c0_i32 = arith.constant 0 : i32
    %c0_i32_0 = arith.constant 0 : i32
    %c0_i32_1 = arith.constant 0 : i32
    return %c0_i32, %c0_i32_0 : i32, i32
  }
  func.func @transform_4(%arg0: i32) -> (i32, i32) {
    %c0_i32 = arith.constant 0 : i32
    %c0_i32_0 = arith.constant 0 : i32
    return %arg0, %c0_i32 : i32, i32
  }
}

module attributes {stable_mosaic.version = 11 : i64} {
  func.func @_dwconv3x3_kernel(%arg0: i32, %arg1: memref<1x8x8x24xf32, #tpu.memory_space<vmem>>, %arg2: memref<9x24xf32, #tpu.memory_space<vmem>>, %arg3: memref<1x8x8x24xf32, #tpu.memory_space<vmem>>, %arg4: memref<10x17x24xf32, #tpu.memory_space<vmem>>) attributes {dimension_semantics = [#tpu.dimension_semantics<parallel>], iteration_bounds = array<i64: 2>, scalar_prefetch = 0 : i64, scratch_operands = 1 : i64, tpu.core_type = #tpu.core_type<tc>, window_params = [{transform_indices = @transform_0, window_bounds = array<i64: 1, 8, 8, 24>}, {pipeline_mode = #tpu.pipeline_mode<synchronous>, transform_indices = @transform_1, window_bounds = array<i64: 9, 24>}, {transform_indices = @transform_2, window_bounds = array<i64: 1, 8, 8, 24>}]} {
    %cst = arith.constant 0.000000e+00 : f32
    %0 = vector.broadcast %cst : f32 to vector<10x17x24xf32>
    %c0 = arith.constant 0 : index
    %c0_0 = arith.constant 0 : index
    %c0_1 = arith.constant 0 : index
    %1 = vector.load %arg4[%c0, %c0_0, %c0_1] : memref<10x17x24xf32, #tpu.memory_space<vmem>>, vector<10x17x24xf32>
    tpu.vector_store %arg4[%c0, %c0_0, %c0_1], %0 {strides = array<i32>} : memref<10x17x24xf32, #tpu.memory_space<vmem>>, vector<10x17x24xf32>,
    %cst_2 = arith.constant 0.000000e+00 : f32
    %2 = vector.broadcast %cst_2 : f32 to vector<8x8x24xf32>
    %c0_3 = arith.constant 0 : index
    %c0_4 = arith.constant 0 : index
    %c0_5 = arith.constant 0 : index
    %c0_6 = arith.constant 0 : index
    %3 = vector.load %arg1[%c0_3, %c0_4, %c0_5, %c0_6] : memref<1x8x8x24xf32, #tpu.memory_space<vmem>>, vector<1x8x8x24xf32>
    %4 = vector.shape_cast %3 : vector<1x8x8x24xf32> to vector<8x8x24xf32>
    %c1 = arith.constant 1 : index
    %c8 = arith.constant 8 : index
    %c0_7 = arith.constant 0 : index
    %5 = vector.load %arg4[%c1, %c8, %c0_7] : memref<10x17x24xf32, #tpu.memory_space<vmem>>, vector<8x8x24xf32>
    tpu.vector_store %arg4[%c1, %c8, %c0_7], %4 {strides = array<i32>} : memref<10x17x24xf32, #tpu.memory_space<vmem>>, vector<8x8x24xf32>,
    %c0_8 = arith.constant 0 : index
    %c0_9 = arith.constant 0 : index
    %6 = vector.load %arg2[%c0_8, %c0_9] : memref<9x24xf32, #tpu.memory_space<vmem>>, vector<9x24xf32>
    %c0_10 = arith.constant 0 : index
    %c7 = arith.constant 7 : index
    %c0_11 = arith.constant 0 : index
    %7 = vector.load %arg4[%c0_10, %c7, %c0_11] : memref<10x17x24xf32, #tpu.memory_space<vmem>>, vector<8x8x24xf32>
    %8 = vector.extract_strided_slice %6 {offsets = [0, 0], sizes = [1, 24], strides = [1, 1]} : vector<9x24xf32> to vector<1x24xf32>
    %9 = vector.shape_cast %8 : vector<1x24xf32> to vector<1x1x24xf32>
    %10 = vector.broadcast %9 : vector<1x1x24xf32> to vector<8x8x24xf32>
    %11 = arith.mulf %7, %10 : vector<8x8x24xf32>
    %12 = arith.addf %2, %11 : vector<8x8x24xf32>
    %c0_12 = arith.constant 0 : index
    %c8_13 = arith.constant 8 : index
    %c0_14 = arith.constant 0 : index
    %13 = vector.load %arg4[%c0_12, %c8_13, %c0_14] : memref<10x17x24xf32, #tpu.memory_space<vmem>>, vector<8x8x24xf32>
    %14 = vector.extract_strided_slice %6 {offsets = [1, 0], sizes = [1, 24], strides = [1, 1]} : vector<9x24xf32> to vector<1x24xf32>
    %15 = vector.shape_cast %14 : vector<1x24xf32> to vector<1x1x24xf32>
    %16 = vector.broadcast %15 : vector<1x1x24xf32> to vector<8x8x24xf32>
    %17 = arith.mulf %13, %16 : vector<8x8x24xf32>
    %18 = arith.addf %12, %17 : vector<8x8x24xf32>
    %c0_15 = arith.constant 0 : index
    %c9 = arith.constant 9 : index
    %c0_16 = arith.constant 0 : index
    %19 = vector.load %arg4[%c0_15, %c9, %c0_16] : memref<10x17x24xf32, #tpu.memory_space<vmem>>, vector<8x8x24xf32>
    %20 = vector.extract_strided_slice %6 {offsets = [2, 0], sizes = [1, 24], strides = [1, 1]} : vector<9x24xf32> to vector<1x24xf32>
    %21 = vector.shape_cast %20 : vector<1x24xf32> to vector<1x1x24xf32>
    %22 = vector.broadcast %21 : vector<1x1x24xf32> to vector<8x8x24xf32>
    %23 = arith.mulf %19, %22 : vector<8x8x24xf32>
    %24 = arith.addf %18, %23 : vector<8x8x24xf32>
    %c1_17 = arith.constant 1 : index
    %c7_18 = arith.constant 7 : index
    %c0_19 = arith.constant 0 : index
    %25 = vector.load %arg4[%c1_17, %c7_18, %c0_19] : memref<10x17x24xf32, #tpu.memory_space<vmem>>, vector<8x8x24xf32>
    %26 = vector.extract_strided_slice %6 {offsets = [3, 0], sizes = [1, 24], strides = [1, 1]} : vector<9x24xf32> to vector<1x24xf32>
    %27 = vector.shape_cast %26 : vector<1x24xf32> to vector<1x1x24xf32>
    %28 = vector.broadcast %27 : vector<1x1x24xf32> to vector<8x8x24xf32>
    %29 = arith.mulf %25, %28 : vector<8x8x24xf32>
    %30 = arith.addf %24, %29 : vector<8x8x24xf32>
    %c1_20 = arith.constant 1 : index
    %c8_21 = arith.constant 8 : index
    %c0_22 = arith.constant 0 : index
    %31 = vector.load %arg4[%c1_20, %c8_21, %c0_22] : memref<10x17x24xf32, #tpu.memory_space<vmem>>, vector<8x8x24xf32>
    %32 = vector.extract_strided_slice %6 {offsets = [4, 0], sizes = [1, 24], strides = [1, 1]} : vector<9x24xf32> to vector<1x24xf32>
    %33 = vector.shape_cast %32 : vector<1x24xf32> to vector<1x1x24xf32>
    %34 = vector.broadcast %33 : vector<1x1x24xf32> to vector<8x8x24xf32>
    %35 = arith.mulf %31, %34 : vector<8x8x24xf32>
    %36 = arith.addf %30, %35 : vector<8x8x24xf32>
    %c1_23 = arith.constant 1 : index
    %c9_24 = arith.constant 9 : index
    %c0_25 = arith.constant 0 : index
    %37 = vector.load %arg4[%c1_23, %c9_24, %c0_25] : memref<10x17x24xf32, #tpu.memory_space<vmem>>, vector<8x8x24xf32>
    %38 = vector.extract_strided_slice %6 {offsets = [5, 0], sizes = [1, 24], strides = [1, 1]} : vector<9x24xf32> to vector<1x24xf32>
    %39 = vector.shape_cast %38 : vector<1x24xf32> to vector<1x1x24xf32>
    %40 = vector.broadcast %39 : vector<1x1x24xf32> to vector<8x8x24xf32>
    %41 = arith.mulf %37, %40 : vector<8x8x24xf32>
    %42 = arith.addf %36, %41 : vector<8x8x24xf32>
    %c2 = arith.constant 2 : index
    %c7_26 = arith.constant 7 : index
    %c0_27 = arith.constant 0 : index
    %43 = vector.load %arg4[%c2, %c7_26, %c0_27] : memref<10x17x24xf32, #tpu.memory_space<vmem>>, vector<8x8x24xf32>
    %44 = vector.extract_strided_slice %6 {offsets = [6, 0], sizes = [1, 24], strides = [1, 1]} : vector<9x24xf32> to vector<1x24xf32>
    %45 = vector.shape_cast %44 : vector<1x24xf32> to vector<1x1x24xf32>
    %46 = vector.broadcast %45 : vector<1x1x24xf32> to vector<8x8x24xf32>
    %47 = arith.mulf %43, %46 : vector<8x8x24xf32>
    %48 = arith.addf %42, %47 : vector<8x8x24xf32>
    %c2_28 = arith.constant 2 : index
    %c8_29 = arith.constant 8 : index
    %c0_30 = arith.constant 0 : index
    %49 = vector.load %arg4[%c2_28, %c8_29, %c0_30] : memref<10x17x24xf32, #tpu.memory_space<vmem>>, vector<8x8x24xf32>
    %50 = vector.extract_strided_slice %6 {offsets = [7, 0], sizes = [1, 24], strides = [1, 1]} : vector<9x24xf32> to vector<1x24xf32>
    %51 = vector.shape_cast %50 : vector<1x24xf32> to vector<1x1x24xf32>
    %52 = vector.broadcast %51 : vector<1x1x24xf32> to vector<8x8x24xf32>
    %53 = arith.mulf %49, %52 : vector<8x8x24xf32>
    %54 = arith.addf %48, %53 : vector<8x8x24xf32>
    %c2_31 = arith.constant 2 : index
    %c9_32 = arith.constant 9 : index
    %c0_33 = arith.constant 0 : index
    %55 = vector.load %arg4[%c2_31, %c9_32, %c0_33] : memref<10x17x24xf32, #tpu.memory_space<vmem>>, vector<8x8x24xf32>
    %56 = vector.extract_strided_slice %6 {offsets = [8, 0], sizes = [1, 24], strides = [1, 1]} : vector<9x24xf32> to vector<1x24xf32>
    %57 = vector.shape_cast %56 : vector<1x24xf32> to vector<1x1x24xf32>
    %58 = vector.broadcast %57 : vector<1x1x24xf32> to vector<8x8x24xf32>
    %59 = arith.mulf %55, %58 : vector<8x8x24xf32>
    %60 = arith.addf %54, %59 : vector<8x8x24xf32>
    %c0_34 = arith.constant 0 : index
    %c0_35 = arith.constant 0 : index
    %c0_36 = arith.constant 0 : index
    %c0_37 = arith.constant 0 : index
    %61 = vector.load %arg3[%c0_34, %c0_35, %c0_36, %c0_37] : memref<1x8x8x24xf32, #tpu.memory_space<vmem>>, vector<1x8x8x24xf32>
    %62 = vector.shape_cast %61 : vector<1x8x8x24xf32> to vector<8x8x24xf32>
    %63 = vector.shape_cast %60 : vector<8x8x24xf32> to vector<1x8x8x24xf32>
    tpu.vector_store %arg3[%c0_34, %c0_35, %c0_36, %c0_37], %63 {strides = array<i32>} : memref<1x8x8x24xf32, #tpu.memory_space<vmem>>, vector<1x8x8x24xf32>,
    return
  }
  func.func @transform_0(%arg0: i32) -> (i32, i32, i32, i32) {
    %c0_i32 = arith.constant 0 : i32
    %c0_i32_0 = arith.constant 0 : i32
    %c0_i32_1 = arith.constant 0 : i32
    %c0_i32_2 = arith.constant 0 : i32
    return %arg0, %c0_i32, %c0_i32_0, %c0_i32_1 : i32, i32, i32, i32
  }
  func.func @transform_1(%arg0: i32) -> (i32, i32) {
    %c0_i32 = arith.constant 0 : i32
    %c0_i32_0 = arith.constant 0 : i32
    %c0_i32_1 = arith.constant 0 : i32
    return %c0_i32, %c0_i32_0 : i32, i32
  }
  func.func @transform_2(%arg0: i32) -> (i32, i32, i32, i32) {
    %c0_i32 = arith.constant 0 : i32
    %c0_i32_0 = arith.constant 0 : i32
    %c0_i32_1 = arith.constant 0 : i32
    %c0_i32_2 = arith.constant 0 : i32
    return %arg0, %c0_i32, %c0_i32_0, %c0_i32_1 : i32, i32, i32, i32
  }
}

module attributes {stable_mosaic.version = 11 : i64} {
  func.func @_gdfn_groupconv_kernel(%arg0: i32, %arg1: memref<1x8x8x32xf32, #tpu.memory_space<vmem>>, %arg2: memref<1x8x8x32xf32, #tpu.memory_space<vmem>>, %arg3: memref<9x32xf32, #tpu.memory_space<vmem>>, %arg4: memref<9x32xf32, #tpu.memory_space<vmem>>, %arg5: memref<1x8x8x32xf32, #tpu.memory_space<vmem>>, %arg6: memref<10x17x32xf32, #tpu.memory_space<vmem>>) attributes {dimension_semantics = [#tpu.dimension_semantics<parallel>], iteration_bounds = array<i64: 2>, scalar_prefetch = 0 : i64, scratch_operands = 1 : i64, tpu.core_type = #tpu.core_type<tc>, window_params = [{transform_indices = @transform_0, window_bounds = array<i64: 1, 8, 8, 32>}, {transform_indices = @transform_1, window_bounds = array<i64: 1, 8, 8, 32>}, {pipeline_mode = #tpu.pipeline_mode<synchronous>, transform_indices = @transform_2, window_bounds = array<i64: 9, 32>}, {pipeline_mode = #tpu.pipeline_mode<synchronous>, transform_indices = @transform_3, window_bounds = array<i64: 9, 32>}, {transform_indices = @transform_4, window_bounds = array<i64: 1, 8, 8, 32>}]} {
    %cst = arith.constant 0.000000e+00 : f32
    %0 = vector.broadcast %cst : f32 to vector<10x17x32xf32>
    %c0 = arith.constant 0 : index
    %c0_0 = arith.constant 0 : index
    %c0_1 = arith.constant 0 : index
    %1 = vector.load %arg6[%c0, %c0_0, %c0_1] : memref<10x17x32xf32, #tpu.memory_space<vmem>>, vector<10x17x32xf32>
    tpu.vector_store %arg6[%c0, %c0_0, %c0_1], %0 {strides = array<i32>} : memref<10x17x32xf32, #tpu.memory_space<vmem>>, vector<10x17x32xf32>,
    %cst_2 = arith.constant 0.000000e+00 : f32
    %2 = vector.broadcast %cst_2 : f32 to vector<8x8x32xf32>
    %c0_3 = arith.constant 0 : index
    %c0_4 = arith.constant 0 : index
    %c0_5 = arith.constant 0 : index
    %c0_6 = arith.constant 0 : index
    %3 = vector.load %arg1[%c0_3, %c0_4, %c0_5, %c0_6] : memref<1x8x8x32xf32, #tpu.memory_space<vmem>>, vector<1x8x8x32xf32>
    %4 = vector.shape_cast %3 : vector<1x8x8x32xf32> to vector<8x8x32xf32>
    %c1 = arith.constant 1 : index
    %c8 = arith.constant 8 : index
    %c0_7 = arith.constant 0 : index
    %5 = vector.load %arg6[%c1, %c8, %c0_7] : memref<10x17x32xf32, #tpu.memory_space<vmem>>, vector<8x8x32xf32>
    tpu.vector_store %arg6[%c1, %c8, %c0_7], %4 {strides = array<i32>} : memref<10x17x32xf32, #tpu.memory_space<vmem>>, vector<8x8x32xf32>,
    %c0_8 = arith.constant 0 : index
    %c0_9 = arith.constant 0 : index
    %6 = vector.load %arg3[%c0_8, %c0_9] : memref<9x32xf32, #tpu.memory_space<vmem>>, vector<9x32xf32>
    %c0_10 = arith.constant 0 : index
    %c7 = arith.constant 7 : index
    %c0_11 = arith.constant 0 : index
    %7 = vector.load %arg6[%c0_10, %c7, %c0_11] : memref<10x17x32xf32, #tpu.memory_space<vmem>>, vector<8x8x32xf32>
    %8 = vector.extract_strided_slice %6 {offsets = [0, 0], sizes = [1, 32], strides = [1, 1]} : vector<9x32xf32> to vector<1x32xf32>
    %9 = vector.shape_cast %8 : vector<1x32xf32> to vector<1x1x32xf32>
    %10 = vector.broadcast %9 : vector<1x1x32xf32> to vector<8x8x32xf32>
    %11 = arith.mulf %7, %10 : vector<8x8x32xf32>
    %12 = arith.addf %2, %11 : vector<8x8x32xf32>
    %c0_12 = arith.constant 0 : index
    %c8_13 = arith.constant 8 : index
    %c0_14 = arith.constant 0 : index
    %13 = vector.load %arg6[%c0_12, %c8_13, %c0_14] : memref<10x17x32xf32, #tpu.memory_space<vmem>>, vector<8x8x32xf32>
    %14 = vector.extract_strided_slice %6 {offsets = [1, 0], sizes = [1, 32], strides = [1, 1]} : vector<9x32xf32> to vector<1x32xf32>
    %15 = vector.shape_cast %14 : vector<1x32xf32> to vector<1x1x32xf32>
    %16 = vector.broadcast %15 : vector<1x1x32xf32> to vector<8x8x32xf32>
    %17 = arith.mulf %13, %16 : vector<8x8x32xf32>
    %18 = arith.addf %12, %17 : vector<8x8x32xf32>
    %c0_15 = arith.constant 0 : index
    %c9 = arith.constant 9 : index
    %c0_16 = arith.constant 0 : index
    %19 = vector.load %arg6[%c0_15, %c9, %c0_16] : memref<10x17x32xf32, #tpu.memory_space<vmem>>, vector<8x8x32xf32>
    %20 = vector.extract_strided_slice %6 {offsets = [2, 0], sizes = [1, 32], strides = [1, 1]} : vector<9x32xf32> to vector<1x32xf32>
    %21 = vector.shape_cast %20 : vector<1x32xf32> to vector<1x1x32xf32>
    %22 = vector.broadcast %21 : vector<1x1x32xf32> to vector<8x8x32xf32>
    %23 = arith.mulf %19, %22 : vector<8x8x32xf32>
    %24 = arith.addf %18, %23 : vector<8x8x32xf32>
    %c1_17 = arith.constant 1 : index
    %c7_18 = arith.constant 7 : index
    %c0_19 = arith.constant 0 : index
    %25 = vector.load %arg6[%c1_17, %c7_18, %c0_19] : memref<10x17x32xf32, #tpu.memory_space<vmem>>, vector<8x8x32xf32>
    %26 = vector.extract_strided_slice %6 {offsets = [3, 0], sizes = [1, 32], strides = [1, 1]} : vector<9x32xf32> to vector<1x32xf32>
    %27 = vector.shape_cast %26 : vector<1x32xf32> to vector<1x1x32xf32>
    %28 = vector.broadcast %27 : vector<1x1x32xf32> to vector<8x8x32xf32>
    %29 = arith.mulf %25, %28 : vector<8x8x32xf32>
    %30 = arith.addf %24, %29 : vector<8x8x32xf32>
    %c1_20 = arith.constant 1 : index
    %c8_21 = arith.constant 8 : index
    %c0_22 = arith.constant 0 : index
    %31 = vector.load %arg6[%c1_20, %c8_21, %c0_22] : memref<10x17x32xf32, #tpu.memory_space<vmem>>, vector<8x8x32xf32>
    %32 = vector.extract_strided_slice %6 {offsets = [4, 0], sizes = [1, 32], strides = [1, 1]} : vector<9x32xf32> to vector<1x32xf32>
    %33 = vector.shape_cast %32 : vector<1x32xf32> to vector<1x1x32xf32>
    %34 = vector.broadcast %33 : vector<1x1x32xf32> to vector<8x8x32xf32>
    %35 = arith.mulf %31, %34 : vector<8x8x32xf32>
    %36 = arith.addf %30, %35 : vector<8x8x32xf32>
    %c1_23 = arith.constant 1 : index
    %c9_24 = arith.constant 9 : index
    %c0_25 = arith.constant 0 : index
    %37 = vector.load %arg6[%c1_23, %c9_24, %c0_25] : memref<10x17x32xf32, #tpu.memory_space<vmem>>, vector<8x8x32xf32>
    %38 = vector.extract_strided_slice %6 {offsets = [5, 0], sizes = [1, 32], strides = [1, 1]} : vector<9x32xf32> to vector<1x32xf32>
    %39 = vector.shape_cast %38 : vector<1x32xf32> to vector<1x1x32xf32>
    %40 = vector.broadcast %39 : vector<1x1x32xf32> to vector<8x8x32xf32>
    %41 = arith.mulf %37, %40 : vector<8x8x32xf32>
    %42 = arith.addf %36, %41 : vector<8x8x32xf32>
    %c2 = arith.constant 2 : index
    %c7_26 = arith.constant 7 : index
    %c0_27 = arith.constant 0 : index
    %43 = vector.load %arg6[%c2, %c7_26, %c0_27] : memref<10x17x32xf32, #tpu.memory_space<vmem>>, vector<8x8x32xf32>
    %44 = vector.extract_strided_slice %6 {offsets = [6, 0], sizes = [1, 32], strides = [1, 1]} : vector<9x32xf32> to vector<1x32xf32>
    %45 = vector.shape_cast %44 : vector<1x32xf32> to vector<1x1x32xf32>
    %46 = vector.broadcast %45 : vector<1x1x32xf32> to vector<8x8x32xf32>
    %47 = arith.mulf %43, %46 : vector<8x8x32xf32>
    %48 = arith.addf %42, %47 : vector<8x8x32xf32>
    %c2_28 = arith.constant 2 : index
    %c8_29 = arith.constant 8 : index
    %c0_30 = arith.constant 0 : index
    %49 = vector.load %arg6[%c2_28, %c8_29, %c0_30] : memref<10x17x32xf32, #tpu.memory_space<vmem>>, vector<8x8x32xf32>
    %50 = vector.extract_strided_slice %6 {offsets = [7, 0], sizes = [1, 32], strides = [1, 1]} : vector<9x32xf32> to vector<1x32xf32>
    %51 = vector.shape_cast %50 : vector<1x32xf32> to vector<1x1x32xf32>
    %52 = vector.broadcast %51 : vector<1x1x32xf32> to vector<8x8x32xf32>
    %53 = arith.mulf %49, %52 : vector<8x8x32xf32>
    %54 = arith.addf %48, %53 : vector<8x8x32xf32>
    %c2_31 = arith.constant 2 : index
    %c9_32 = arith.constant 9 : index
    %c0_33 = arith.constant 0 : index
    %55 = vector.load %arg6[%c2_31, %c9_32, %c0_33] : memref<10x17x32xf32, #tpu.memory_space<vmem>>, vector<8x8x32xf32>
    %56 = vector.extract_strided_slice %6 {offsets = [8, 0], sizes = [1, 32], strides = [1, 1]} : vector<9x32xf32> to vector<1x32xf32>
    %57 = vector.shape_cast %56 : vector<1x32xf32> to vector<1x1x32xf32>
    %58 = vector.broadcast %57 : vector<1x1x32xf32> to vector<8x8x32xf32>
    %59 = arith.mulf %55, %58 : vector<8x8x32xf32>
    %60 = arith.addf %54, %59 : vector<8x8x32xf32>
    %c0_34 = arith.constant 0 : index
    %c0_35 = arith.constant 0 : index
    %c0_36 = arith.constant 0 : index
    %c0_37 = arith.constant 0 : index
    %61 = vector.load %arg2[%c0_34, %c0_35, %c0_36, %c0_37] : memref<1x8x8x32xf32, #tpu.memory_space<vmem>>, vector<1x8x8x32xf32>
    %62 = vector.shape_cast %61 : vector<1x8x8x32xf32> to vector<8x8x32xf32>
    %c1_38 = arith.constant 1 : index
    %c8_39 = arith.constant 8 : index
    %c0_40 = arith.constant 0 : index
    %63 = vector.load %arg6[%c1_38, %c8_39, %c0_40] : memref<10x17x32xf32, #tpu.memory_space<vmem>>, vector<8x8x32xf32>
    tpu.vector_store %arg6[%c1_38, %c8_39, %c0_40], %62 {strides = array<i32>} : memref<10x17x32xf32, #tpu.memory_space<vmem>>, vector<8x8x32xf32>,
    %c0_41 = arith.constant 0 : index
    %c0_42 = arith.constant 0 : index
    %64 = vector.load %arg4[%c0_41, %c0_42] : memref<9x32xf32, #tpu.memory_space<vmem>>, vector<9x32xf32>
    %c0_43 = arith.constant 0 : index
    %c7_44 = arith.constant 7 : index
    %c0_45 = arith.constant 0 : index
    %65 = vector.load %arg6[%c0_43, %c7_44, %c0_45] : memref<10x17x32xf32, #tpu.memory_space<vmem>>, vector<8x8x32xf32>
    %66 = vector.extract_strided_slice %64 {offsets = [0, 0], sizes = [1, 32], strides = [1, 1]} : vector<9x32xf32> to vector<1x32xf32>
    %67 = vector.shape_cast %66 : vector<1x32xf32> to vector<1x1x32xf32>
    %68 = vector.broadcast %67 : vector<1x1x32xf32> to vector<8x8x32xf32>
    %69 = arith.mulf %65, %68 : vector<8x8x32xf32>
    %70 = arith.addf %60, %69 : vector<8x8x32xf32>
    %c0_46 = arith.constant 0 : index
    %c8_47 = arith.constant 8 : index
    %c0_48 = arith.constant 0 : index
    %71 = vector.load %arg6[%c0_46, %c8_47, %c0_48] : memref<10x17x32xf32, #tpu.memory_space<vmem>>, vector<8x8x32xf32>
    %72 = vector.extract_strided_slice %64 {offsets = [1, 0], sizes = [1, 32], strides = [1, 1]} : vector<9x32xf32> to vector<1x32xf32>
    %73 = vector.shape_cast %72 : vector<1x32xf32> to vector<1x1x32xf32>
    %74 = vector.broadcast %73 : vector<1x1x32xf32> to vector<8x8x32xf32>
    %75 = arith.mulf %71, %74 : vector<8x8x32xf32>
    %76 = arith.addf %70, %75 : vector<8x8x32xf32>
    %c0_49 = arith.constant 0 : index
    %c9_50 = arith.constant 9 : index
    %c0_51 = arith.constant 0 : index
    %77 = vector.load %arg6[%c0_49, %c9_50, %c0_51] : memref<10x17x32xf32, #tpu.memory_space<vmem>>, vector<8x8x32xf32>
    %78 = vector.extract_strided_slice %64 {offsets = [2, 0], sizes = [1, 32], strides = [1, 1]} : vector<9x32xf32> to vector<1x32xf32>
    %79 = vector.shape_cast %78 : vector<1x32xf32> to vector<1x1x32xf32>
    %80 = vector.broadcast %79 : vector<1x1x32xf32> to vector<8x8x32xf32>
    %81 = arith.mulf %77, %80 : vector<8x8x32xf32>
    %82 = arith.addf %76, %81 : vector<8x8x32xf32>
    %c1_52 = arith.constant 1 : index
    %c7_53 = arith.constant 7 : index
    %c0_54 = arith.constant 0 : index
    %83 = vector.load %arg6[%c1_52, %c7_53, %c0_54] : memref<10x17x32xf32, #tpu.memory_space<vmem>>, vector<8x8x32xf32>
    %84 = vector.extract_strided_slice %64 {offsets = [3, 0], sizes = [1, 32], strides = [1, 1]} : vector<9x32xf32> to vector<1x32xf32>
    %85 = vector.shape_cast %84 : vector<1x32xf32> to vector<1x1x32xf32>
    %86 = vector.broadcast %85 : vector<1x1x32xf32> to vector<8x8x32xf32>
    %87 = arith.mulf %83, %86 : vector<8x8x32xf32>
    %88 = arith.addf %82, %87 : vector<8x8x32xf32>
    %c1_55 = arith.constant 1 : index
    %c8_56 = arith.constant 8 : index
    %c0_57 = arith.constant 0 : index
    %89 = vector.load %arg6[%c1_55, %c8_56, %c0_57] : memref<10x17x32xf32, #tpu.memory_space<vmem>>, vector<8x8x32xf32>
    %90 = vector.extract_strided_slice %64 {offsets = [4, 0], sizes = [1, 32], strides = [1, 1]} : vector<9x32xf32> to vector<1x32xf32>
    %91 = vector.shape_cast %90 : vector<1x32xf32> to vector<1x1x32xf32>
    %92 = vector.broadcast %91 : vector<1x1x32xf32> to vector<8x8x32xf32>
    %93 = arith.mulf %89, %92 : vector<8x8x32xf32>
    %94 = arith.addf %88, %93 : vector<8x8x32xf32>
    %c1_58 = arith.constant 1 : index
    %c9_59 = arith.constant 9 : index
    %c0_60 = arith.constant 0 : index
    %95 = vector.load %arg6[%c1_58, %c9_59, %c0_60] : memref<10x17x32xf32, #tpu.memory_space<vmem>>, vector<8x8x32xf32>
    %96 = vector.extract_strided_slice %64 {offsets = [5, 0], sizes = [1, 32], strides = [1, 1]} : vector<9x32xf32> to vector<1x32xf32>
    %97 = vector.shape_cast %96 : vector<1x32xf32> to vector<1x1x32xf32>
    %98 = vector.broadcast %97 : vector<1x1x32xf32> to vector<8x8x32xf32>
    %99 = arith.mulf %95, %98 : vector<8x8x32xf32>
    %100 = arith.addf %94, %99 : vector<8x8x32xf32>
    %c2_61 = arith.constant 2 : index
    %c7_62 = arith.constant 7 : index
    %c0_63 = arith.constant 0 : index
    %101 = vector.load %arg6[%c2_61, %c7_62, %c0_63] : memref<10x17x32xf32, #tpu.memory_space<vmem>>, vector<8x8x32xf32>
    %102 = vector.extract_strided_slice %64 {offsets = [6, 0], sizes = [1, 32], strides = [1, 1]} : vector<9x32xf32> to vector<1x32xf32>
    %103 = vector.shape_cast %102 : vector<1x32xf32> to vector<1x1x32xf32>
    %104 = vector.broadcast %103 : vector<1x1x32xf32> to vector<8x8x32xf32>
    %105 = arith.mulf %101, %104 : vector<8x8x32xf32>
    %106 = arith.addf %100, %105 : vector<8x8x32xf32>
    %c2_64 = arith.constant 2 : index
    %c8_65 = arith.constant 8 : index
    %c0_66 = arith.constant 0 : index
    %107 = vector.load %arg6[%c2_64, %c8_65, %c0_66] : memref<10x17x32xf32, #tpu.memory_space<vmem>>, vector<8x8x32xf32>
    %108 = vector.extract_strided_slice %64 {offsets = [7, 0], sizes = [1, 32], strides = [1, 1]} : vector<9x32xf32> to vector<1x32xf32>
    %109 = vector.shape_cast %108 : vector<1x32xf32> to vector<1x1x32xf32>
    %110 = vector.broadcast %109 : vector<1x1x32xf32> to vector<8x8x32xf32>
    %111 = arith.mulf %107, %110 : vector<8x8x32xf32>
    %112 = arith.addf %106, %111 : vector<8x8x32xf32>
    %c2_67 = arith.constant 2 : index
    %c9_68 = arith.constant 9 : index
    %c0_69 = arith.constant 0 : index
    %113 = vector.load %arg6[%c2_67, %c9_68, %c0_69] : memref<10x17x32xf32, #tpu.memory_space<vmem>>, vector<8x8x32xf32>
    %114 = vector.extract_strided_slice %64 {offsets = [8, 0], sizes = [1, 32], strides = [1, 1]} : vector<9x32xf32> to vector<1x32xf32>
    %115 = vector.shape_cast %114 : vector<1x32xf32> to vector<1x1x32xf32>
    %116 = vector.broadcast %115 : vector<1x1x32xf32> to vector<8x8x32xf32>
    %117 = arith.mulf %113, %116 : vector<8x8x32xf32>
    %118 = arith.addf %112, %117 : vector<8x8x32xf32>
    %c0_70 = arith.constant 0 : index
    %c0_71 = arith.constant 0 : index
    %c0_72 = arith.constant 0 : index
    %c0_73 = arith.constant 0 : index
    %119 = vector.load %arg5[%c0_70, %c0_71, %c0_72, %c0_73] : memref<1x8x8x32xf32, #tpu.memory_space<vmem>>, vector<1x8x8x32xf32>
    %120 = vector.shape_cast %119 : vector<1x8x8x32xf32> to vector<8x8x32xf32>
    %121 = vector.shape_cast %118 : vector<8x8x32xf32> to vector<1x8x8x32xf32>
    tpu.vector_store %arg5[%c0_70, %c0_71, %c0_72, %c0_73], %121 {strides = array<i32>} : memref<1x8x8x32xf32, #tpu.memory_space<vmem>>, vector<1x8x8x32xf32>,
    return
  }
  func.func @transform_0(%arg0: i32) -> (i32, i32, i32, i32) {
    %c0_i32 = arith.constant 0 : i32
    %c0_i32_0 = arith.constant 0 : i32
    %c0_i32_1 = arith.constant 0 : i32
    %c0_i32_2 = arith.constant 0 : i32
    return %arg0, %c0_i32, %c0_i32_0, %c0_i32_1 : i32, i32, i32, i32
  }
  func.func @transform_1(%arg0: i32) -> (i32, i32, i32, i32) {
    %c0_i32 = arith.constant 0 : i32
    %c0_i32_0 = arith.constant 0 : i32
    %c0_i32_1 = arith.constant 0 : i32
    %c0_i32_2 = arith.constant 0 : i32
    return %arg0, %c0_i32, %c0_i32_0, %c0_i32_1 : i32, i32, i32, i32
  }
  func.func @transform_2(%arg0: i32) -> (i32, i32) {
    %c0_i32 = arith.constant 0 : i32
    %c0_i32_0 = arith.constant 0 : i32
    %c0_i32_1 = arith.constant 0 : i32
    return %c0_i32, %c0_i32_0 : i32, i32
  }
  func.func @transform_3(%arg0: i32) -> (i32, i32) {
    %c0_i32 = arith.constant 0 : i32
    %c0_i32_0 = arith.constant 0 : i32
    %c0_i32_1 = arith.constant 0 : i32
    return %c0_i32, %c0_i32_0 : i32, i32
  }
  func.func @transform_4(%arg0: i32) -> (i32, i32, i32, i32) {
    %c0_i32 = arith.constant 0 : i32
    %c0_i32_0 = arith.constant 0 : i32
    %c0_i32_1 = arith.constant 0 : i32
    %c0_i32_2 = arith.constant 0 : i32
    return %arg0, %c0_i32, %c0_i32_0, %c0_i32_1 : i32, i32, i32, i32
  }
}

module attributes {stable_mosaic.version = 11 : i64} {
  func.func @_mdta_ln_gdfn1_kernel(%arg0: i32, %arg1: memref<2xf32, #tpu.memory_space<smem>>, %arg2: memref<1x64x24xf32, #tpu.memory_space<vmem>>, %arg3: memref<1x8xf32, #tpu.memory_space<vmem>>, %arg4: memref<1x8xf32, #tpu.memory_space<vmem>>, %arg5: memref<8x8xf32, #tpu.memory_space<vmem>>, %arg6: memref<8x32xf32, #tpu.memory_space<vmem>>, %arg7: memref<8x32xf32, #tpu.memory_space<vmem>>, %arg8: memref<1x64x8xf32, #tpu.memory_space<vmem>>, %arg9: memref<1x64x32xf32, #tpu.memory_space<vmem>>, %arg10: memref<1x64x32xf32, #tpu.memory_space<vmem>>) attributes {dimension_semantics = [#tpu.dimension_semantics<parallel>], iteration_bounds = array<i64: 2>, scalar_prefetch = 0 : i64, scratch_operands = 0 : i64, tpu.core_type = #tpu.core_type<tc>, window_params = [{transform_indices = @transform_0, window_bounds = array<i64: 2>}, {transform_indices = @transform_1, window_bounds = array<i64: 1, 64, 24>}, {pipeline_mode = #tpu.pipeline_mode<synchronous>, transform_indices = @transform_2, window_bounds = array<i64: 1, 8>}, {pipeline_mode = #tpu.pipeline_mode<synchronous>, transform_indices = @transform_3, window_bounds = array<i64: 1, 8>}, {pipeline_mode = #tpu.pipeline_mode<synchronous>, transform_indices = @transform_4, window_bounds = array<i64: 8, 8>}, {pipeline_mode = #tpu.pipeline_mode<synchronous>, transform_indices = @transform_5, window_bounds = array<i64: 8, 32>}, {pipeline_mode = #tpu.pipeline_mode<synchronous>, transform_indices = @transform_6, window_bounds = array<i64: 8, 32>}, {transform_indices = @transform_7, window_bounds = array<i64: 1, 64, 8>}, {transform_indices = @transform_8, window_bounds = array<i64: 1, 64, 32>}, {transform_indices = @transform_9, window_bounds = array<i64: 1, 64, 32>}]} {
    %c0 = arith.constant 0 : index
    %c0_0 = arith.constant 0 : index
    %c0_1 = arith.constant 0 : index
    %0 = vector.load %arg2[%c0, %c0_0, %c0_1] : memref<1x64x24xf32, #tpu.memory_space<vmem>>, vector<1x64x24xf32>
    %1 = vector.shape_cast %0 : vector<1x64x24xf32> to vector<64x24xf32>
    %c0_2 = arith.constant 0 : index
    %c0_3 = arith.constant 0 : index
    %2 = vector.load %arg5[%c0_2, %c0_3] : memref<8x8xf32, #tpu.memory_space<vmem>>, vector<8x8xf32>
    %cst = arith.constant 0.000000e+00 : f32
    %3 = vector.broadcast %cst : f32 to vector<64x8xf32>
    %4 = vector.extract_strided_slice %1 {offsets = [0, 0], sizes = [64, 4], strides = [1, 1]} : vector<64x24xf32> to vector<64x4xf32>
    %5 = vector.extract_strided_slice %1 {offsets = [0, 8], sizes = [64, 4], strides = [1, 1]} : vector<64x24xf32> to vector<64x4xf32>
    %6 = vector.extract_strided_slice %1 {offsets = [0, 16], sizes = [64, 4], strides = [1, 1]} : vector<64x24xf32> to vector<64x4xf32>
    %7 = arith.mulf %4, %4 : vector<64x4xf32>
    %cst_4 = arith.constant dense<0.000000e+00> : vector<4xf32>
    %8 = vector.multi_reduction <add>, %7, %cst_4 [0] : vector<64x4xf32> to vector<4xf32>
    %9 = vector.shape_cast %8 : vector<4xf32> to vector<1x4xf32>
    %cst_5 = arith.constant 1.000000e-24 : f32
    %10 = vector.broadcast %cst_5 : f32 to vector<1x4xf32>
    %11 = arith.maximumf %9, %10 : vector<1x4xf32>
    %12 = math.rsqrt %11 : vector<1x4xf32>
    %13 = vector.broadcast %12 : vector<1x4xf32> to vector<64x4xf32>
    %14 = arith.mulf %4, %13 : vector<64x4xf32>
    %15 = arith.mulf %5, %5 : vector<64x4xf32>
    %cst_6 = arith.constant dense<0.000000e+00> : vector<4xf32>
    %16 = vector.multi_reduction <add>, %15, %cst_6 [0] : vector<64x4xf32> to vector<4xf32>
    %17 = vector.shape_cast %16 : vector<4xf32> to vector<1x4xf32>
    %cst_7 = arith.constant 1.000000e-24 : f32
    %18 = vector.broadcast %cst_7 : f32 to vector<1x4xf32>
    %19 = arith.maximumf %17, %18 : vector<1x4xf32>
    %20 = math.rsqrt %19 : vector<1x4xf32>
    %21 = vector.broadcast %20 : vector<1x4xf32> to vector<64x4xf32>
    %22 = arith.mulf %5, %21 : vector<64x4xf32>
    %cst_8 = arith.constant dense<0.000000e+00> : vector<4x4xf32>
    %23 = tpu.matmul %14, %22, %cst_8 {dimension_numbers = #tpu.dot_dimension_numbers<[0], [0], [1], [1], [0, 1, 1, 1], [], []>} : vector<64x4xf32>, vector<64x4xf32>, vector<4x4xf32> -> vector<4x4xf32>
    %c0_9 = arith.constant 0 : index
    %24 = memref.load %arg1[%c0_9] : memref<2xf32, #tpu.memory_space<smem>>
    %25 = vector.broadcast %24 : f32 to vector<4x4xf32>
    %26 = arith.mulf %23, %25 : vector<4x4xf32>
    %cst_10 = arith.constant dense<0xFF800000> : vector<4xf32>
    %27 = vector.multi_reduction <maximumf>, %26, %cst_10 [1] : vector<4x4xf32> to vector<4xf32>
    %28 = vector.shape_cast %27 : vector<4xf32> to vector<4x1xf32>
    %29 = vector.broadcast %28 : vector<4x1xf32> to vector<4x4xf32>
    %30 = arith.subf %26, %29 : vector<4x4xf32>
    %31 = math.exp %30 : vector<4x4xf32>
    %cst_11 = arith.constant dense<0.000000e+00> : vector<4xf32>
    %32 = vector.multi_reduction <add>, %31, %cst_11 [1] : vector<4x4xf32> to vector<4xf32>
    %33 = vector.shape_cast %32 : vector<4xf32> to vector<4x1xf32>
    %34 = tpu.reciprocal %33 : vector<4x1xf32> -> vector<4x1xf32>
    %35 = vector.broadcast %34 : vector<4x1xf32> to vector<4x4xf32>
    %36 = arith.mulf %31, %35 : vector<4x4xf32>
    %cst_12 = arith.constant dense<0.000000e+00> : vector<64x4xf32>
    %37 = tpu.matmul %6, %36, %cst_12 {dimension_numbers = #tpu.dot_dimension_numbers<[1], [1], [0], [0], [0, 0, 1, 0], [], []>} : vector<64x4xf32>, vector<4x4xf32>, vector<64x4xf32> -> vector<64x4xf32>
    %38 = vector.extract_strided_slice %2 {offsets = [0, 0], sizes = [4, 8], strides = [1, 1]} : vector<8x8xf32> to vector<4x8xf32>
    %cst_13 = arith.constant dense<0.000000e+00> : vector<64x8xf32>
    %39 = tpu.matmul %37, %38, %cst_13 {dimension_numbers = #tpu.dot_dimension_numbers<[1], [0], [0], [1], [0, 0, 1, 1], [], []>} : vector<64x4xf32>, vector<4x8xf32>, vector<64x8xf32> -> vector<64x8xf32>
    %40 = arith.addf %3, %39 : vector<64x8xf32>
    %41 = vector.extract_strided_slice %1 {offsets = [0, 4], sizes = [64, 4], strides = [1, 1]} : vector<64x24xf32> to vector<64x4xf32>
    %42 = vector.extract_strided_slice %1 {offsets = [0, 12], sizes = [64, 4], strides = [1, 1]} : vector<64x24xf32> to vector<64x4xf32>
    %43 = vector.extract_strided_slice %1 {offsets = [0, 20], sizes = [64, 4], strides = [1, 1]} : vector<64x24xf32> to vector<64x4xf32>
    %44 = arith.mulf %41, %41 : vector<64x4xf32>
    %cst_14 = arith.constant dense<0.000000e+00> : vector<4xf32>
    %45 = vector.multi_reduction <add>, %44, %cst_14 [0] : vector<64x4xf32> to vector<4xf32>
    %46 = vector.shape_cast %45 : vector<4xf32> to vector<1x4xf32>
    %cst_15 = arith.constant 1.000000e-24 : f32
    %47 = vector.broadcast %cst_15 : f32 to vector<1x4xf32>
    %48 = arith.maximumf %46, %47 : vector<1x4xf32>
    %49 = math.rsqrt %48 : vector<1x4xf32>
    %50 = vector.broadcast %49 : vector<1x4xf32> to vector<64x4xf32>
    %51 = arith.mulf %41, %50 : vector<64x4xf32>
    %52 = arith.mulf %42, %42 : vector<64x4xf32>
    %cst_16 = arith.constant dense<0.000000e+00> : vector<4xf32>
    %53 = vector.multi_reduction <add>, %52, %cst_16 [0] : vector<64x4xf32> to vector<4xf32>
    %54 = vector.shape_cast %53 : vector<4xf32> to vector<1x4xf32>
    %cst_17 = arith.constant 1.000000e-24 : f32
    %55 = vector.broadcast %cst_17 : f32 to vector<1x4xf32>
    %56 = arith.maximumf %54, %55 : vector<1x4xf32>
    %57 = math.rsqrt %56 : vector<1x4xf32>
    %58 = vector.broadcast %57 : vector<1x4xf32> to vector<64x4xf32>
    %59 = arith.mulf %42, %58 : vector<64x4xf32>
    %cst_18 = arith.constant dense<0.000000e+00> : vector<4x4xf32>
    %60 = tpu.matmul %51, %59, %cst_18 {dimension_numbers = #tpu.dot_dimension_numbers<[0], [0], [1], [1], [0, 1, 1, 1], [], []>} : vector<64x4xf32>, vector<64x4xf32>, vector<4x4xf32> -> vector<4x4xf32>
    %c1 = arith.constant 1 : index
    %61 = memref.load %arg1[%c1] : memref<2xf32, #tpu.memory_space<smem>>
    %62 = vector.broadcast %61 : f32 to vector<4x4xf32>
    %63 = arith.mulf %60, %62 : vector<4x4xf32>
    %cst_19 = arith.constant dense<0xFF800000> : vector<4xf32>
    %64 = vector.multi_reduction <maximumf>, %63, %cst_19 [1] : vector<4x4xf32> to vector<4xf32>
    %65 = vector.shape_cast %64 : vector<4xf32> to vector<4x1xf32>
    %66 = vector.broadcast %65 : vector<4x1xf32> to vector<4x4xf32>
    %67 = arith.subf %63, %66 : vector<4x4xf32>
    %68 = math.exp %67 : vector<4x4xf32>
    %cst_20 = arith.constant dense<0.000000e+00> : vector<4xf32>
    %69 = vector.multi_reduction <add>, %68, %cst_20 [1] : vector<4x4xf32> to vector<4xf32>
    %70 = vector.shape_cast %69 : vector<4xf32> to vector<4x1xf32>
    %71 = tpu.reciprocal %70 : vector<4x1xf32> -> vector<4x1xf32>
    %72 = vector.broadcast %71 : vector<4x1xf32> to vector<4x4xf32>
    %73 = arith.mulf %68, %72 : vector<4x4xf32>
    %cst_21 = arith.constant dense<0.000000e+00> : vector<64x4xf32>
    %74 = tpu.matmul %43, %73, %cst_21 {dimension_numbers = #tpu.dot_dimension_numbers<[1], [1], [0], [0], [0, 0, 1, 0], [], []>} : vector<64x4xf32>, vector<4x4xf32>, vector<64x4xf32> -> vector<64x4xf32>
    %75 = vector.extract_strided_slice %2 {offsets = [4, 0], sizes = [4, 8], strides = [1, 1]} : vector<8x8xf32> to vector<4x8xf32>
    %cst_22 = arith.constant dense<0.000000e+00> : vector<64x8xf32>
    %76 = tpu.matmul %74, %75, %cst_22 {dimension_numbers = #tpu.dot_dimension_numbers<[1], [0], [0], [1], [0, 0, 1, 1], [], []>} : vector<64x4xf32>, vector<4x8xf32>, vector<64x8xf32> -> vector<64x8xf32>
    %77 = arith.addf %40, %76 : vector<64x8xf32>
    %cst_23 = arith.constant dense<0.000000e+00> : vector<64xf32>
    %78 = vector.multi_reduction <add>, %77, %cst_23 [1] : vector<64x8xf32> to vector<64xf32>
    %79 = vector.shape_cast %78 : vector<64xf32> to vector<64x1xf32>
    %cst_24 = arith.constant 8.000000e+00 : f32
    %80 = vector.broadcast %cst_24 : f32 to vector<64x1xf32>
    %81 = arith.divf %79, %80 : vector<64x1xf32>
    %82 = vector.broadcast %81 : vector<64x1xf32> to vector<64x8xf32>
    %83 = arith.subf %77, %82 : vector<64x8xf32>
    %84 = arith.mulf %83, %83 : vector<64x8xf32>
    %cst_25 = arith.constant dense<0.000000e+00> : vector<64xf32>
    %85 = vector.multi_reduction <add>, %84, %cst_25 [1] : vector<64x8xf32> to vector<64xf32>
    %86 = vector.shape_cast %85 : vector<64xf32> to vector<64x1xf32>
    %cst_26 = arith.constant 8.000000e+00 : f32
    %87 = vector.broadcast %cst_26 : f32 to vector<64x1xf32>
    %88 = arith.divf %86, %87 : vector<64x1xf32>
    %cst_27 = arith.constant 9.99999974E-6 : f32
    %89 = vector.broadcast %cst_27 : f32 to vector<64x1xf32>
    %90 = arith.addf %88, %89 : vector<64x1xf32>
    %91 = math.rsqrt %90 : vector<64x1xf32>
    %92 = vector.broadcast %91 : vector<64x1xf32> to vector<64x8xf32>
    %93 = arith.mulf %83, %92 : vector<64x8xf32>
    %c0_28 = arith.constant 0 : index
    %c0_29 = arith.constant 0 : index
    %94 = vector.load %arg3[%c0_28, %c0_29] : memref<1x8xf32, #tpu.memory_space<vmem>>, vector<1x8xf32>
    %95 = vector.broadcast %94 : vector<1x8xf32> to vector<64x8xf32>
    %96 = arith.mulf %93, %95 : vector<64x8xf32>
    %c0_30 = arith.constant 0 : index
    %c0_31 = arith.constant 0 : index
    %97 = vector.load %arg4[%c0_30, %c0_31] : memref<1x8xf32, #tpu.memory_space<vmem>>, vector<1x8xf32>
    %98 = vector.broadcast %97 : vector<1x8xf32> to vector<64x8xf32>
    %99 = arith.addf %96, %98 : vector<64x8xf32>
    %c0_32 = arith.constant 0 : index
    %c0_33 = arith.constant 0 : index
    %c0_34 = arith.constant 0 : index
    %100 = vector.load %arg8[%c0_32, %c0_33, %c0_34] : memref<1x64x8xf32, #tpu.memory_space<vmem>>, vector<1x64x8xf32>
    %101 = vector.shape_cast %100 : vector<1x64x8xf32> to vector<64x8xf32>
    %102 = vector.shape_cast %99 : vector<64x8xf32> to vector<1x64x8xf32>
    tpu.vector_store %arg8[%c0_32, %c0_33, %c0_34], %102 {strides = array<i32>} : memref<1x64x8xf32, #tpu.memory_space<vmem>>, vector<1x64x8xf32>,
    %c0_35 = arith.constant 0 : index
    %c0_36 = arith.constant 0 : index
    %103 = vector.load %arg6[%c0_35, %c0_36] : memref<8x32xf32, #tpu.memory_space<vmem>>, vector<8x32xf32>
    %cst_37 = arith.constant dense<0.000000e+00> : vector<64x32xf32>
    %104 = tpu.matmul %99, %103, %cst_37 {dimension_numbers = #tpu.dot_dimension_numbers<[1], [0], [0], [1], [0, 0, 1, 1], [], []>} : vector<64x8xf32>, vector<8x32xf32>, vector<64x32xf32> -> vector<64x32xf32>
    %c0_38 = arith.constant 0 : index
    %c0_39 = arith.constant 0 : index
    %c0_40 = arith.constant 0 : index
    %105 = vector.load %arg9[%c0_38, %c0_39, %c0_40] : memref<1x64x32xf32, #tpu.memory_space<vmem>>, vector<1x64x32xf32>
    %106 = vector.shape_cast %105 : vector<1x64x32xf32> to vector<64x32xf32>
    %107 = vector.shape_cast %104 : vector<64x32xf32> to vector<1x64x32xf32>
    tpu.vector_store %arg9[%c0_38, %c0_39, %c0_40], %107 {strides = array<i32>} : memref<1x64x32xf32, #tpu.memory_space<vmem>>, vector<1x64x32xf32>,
    %c0_41 = arith.constant 0 : index
    %c0_42 = arith.constant 0 : index
    %108 = vector.load %arg7[%c0_41, %c0_42] : memref<8x32xf32, #tpu.memory_space<vmem>>, vector<8x32xf32>
    %cst_43 = arith.constant dense<0.000000e+00> : vector<64x32xf32>
    %109 = tpu.matmul %99, %108, %cst_43 {dimension_numbers = #tpu.dot_dimension_numbers<[1], [0], [0], [1], [0, 0, 1, 1], [], []>} : vector<64x8xf32>, vector<8x32xf32>, vector<64x32xf32> -> vector<64x32xf32>
    %c0_44 = arith.constant 0 : index
    %c0_45 = arith.constant 0 : index
    %c0_46 = arith.constant 0 : index
    %110 = vector.load %arg10[%c0_44, %c0_45, %c0_46] : memref<1x64x32xf32, #tpu.memory_space<vmem>>, vector<1x64x32xf32>
    %111 = vector.shape_cast %110 : vector<1x64x32xf32> to vector<64x32xf32>
    %112 = vector.shape_cast %109 : vector<64x32xf32> to vector<1x64x32xf32>
    tpu.vector_store %arg10[%c0_44, %c0_45, %c0_46], %112 {strides = array<i32>} : memref<1x64x32xf32, #tpu.memory_space<vmem>>, vector<1x64x32xf32>,
    return
  }
  func.func @transform_0(%arg0: i32) -> i32 {
    %c0_i32 = arith.constant 0 : i32
    %c0_i32_0 = arith.constant 0 : i32
    return %c0_i32 : i32
  }
  func.func @transform_1(%arg0: i32) -> (i32, i32, i32) {
    %c0_i32 = arith.constant 0 : i32
    %c0_i32_0 = arith.constant 0 : i32
    %c0_i32_1 = arith.constant 0 : i32
    return %arg0, %c0_i32, %c0_i32_0 : i32, i32, i32
  }
  func.func @transform_2(%arg0: i32) -> (i32, i32) {
    %c0_i32 = arith.constant 0 : i32
    %c0_i32_0 = arith.constant 0 : i32
    %c0_i32_1 = arith.constant 0 : i32
    return %c0_i32, %c0_i32_0 : i32, i32
  }
  func.func @transform_3(%arg0: i32) -> (i32, i32) {
    %c0_i32 = arith.constant 0 : i32
    %c0_i32_0 = arith.constant 0 : i32
    %c0_i32_1 = arith.constant 0 : i32
    return %c0_i32, %c0_i32_0 : i32, i32
  }
  func.func @transform_4(%arg0: i32) -> (i32, i32) {
    %c0_i32 = arith.constant 0 : i32
    %c0_i32_0 = arith.constant 0 : i32
    %c0_i32_1 = arith.constant 0 : i32
    return %c0_i32, %c0_i32_0 : i32, i32
  }
  func.func @transform_5(%arg0: i32) -> (i32, i32) {
    %c0_i32 = arith.constant 0 : i32
    %c0_i32_0 = arith.constant 0 : i32
    %c0_i32_1 = arith.constant 0 : i32
    return %c0_i32, %c0_i32_0 : i32, i32
  }
  func.func @transform_6(%arg0: i32) -> (i32, i32) {
    %c0_i32 = arith.constant 0 : i32
    %c0_i32_0 = arith.constant 0 : i32
    %c0_i32_1 = arith.constant 0 : i32
    return %c0_i32, %c0_i32_0 : i32, i32
  }
  func.func @transform_7(%arg0: i32) -> (i32, i32, i32) {
    %c0_i32 = arith.constant 0 : i32
    %c0_i32_0 = arith.constant 0 : i32
    %c0_i32_1 = arith.constant 0 : i32
    return %arg0, %c0_i32, %c0_i32_0 : i32, i32, i32
  }
  func.func @transform_8(%arg0: i32) -> (i32, i32, i32) {
    %c0_i32 = arith.constant 0 : i32
    %c0_i32_0 = arith.constant 0 : i32
    %c0_i32_1 = arith.constant 0 : i32
    return %arg0, %c0_i32, %c0_i32_0 : i32, i32, i32
  }
  func.func @transform_9(%arg0: i32) -> (i32, i32, i32) {
    %c0_i32 = arith.constant 0 : i32
    %c0_i32_0 = arith.constant 0 : i32
    %c0_i32_1 = arith.constant 0 : i32
    return %arg0, %c0_i32, %c0_i32_0 : i32, i32, i32
  }
}

module attributes {stable_mosaic.version = 11 : i64} {
  func.func @_gdfn_gate_proj_kernel(%arg0: i32, %arg1: memref<128x32xf32, #tpu.memory_space<vmem>>, %arg2: memref<16x8xf32, #tpu.memory_space<vmem>>, %arg3: memref<128x8xf32, #tpu.memory_space<vmem>>, %arg4: memref<128x8xf32, #tpu.memory_space<vmem>>) attributes {dimension_semantics = [#tpu.dimension_semantics<parallel>], iteration_bounds = array<i64: 1>, scalar_prefetch = 0 : i64, scratch_operands = 0 : i64, tpu.core_type = #tpu.core_type<tc>, window_params = [{transform_indices = @transform_0, window_bounds = array<i64: 128, 32>}, {pipeline_mode = #tpu.pipeline_mode<synchronous>, transform_indices = @transform_1, window_bounds = array<i64: 16, 8>}, {transform_indices = @transform_2, window_bounds = array<i64: 128, 8>}, {transform_indices = @transform_3, window_bounds = array<i64: 128, 8>}]} {
    %c0 = arith.constant 0 : index
    %c0_0 = arith.constant 0 : index
    %0 = vector.load %arg1[%c0, %c0_0] : memref<128x32xf32, #tpu.memory_space<vmem>>, vector<128x32xf32>
    %1 = vector.extract_strided_slice %0 {offsets = [0, 0], sizes = [128, 16], strides = [1, 1]} : vector<128x32xf32> to vector<128x16xf32>
    %2 = vector.extract_strided_slice %0 {offsets = [0, 16], sizes = [128, 16], strides = [1, 1]} : vector<128x32xf32> to vector<128x16xf32>
    %cst = arith.constant 5.000000e-01 : f32
    %3 = vector.broadcast %cst : f32 to vector<128x16xf32>
    %4 = arith.mulf %3, %2 : vector<128x16xf32>
    %cst_1 = arith.constant 0.707106769 : f32
    %5 = vector.broadcast %cst_1 : f32 to vector<128x16xf32>
    %6 = arith.mulf %2, %5 : vector<128x16xf32>
    %cst_2 = arith.constant 0.000000e+00 : f32
    %7 = vector.broadcast %cst_2 : f32 to vector<128x16xf32>
    %8 = arith.cmpf oge, %6, %7 : vector<128x16xf32>
    %cst_3 = arith.constant 1.000000e+00 : f32
    %cst_4 = arith.constant -1.000000e+00 : f32
    %9 = vector.broadcast %cst_3 : f32 to vector<128x16xf32>
    %10 = vector.broadcast %cst_4 : f32 to vector<128x16xf32>
    %11 = arith.select %8, %9, %10 : vector<128x16xi1>, vector<128x16xf32>
    %12 = math.absf %6 : vector<128x16xf32>
    %cst_5 = arith.constant 0.327591091 : f32
    %13 = vector.broadcast %cst_5 : f32 to vector<128x16xf32>
    %14 = arith.mulf %13, %12 : vector<128x16xf32>
    %cst_6 = arith.constant 1.000000e+00 : f32
    %15 = vector.broadcast %cst_6 : f32 to vector<128x16xf32>
    %16 = arith.addf %15, %14 : vector<128x16xf32>
    %cst_7 = arith.constant 1.000000e+00 : f32
    %17 = vector.broadcast %cst_7 : f32 to vector<128x16xf32>
    %18 = arith.divf %17, %16 : vector<128x16xf32>
    %cst_8 = arith.constant 1.06140542 : f32
    %19 = vector.broadcast %cst_8 : f32 to vector<128x16xf32>
    %20 = arith.mulf %19, %18 : vector<128x16xf32>
    %cst_9 = arith.constant -1.45315206 : f32
    %21 = vector.broadcast %cst_9 : f32 to vector<128x16xf32>
    %22 = arith.addf %20, %21 : vector<128x16xf32>
    %23 = arith.mulf %22, %18 : vector<128x16xf32>
    %cst_10 = arith.constant 1.42141378 : f32
    %24 = vector.broadcast %cst_10 : f32 to vector<128x16xf32>
    %25 = arith.addf %23, %24 : vector<128x16xf32>
    %26 = arith.mulf %25, %18 : vector<128x16xf32>
    %cst_11 = arith.constant -0.284496725 : f32
    %27 = vector.broadcast %cst_11 : f32 to vector<128x16xf32>
    %28 = arith.addf %26, %27 : vector<128x16xf32>
    %29 = arith.mulf %28, %18 : vector<128x16xf32>
    %cst_12 = arith.constant 0.254829586 : f32
    %30 = vector.broadcast %cst_12 : f32 to vector<128x16xf32>
    %31 = arith.addf %29, %30 : vector<128x16xf32>
    %32 = arith.mulf %31, %18 : vector<128x16xf32>
    %cst_13 = arith.constant 0.000000e+00 : f32
    %33 = vector.broadcast %cst_13 : f32 to vector<128x16xf32>
    %34 = arith.subf %33, %12 : vector<128x16xf32>
    %35 = arith.mulf %34, %12 : vector<128x16xf32>
    %36 = math.exp %35 : vector<128x16xf32>
    %37 = arith.mulf %32, %36 : vector<128x16xf32>
    %cst_14 = arith.constant 1.000000e+00 : f32
    %38 = vector.broadcast %cst_14 : f32 to vector<128x16xf32>
    %39 = arith.subf %38, %37 : vector<128x16xf32>
    %40 = arith.mulf %11, %39 : vector<128x16xf32>
    %cst_15 = arith.constant 1.000000e+00 : f32
    %41 = vector.broadcast %cst_15 : f32 to vector<128x16xf32>
    %42 = arith.addf %41, %40 : vector<128x16xf32>
    %43 = arith.mulf %4, %42 : vector<128x16xf32>
    %44 = arith.mulf %43, %1 : vector<128x16xf32>
    %c0_16 = arith.constant 0 : index
    %c0_17 = arith.constant 0 : index
    %45 = vector.load %arg2[%c0_16, %c0_17] : memref<16x8xf32, #tpu.memory_space<vmem>>, vector<16x8xf32>
    %cst_18 = arith.constant dense<0.000000e+00> : vector<128x8xf32>
    %46 = tpu.matmul %44, %45, %cst_18 {dimension_numbers = #tpu.dot_dimension_numbers<[1], [0], [0], [1], [0, 0, 1, 1], [], []>} : vector<128x16xf32>, vector<16x8xf32>, vector<128x8xf32> -> vector<128x8xf32>
    %c0_19 = arith.constant 0 : index
    %c0_20 = arith.constant 0 : index
    %47 = vector.load %arg3[%c0_19, %c0_20] : memref<128x8xf32, #tpu.memory_space<vmem>>, vector<128x8xf32>
    %48 = arith.addf %46, %47 : vector<128x8xf32>
    %c0_21 = arith.constant 0 : index
    %c0_22 = arith.constant 0 : index
    %49 = vector.load %arg4[%c0_21, %c0_22] : memref<128x8xf32, #tpu.memory_space<vmem>>, vector<128x8xf32>
    tpu.vector_store %arg4[%c0_21, %c0_22], %48 {strides = array<i32>} : memref<128x8xf32, #tpu.memory_space<vmem>>, vector<128x8xf32>,
    return
  }
  func.func @transform_0(%arg0: i32) -> (i32, i32) {
    %c0_i32 = arith.constant 0 : i32
    %c0_i32_0 = arith.constant 0 : i32
    return %arg0, %c0_i32 : i32, i32
  }
  func.func @transform_1(%arg0: i32) -> (i32, i32) {
    %c0_i32 = arith.constant 0 : i32
    %c0_i32_0 = arith.constant 0 : i32
    %c0_i32_1 = arith.constant 0 : i32
    return %c0_i32, %c0_i32_0 : i32, i32
  }
  func.func @transform_2(%arg0: i32) -> (i32, i32) {
    %c0_i32 = arith.constant 0 : i32
    %c0_i32_0 = arith.constant 0 : i32
    return %arg0, %c0_i32 : i32, i32
  }
  func.func @transform_3(%arg0: i32) -> (i32, i32) {
    %c0_i32 = arith.constant 0 : i32
    %c0_i32_0 = arith.constant 0 : i32
    return %arg0, %c0_i32 : i32, i32
  }
}

</mosaic_0001>

<bundles_post_ra>
// kernel: transformer_block.6
= control target key start
LH: loop header
LB: loop body
LE: loop exit
PB: predicated region body
PF: predicated region fallthrough
CT: control target
= control target key end

     0   :  { %s558_s9 = smov 0   ;;  %s744_s0 = inlined_call_operand.vmem [shape: f32[2,8,8,24], index: 0, kind: input, shape index: {}]   ;;  %s745_s1 = inlined_call_operand.vmem [shape: f32[9,24], index: 1, kind: input, shape index: {}]   ;;  %s746_s2 = inlined_call_operand.vmem [shape: f32[2,8,8,24], index: 2, kind: output, shape index: {}]  }
   0x1 LB: > { %s511_s10 = sadd.s32 4294967295, %s540_s9   ;;  %p515_p0 = scmp.ge.s32.totalorder %s540_s9, 1  ;;  %s540_s9 = sphi %s558_s9, %s12_s9  }
   0x2   : > { %p112_p1 = scmp.lt.s32.totalorder %s540_s9, 3 }
   0x4   : > { %p113_p2 = pnand %p515_p0, %p112_p1 }
   0x5   : > { %vm144_vm0 = vcmask (!%p113_p2), 195584   ;;  %vm147_vm1 = vcmask (!%p113_p2), 188416   ;;  %p568_p3 = scmp.lt.s32.totalorder (!%p113_p2), %s511_s10, 1  ;;  %v203_v0 = vlaneseq (!%p113_p2)  ;;  %v542_v1 = vmov (!%p113_p2), 0.0   ;;  %v193_v3 = vld [vmem:[%s745_s1] sm:$0xff] (!%p113_p2) }
   0x6   : > { %116 = sbr.rel (%p113_p2) target bundleno = 71 (0x47), region = 28  ;;  %145 = vst.msk [vmem:[#allocation2] sm:$0xff] (!%p113_p2), %vm144_vm0, %v542_v1  ;;  %146 = vst.msk [vmem:[#allocation2 + $0x8] sm:$0xff] (!%p113_p2), %vm144_vm0, %v542_v1  ;;  %v650_v44 = vld [vmem:[%s745_s1 + $0x8] ss:$0 sm:$0xff] (!%p113_p2) }
   0x7   : > { %149 = vst.msk [vmem:[#allocation2 + $0x18] sm:$0xff] (!%p113_p2), %vm144_vm0, %v542_v1  ;;  %150 = vst.msk [vmem:[#allocation2 + $0x20] sm:$0xff] (!%p113_p2), %vm144_vm0, %v542_v1  ;;  %v204_v2 = vshrl.u32 (!%p113_p2), %v203_v0, 7 }
   0x8   : > { %152 = vst.msk [vmem:[#allocation2 + $0x30] sm:$0xff] (!%p113_p2), %vm144_vm0, %v542_v1  ;;  %153 = vst.msk [vmem:[#allocation2 + $0x38] sm:$0xff] (!%p113_p2), %vm144_vm0, %v542_v1 }
   0x9   : > { %155 = vst.msk [vmem:[#allocation2 + $0x48] sm:$0xff] (!%p113_p2), %vm144_vm0, %v542_v1  ;;  %156 = vst.msk [vmem:[#allocation2 + $0x50] sm:$0xff] (!%p113_p2), %vm144_vm0, %v542_v1  ;;  %v205_v4 = vsub.s32 (!%p113_p2), 0, %v204_v2  ;;  %v233_v5 = vsub.s32 (!%p113_p2), 1, %v204_v2  ;;  %v261_v6 = vsub.s32 (!%p113_p2), 2, %v204_v2  ;;  %v289_v16 = vsub.s32 (!%p113_p2), 3, %v204_v2 }
   0xa   : > { %158 = vst.msk [vmem:[#allocation2 + $0x60] sm:$0xff] (!%p113_p2), %vm144_vm0, %v542_v1  ;;  %159 = vst.msk [vmem:[#allocation2 + $0x68] sm:$0xff] (!%p113_p2), %vm144_vm0, %v542_v1  ;;  %v317_v23 = vsub.s32 (!%p113_p2), 4, %v204_v2  ;;  %v345_v26 = vsub.s32 (!%p113_p2), 5, %v204_v2  ;;  %v374_v28 = vsub.s32 (!%p113_p2), 6, %v204_v2  ;;  %v402_v30 = vsub.s32 (!%p113_p2), 7, %v204_v2 }
   0xb   : > { %161 = vst.msk [vmem:[#allocation2 + $0x78] sm:$0xff] (!%p113_p2), %vm144_vm0, %v542_v1  ;;  %162 = vst.msk [vmem:[#allocation2 + $0x80] sm:$0xff] (!%p113_p2), %vm144_vm0, %v542_v1  ;;  %v617_v10 = vrot.slane (!%p113_p2), %v193_v3, %v205_v4  ;;  %v619_v11 = vrot.slane (!%p113_p2), %v193_v3, %v233_v5  ;;  %v621_v12 = vrot.slane (!%p113_p2), %v193_v3, %v261_v6 }
   0xc   : > { %164 = vst.msk [vmem:[#allocation2 + $0x90] sm:$0xff] (!%p113_p2), %vm144_vm0, %v542_v1  ;;  %165 = vst.msk [vmem:[#allocation2 + $0x98] sm:$0xff] (!%p113_p2), %vm144_vm0, %v542_v1  ;;  %v634_v27 = vrot.slane (!%p113_p2), %v193_v3, %v289_v16  ;;  %v636_v31 = vrot.slane (!%p113_p2), %v193_v3, %v317_v23  ;;  %v638_v35 = vrot.slane (!%p113_p2), %v193_v3, %v345_v26 }
   0xd   : > { %167 = vst.msk [vmem:[#allocation2 + $0xa8] sm:$0xff] %vm144_vm0, %v542_v1  ;;  %168 = vst.msk [vmem:[#allocation2 + $0xb0] sm:$0xff] %vm144_vm0, %v542_v1  ;;  %s749_s10 = smov (!%p568_p3, %s511_s10), 1  ;;  %v195_v19 = vld [vmem:[#allocation2 + $0x7] sm:$0xff]  ;;  %v641_v38 = vrot.slane %v193_v3, %v374_v28  ;;  %v644_v42 = vrot.slane %v193_v3, %v402_v30 }
   0xe   : > { %170 = vst.msk [vmem:[#allocation2 + $0xc0] sm:$0xff] %vm144_vm0, %v542_v1  ;;  %171 = vst.msk [vmem:[#allocation2 + $0xc8] sm:$0xff] %vm144_vm0, %v542_v1  ;;  %s523_s14 = sshll.u32 %s749_s10, 6  ;;  %v207_v20 = vmul.f32 %v617_v10, %v195_v19  ;;  %v223_v21 = vld [vmem:[#allocation2 + $0x8] sm:$0xff] }
   0xf   : > { %173 = vst.msk [vmem:[#allocation2 + $0xd8] sm:$0xff] %vm144_vm0, %v542_v1  ;;  %174 = vst.msk [vmem:[#allocation2 + $0xe0] sm:$0xff] %vm144_vm0, %v542_v1  ;;  %s138_s17 = scalar_lea.vmem %s744_s0, %s523_s14  ;;  %v235_v24 = vmul.f32 %v619_v11, %v223_v21  ;;  %s677_s22 = scalar_lea.vmem %s746_s2, %s523_s14 }
  0x10   : > { %148 = vst.msk [vmem:[#allocation2 + $0x10] sm:$0x1] %vm147_vm1, %v542_v1  ;;  %151 = vst.msk [vmem:[#allocation2 + $0x28] sm:$0x1] %vm147_vm1, %v542_v1  ;;  %v176_v7 = vld [vmem:[%s138_s17] sm:$0xff]  ;;  %v177_v8 = vld [vmem:[%s138_s17 + $0x8] sm:$0xff] }
  0x11   : > { %154 = vst.msk [vmem:[#allocation2 + $0x40] sm:$0x1] %vm147_vm1, %v542_v1  ;;  %157 = vst.msk [vmem:[#allocation2 + $0x58] sm:$0x1] %vm147_vm1, %v542_v1  ;;  %v178_v9 = vld [vmem:[%s138_s17 + $0x10] sm:$0xff]  ;;  %v179_v13 = vld [vmem:[%s138_s17 + $0x18] sm:$0xff]  ;;  %v243_v29 = vadd.f32 %v235_v24, %v207_v20 }
  0x12   : > { %160 = vst.msk [vmem:[#allocation2 + $0x70] sm:$0x1] %vm147_vm1, %v542_v1  ;;  %163 = vst.msk [vmem:[#allocation2 + $0x88] sm:$0x1] %vm147_vm1, %v542_v1  ;;  %v180_v14 = vld [vmem:[%s138_s17 + $0x20] sm:$0xff]  ;;  %v181_v15 = vld [vmem:[%s138_s17 + $0x28] sm:$0xff] }
  0x13   : > { %166 = vst.msk [vmem:[#allocation2 + $0xa0] sm:$0x1] %vm147_vm1, %v542_v1  ;;  %169 = vst.msk [vmem:[#allocation2 + $0xb8] sm:$0x1] %vm147_vm1, %v542_v1  ;;  %v182_v17 = vld [vmem:[%s138_s17 + $0x30] sm:$0xff]  ;;  %v183_v18 = vld [vmem:[%s138_s17 + $0x38] sm:$0xff] }
  0x14   : > { %172 = vst.msk [vmem:[#allocation2 + $0xd0] sm:$0x1] %vm147_vm1, %v542_v1  ;;  %175 = vst.msk [vmem:[#allocation2 + $0xe8] sm:$0x1] %vm147_vm1, %v542_v1 }
  0x15   : > { %185 = vst.msk [vmem:[#allocation2 + $0x20] sm:$0xff] %vm144_vm0, %v176_v7  ;;  %186 = vst.msk [vmem:[#allocation2 + $0x38] sm:$0xff] %vm144_vm0, %v177_v8 }
  0x16   : > { %187 = vst.msk [vmem:[#allocation2 + $0x50] sm:$0xff] %vm144_vm0, %v178_v9  ;;  %188 = vst.msk [vmem:[#allocation2 + $0x68] sm:$0xff] %vm144_vm0, %v179_v13 }
  0x17   : > { %189 = vst.msk [vmem:[#allocation2 + $0x80] sm:$0xff] %vm144_vm0, %v180_v14  ;;  %190 = vst.msk [vmem:[#allocation2 + $0x98] sm:$0xff] %vm144_vm0, %v181_v15  ;;  %v251_v22 = vld [vmem:[#allocation2 + $0x9] sm:$0xff] }
  0x18   : > { %191 = vst.msk [vmem:[#allocation2 + $0xb0] sm:$0xff] %vm144_vm0, %v182_v17  ;;  %192 = vst.msk [vmem:[#allocation2 + $0xc8] sm:$0xff] %vm144_vm0, %v183_v18  ;;  %v263_v25 = vmul.f32 %v621_v12, %v251_v22 }
  0x1a   : > { %v271_v32 = vadd.f32 %v263_v25, %v243_v29 }
  0x1c   : > { %v279_v33 = vld [vmem:[#allocation2 + $0x1f] sm:$0xff]  ;;  %v364_v40 = vld [vmem:[#allocation2 + $0x37] sm:$0xff] }
  0x1d   : > { %v307_v34 = vld [vmem:[#allocation2 + $0x20] sm:$0xff]  ;;  %v291_v36 = vmul.f32 %v634_v27, %v279_v33  ;;  %v208_v39 = vmul.f32 %v279_v33, %v617_v10  ;;  %v392_v41 = vld [vmem:[#allocation2 + $0x38] sm:$0xff]  ;;  %v376_v52 = vmul.f32 %v641_v38, %v364_v40  ;;  %v365_v53 = vld [vmem:[#allocation2 + $0x4f] sm:$0xff]  ;;  %v209_v54 = vmul.f32 %v364_v40, %v617_v10 }
  0x1e   : > { %v335_v37 = vld [vmem:[#allocation2 + $0x21] sm:$0xff]  ;;  %v236_v43 = vmul.f32 %v307_v34, %v619_v11  ;;  %v319_v46 = vmul.f32 %v636_v31, %v307_v34  ;;  %v420_v47 = vld [vmem:[#allocation2 + $0x39] sm:$0xff]  ;;  %v237_v55 = vmul.f32 %v392_v41, %v619_v11  ;;  %v404_v56 = vmul.f32 %v644_v42, %v392_v41  ;;  %v393_v60 = vld [vmem:[#allocation2 + $0x50] sm:$0xff] }
  0x1f   : > { %v299_v45 = vadd.f32 %v291_v36, %v271_v32  ;;  %v347_v48 = vmul.f32 %v638_v35, %v335_v37  ;;  %v264_v50 = vmul.f32 %v335_v37, %v621_v12  ;;  %v432_v57 = vmul.f32 %v650_v44, %v420_v47  ;;  %v421_v63 = vld [vmem:[#allocation2 + $0x51] sm:$0xff]  ;;  %v366_v9 = vld [vmem:[#allocation2 + $0x67] sm:$0xff]  ;;  %v367_v33 = vld [vmem:[#allocation2 + $0x7f] sm:$0xff] }
  0x20   : > { %v244_v49 = vadd.f32 %v236_v43, %v208_v39  ;;  %v292_v59 = vmul.f32 %v364_v40, %v634_v27  ;;  %v320_v62 = vmul.f32 %v392_v41, %v636_v31  ;;  %v245_v0 = vadd.f32 %v237_v55, %v209_v54  ;;  %v394_v18 = vld [vmem:[#allocation2 + $0x68] sm:$0xff] }
  0x21   : > { %v327_v51 = vadd.f32 %v319_v46, %v299_v45  ;;  %v265_v1 = vmul.f32 %v420_v47, %v621_v12  ;;  %v348_v3 = vmul.f32 %v420_v47, %v638_v35  ;;  %v377_v4 = vmul.f32 %v641_v38, %v365_v53  ;;  %v422_v25 = vld [vmem:[#allocation2 + $0x69] sm:$0xff]  ;;  %v395_v45 = vld [vmem:[#allocation2 + $0x80] sm:$0xff] }
  0x22   : > { %v272_v58 = vadd.f32 %v264_v50, %v244_v49  ;;  %v210_v5 = vmul.f32 %v365_v53, %v617_v10  ;;  %v293_v8 = vmul.f32 %v365_v53, %v634_v27  ;;  %v238_v13 = vmul.f32 %v393_v60, %v619_v11  ;;  %v423_v54 = vld [vmem:[#allocation2 + $0x81] sm:$0xff] }
  0x23   : > { %v355_v61 = vadd.f32 %v347_v48, %v327_v51  ;;  %v273_v7 = vadd.f32 %v265_v1, %v245_v0  ;;  %v405_v15 = vmul.f32 %v644_v42, %v393_v60  ;;  %v433_v16 = vmul.f32 %v650_v44, %v421_v63 }
  0x24   : > { %v300_v2 = vadd.f32 %v292_v59, %v272_v58  ;;  %v321_v17 = vmul.f32 %v393_v60, %v636_v31  ;;  %v246_v21 = vadd.f32 %v238_v13, %v210_v5  ;;  %v266_v22 = vmul.f32 %v421_v63, %v621_v12  ;;  %v368_v60 = vld [vmem:[#allocation2 + $0x97] sm:$0xff] }
  0x25   : > { %v384_v6 = vadd.f32 %v376_v52, %v355_v61  ;;  %v301_v20 = vadd.f32 %v293_v8, %v273_v7  ;;  %v349_v24 = vmul.f32 %v421_v63, %v638_v35  ;;  %v294_v26 = vmul.f32 %v366_v9, %v634_v27  ;;  %v424_v5 = vld [vmem:[#allocation2 + $0x99] sm:$0xff] }
  0x26   : > { %v328_v14 = vadd.f32 %v320_v62, %v300_v2  ;;  %v211_v28 = vmul.f32 %v366_v9, %v617_v10  ;;  %v274_v32 = vadd.f32 %v266_v22, %v246_v21  ;;  %v239_v34 = vmul.f32 %v394_v18, %v619_v11  ;;  %v396_v2 = vld [vmem:[#allocation2 + $0x98] sm:$0xff] }
  0x27   : > { %v412_v19 = vadd.f32 %v404_v56, %v384_v6  ;;  %v329_v30 = vadd.f32 %v321_v17, %v301_v20  ;;  %v378_v37 = vmul.f32 %v641_v38, %v366_v9  ;;  %v406_v39 = vmul.f32 %v644_v42, %v394_v18  ;;  %v369_v17 = vld [vmem:[#allocation2 + $0xaf] sm:$0xff] }
  0x28   : > { %v356_v23 = vadd.f32 %v348_v3, %v328_v14  ;;  %v322_v40 = vmul.f32 %v394_v18, %v636_v31  ;;  %v302_v43 = vadd.f32 %v294_v26, %v274_v32  ;;  %v247_v46 = vadd.f32 %v239_v34, %v211_v28  ;;  %v425_v28 = vld [vmem:[#allocation2 + $0xb1] sm:$0xff] }
  0x29   : > { %v440_v29 = vadd.f32 %v432_v57, %v412_v19  ;;  %v357_v41 = vadd.f32 %v349_v24, %v329_v30  ;;  %v267_v47 = vmul.f32 %v422_v25, %v621_v12  ;;  %v434_v49 = vmul.f32 %v650_v44, %v422_v25  ;;  %v397_v24 = vld [vmem:[#allocation2 + $0xb0] sm:$0xff] }
  0x2a   : > { %v385_v36 = vadd.f32 %v377_v4, %v356_v23  ;;  %v350_v50 = vmul.f32 %v422_v25, %v638_v35  ;;  %v295_v51 = vmul.f32 %v367_v33, %v634_v27  ;;  %v330_v53 = vadd.f32 %v322_v40, %v302_v43 }
  0x2b   : > { %448 = vst.msk [vmem:[%s677_s22] sm:$0xff] %vm144_vm0, %v440_v29  ;;  %v386_v52 = vadd.f32 %v378_v37, %v357_v41  ;;  %v275_v55 = vadd.f32 %v267_v47, %v247_v46  ;;  %v212_v56 = vmul.f32 %v367_v33, %v617_v10  ;;  %v379_v58 = vmul.f32 %v641_v38, %v367_v33  ;;  %v370_v37 = vld [vmem:[#allocation2 + $0xc7] sm:$0xff] }
  0x2c   : > { %v413_v48 = vadd.f32 %v405_v15, %v385_v36  ;;  %v407_v59 = vmul.f32 %v644_v42, %v395_v45  ;;  %v240_v61 = vmul.f32 %v395_v45, %v619_v11  ;;  %v358_v63 = vadd.f32 %v350_v50, %v330_v53 }
  0x2d   : > { %v414_v62 = vadd.f32 %v406_v39, %v386_v52  ;;  %v303_v0 = vadd.f32 %v295_v51, %v275_v55  ;;  %v323_v1 = vmul.f32 %v395_v45, %v636_v31  ;;  %v435_v3 = vmul.f32 %v650_v44, %v423_v54 }
  0x2e   : > { %v441_v57 = vadd.f32 %v433_v16, %v413_v48  ;;  %v351_v4 = vmul.f32 %v423_v54, %v638_v35  ;;  %v248_v6 = vadd.f32 %v240_v61, %v212_v56  ;;  %v268_v7 = vmul.f32 %v423_v54, %v621_v12  ;;  %v398_v54 = vld [vmem:[#allocation2 + $0xc8] sm:$0xff] }
  0x2f   : > { %v442_v8 = vadd.f32 %v434_v49, %v414_v62  ;;  %v387_v9 = vadd.f32 %v379_v58, %v358_v63  ;;  %v331_v13 = vadd.f32 %v323_v1, %v303_v0  ;;  %v380_v14 = vmul.f32 %v641_v38, %v368_v60  ;;  %v371_v58 = vld [vmem:[#allocation2 + $0xdf] sm:$0xff] }
  0x30   : > { %449 = vst.msk [vmem:[%s677_s22 + $0x8] sm:$0xff] %vm144_vm0, %v441_v57  ;;  %v276_v15 = vadd.f32 %v268_v7, %v248_v6  ;;  %v296_v16 = vmul.f32 %v368_v60, %v634_v27  ;;  %v213_v18 = vmul.f32 %v368_v60, %v617_v10  ;;  %v241_v19 = vmul.f32 %v396_v2, %v619_v11  ;;  %v426_v60 = vld [vmem:[#allocation2 + $0xc9] sm:$0xff]  ;;  %v399_v6 = vld [vmem:[#allocation2 + $0xe0] sm:$0xff] }
  0x31   : > { %450 = vst.msk [vmem:[%s677_s22 + $0x10] sm:$0xff] %vm144_vm0, %v442_v8  ;;  %v415_v20 = vadd.f32 %v407_v59, %v387_v9  ;;  %v359_v21 = vadd.f32 %v351_v4, %v331_v13  ;;  %v408_v22 = vmul.f32 %v644_v42, %v396_v2  ;;  %v436_v23 = vmul.f32 %v650_v44, %v424_v5  ;;  %v427_v13 = vld [vmem:[#allocation2 + $0xe1] sm:$0xff] }
  0x32   : > { %v304_v25 = vadd.f32 %v296_v16, %v276_v15  ;;  %v324_v26 = vmul.f32 %v396_v2, %v636_v31  ;;  %v249_v29 = vadd.f32 %v241_v19, %v213_v18  ;;  %v269_v30 = vmul.f32 %v424_v5, %v621_v12 }
  0x33   : > { %v443_v32 = vadd.f32 %v435_v3, %v415_v20  ;;  %v388_v33 = vadd.f32 %v380_v14, %v359_v21  ;;  %v352_v34 = vmul.f32 %v424_v5, %v638_v35  ;;  %v297_v36 = vmul.f32 %v369_v17, %v634_v27 }
  0x34   : > { %v332_v39 = vadd.f32 %v324_v26, %v304_v25  ;;  %v277_v40 = vadd.f32 %v269_v30, %v249_v29  ;;  %v214_v41 = vmul.f32 %v369_v17, %v617_v10  ;;  %v242_v43 = vmul.f32 %v397_v24, %v619_v11 }
  0x35   : > { %451 = vst.msk [vmem:[%s677_s22 + $0x18] sm:$0xff] %vm144_vm0, %v443_v32  ;;  %v416_v45 = vadd.f32 %v408_v22, %v388_v33  ;;  %v381_v46 = vmul.f32 %v641_v38, %v369_v17  ;;  %v325_v47 = vmul.f32 %v397_v24, %v636_v31  ;;  %v270_v48 = vmul.f32 %v425_v28, %v621_v12 }
  0x36   : > { %v360_v49 = vadd.f32 %v352_v34, %v332_v39  ;;  %v305_v50 = vadd.f32 %v297_v36, %v277_v40  ;;  %v250_v51 = vadd.f32 %v242_v43, %v214_v41  ;;  %v298_v52 = vmul.f32 %v370_v37, %v634_v27 }
  0x37   : > { %v444_v53 = vadd.f32 %v436_v23, %v416_v45  ;;  %v409_v10 = vmul.f32 %v644_v42, %v397_v24  ;;  %v353_v56 = vmul.f32 %v425_v28, %v638_v35  ;;  %v437_v12 = vmul.f32 %v650_v44, %v425_v28 }
  0x38   : > { %v389_v11 = vadd.f32 %v381_v46, %v360_v49  ;;  %v333_v55 = vadd.f32 %v325_v47, %v305_v50  ;;  %v278_v57 = vadd.f32 %v270_v48, %v250_v51  ;;  %v382_v59 = vmul.f32 %v641_v38, %v370_v37 }
  0x39   : > { %452 = vst.msk [vmem:[%s677_s22 + $0x20] sm:$0xff] %vm144_vm0, %v444_v53  ;;  %v326_v63 = vmul.f32 %v398_v54, %v636_v31  ;;  %v410_v0 = vmul.f32 %v644_v42, %v398_v54  ;;  %v383_v1 = vmul.f32 %v641_v38, %v371_v58  ;;  %v354_v5 = vmul.f32 %v426_v60, %v638_v35 }
  0x3a   : > { %v417_v61 = vadd.f32 %v409_v10, %v389_v11  ;;  %v361_v27 = vadd.f32 %v353_v56, %v333_v55  ;;  %v306_v62 = vadd.f32 %v298_v52, %v278_v57  ;;  %v438_v8 = vmul.f32 %v650_v44, %v426_v60 }
  0x3b   : > { %v411_v15 = vmul.f32 %v644_v42, %v399_v6  ;;  %v439_v16 = vmul.f32 %v650_v44, %v427_v13 }
  0x3c   : > { %v445_v2 = vadd.f32 %v437_v12, %v417_v61  ;;  %v390_v3 = vadd.f32 %v382_v59, %v361_v27  ;;  %v334_v4 = vadd.f32 %v326_v63, %v306_v62 }
  0x3e   : > { %453 = vst.msk [vmem:[%s677_s22 + $0x28] sm:$0xff] %vm144_vm0, %v445_v2  ;;  %v418_v7 = vadd.f32 %v410_v0, %v390_v3  ;;  %v362_v9 = vadd.f32 %v354_v5, %v334_v4 }
  0x40   : > { %v446_v31 = vadd.f32 %v438_v8, %v418_v7  ;;  %v391_v14 = vadd.f32 %v383_v1, %v362_v9 }
  0x42   : > { %454 = vst.msk [vmem:[%s677_s22 + $0x30] sm:$0xff] %vm144_vm0, %v446_v31  ;;  %v419_v38 = vadd.f32 %v411_v15, %v391_v14 }
  0x44   : > { %v447_v17 = vadd.f32 %v439_v16, %v419_v38 }
  0x46   : > { %455 = vst.msk [vmem:[%s677_s22 + $0x38] sm:$0xff] %vm144_vm0, %v447_v17 }
  0x47 PF: > { %s12_s9 = sadd.s32 1, %s540_s9  }
  0x48   : > { %p9_p4 = scmp.ge.s32.totalorder %s12_s9, 4  }
  0x4a   :  { %11 = sbr.rel (!%p9_p4) target bundleno = 1 (0x1), region = 60 }

// kernel: transformer_block.5
= control target key start
LH: loop header
LB: loop body
LE: loop exit
PB: predicated region body
PF: predicated region fallthrough
CT: control target
= control target key end

     0   :  { %vm33_vm0 = vcmask 64512   ;;  %vm483_vm1 = vcmask 195584   ;;  %s949_s0 = inlined_call_operand.vmem [shape: f32[128,8], index: 0, kind: input, shape index: {}]   ;;  %s950_s3 = inlined_call_operand.vmem [shape: f32[8,24], index: 3, kind: input, shape index: {}]   ;;  %s951_s1 = inlined_call_operand.vmem [shape: f32[1,8], index: 1, kind: input, shape index: {}]   ;;  %s952_s2 = inlined_call_operand.vmem [shape: f32[1,8], index: 2, kind: input, shape index: {}]   ;;  %s953_s4 = inlined_call_operand.vmem [shape: f32[128,24], index: 4, kind: output, shape index: {}]  }
   0x1   :  { %v17_v0 = vld [vmem:[%s949_s0] sm:$0xff]  ;;  %v18_v1 = vld [vmem:[%s949_s0 + $0x8] sm:$0xff]  ;;  %v19_v8 = vld [vmem:[%s949_s0 + $0x10] sm:$0xff] }
   0x2   :  { %v25_v2 = vld [vmem:[%s949_s0 + $0x40] sm:$0xff]  ;;  %v34_v3 = vsel %vm33_vm0, %v17_v0, 0.0  ;;  %v37_v4 = vsel %vm33_vm0, %v18_v1, 0.0  ;;  %v26_v5 = vld [vmem:[%s949_s0 + $0x48] sm:$0xff]  ;;  %v27_v9 = vld [vmem:[%s949_s0 + $0x50] sm:$0xff]  ;;  %v40_v10 = vsel %vm33_vm0, %v19_v8, 0.0 }
   0x3   :  { %35 = vadd.xlane.f32.xlu0 %v34_v3  ;;  %38 = vadd.xlane.f32.xlu1 %v37_v4  ;;  %v58_v6 = vsel %vm33_vm0, %v25_v2, 0.0  ;;  %v61_v7 = vsel %vm33_vm0, %v26_v5, 0.0  ;;  %v64_v11 = vsel %vm33_vm0, %v27_v9, 0.0  ;;  %v651_v12 = vld [vmem:[%s949_s0 + $0x18] sm:$0xff]  ;;  %v665_v16 = vld [vmem:[%s949_s0 + $0x20] sm:$0xff]  ;;  %v679_v20 = vld [vmem:[%s949_s0 + $0x28] sm:$0xff] }
   0x4   :  { %v656_v13 = vld [vmem:[%s949_s0 + $0x58] sm:$0xff]  ;;  %v43_v14 = vsel %vm33_vm0, %v651_v12, 0.0  ;;  %v670_v17 = vld [vmem:[%s949_s0 + $0x60] sm:$0xff]  ;;  %v46_v18 = vsel %vm33_vm0, %v665_v16, 0.0  ;;  %v684_v21 = vld [vmem:[%s949_s0 + $0x68] sm:$0xff]  ;;  %v49_v22 = vsel %vm33_vm0, %v679_v20, 0.0 }
   0x5   :  { %v67_v15 = vsel %vm33_vm0, %v656_v13, 0.0  ;;  %v70_v19 = vsel %vm33_vm0, %v670_v17, 0.0  ;;  %v73_v23 = vsel %vm33_vm0, %v684_v21, 0.0  ;;  %v693_v24 = vld [vmem:[%s949_s0 + $0x30] sm:$0xff]  ;;  %v707_v28 = vld [vmem:[%s949_s0 + $0x38] sm:$0xff] }
   0x6   :  { %v698_v25 = vld [vmem:[%s949_s0 + $0x70] sm:$0xff]  ;;  %v52_v26 = vsel %vm33_vm0, %v693_v24, 0.0  ;;  %v712_v29 = vld [vmem:[%s949_s0 + $0x78] sm:$0xff]  ;;  %v55_v30 = vsel %vm33_vm0, %v707_v28, 0.0 }
   0x7   :  { %59 = vadd.xlane.f32.xlu0 %v58_v6  ;;  %62 = vadd.xlane.f32.xlu1 %v61_v7  ;;  %v76_v27 = vsel %vm33_vm0, %v698_v25, 0.0  ;;  %v79_v31 = vsel %vm33_vm0, %v712_v29, 0.0 }
   0xb   :  { %41 = vadd.xlane.f32.xlu0 %v40_v10  ;;  %65 = vadd.xlane.f32.xlu1 %v64_v11 }
   0xf   :  { %44 = vadd.xlane.f32.xlu0 %v43_v14  ;;  %68 = vadd.xlane.f32.xlu1 %v67_v15 }
  0x13   :  { %47 = vadd.xlane.f32.xlu0 %v46_v18  ;;  %71 = vadd.xlane.f32.xlu1 %v70_v19 }
  0x17   :  { %50 = vadd.xlane.f32.xlu0 %v49_v22  ;;  %74 = vadd.xlane.f32.xlu1 %v73_v23 }
  0x1b   :  { %53 = vadd.xlane.f32.xlu0 %v52_v26  ;;  %77 = vadd.xlane.f32.xlu1 %v76_v27 }
  0x1f   :  { %56 = vadd.xlane.f32.xlu0 %v55_v30  ;;  %80 = vadd.xlane.f32.xlu1 %v79_v31 }
  0x90   :  { %v36_v32 = vpop.xlane.xlu0 %35  ;;  %v39_v33 = vpop.xlane.xlu1 %38 }
  0x91   :  { %v83_v34 = vmul.f32 0.125, %v36_v32  ;;  %v84_v35 = vmul.f32 0.125, %v39_v33 }
  0x93   :  { %v718_v36 = vsub.f32 %v17_v0, %v83_v34  ;;  %v720_v37 = vsub.f32 %v18_v1, %v84_v35 }
  0x94   :  { %v60_v38 = vpop.xlane.xlu0 %59  ;;  %v63_v39 = vpop.xlane.xlu1 %62 }
  0x95   :  { %v91_v40 = vmul.f32 0.125, %v60_v38  ;;  %v92_v41 = vmul.f32 0.125, %v63_v39  ;;  %v115_v42 = vmul.f32 %v718_v36, %v718_v36  ;;  %v116_v43 = vmul.f32 %v720_v37, %v720_v37 }
  0x97   :  { %v726_v44 = vsub.f32 %v25_v2, %v91_v40  ;;  %v728_v45 = vsub.f32 %v26_v5, %v92_v41  ;;  %v131_v46 = vsel %vm33_vm0, %v115_v42, 0.0  ;;  %v134_v49 = vsel %vm33_vm0, %v116_v43, 0.0 }
  0x98   :  { %132 = vadd.xlane.f32.xlu0 %v131_v46  ;;  %v42_v47 = vpop.xlane.xlu0 %41  ;;  %v66_v48 = vpop.xlane.xlu1 %65 }
  0x99   :  { %v85_v50 = vmul.f32 0.125, %v42_v47  ;;  %v93_v51 = vmul.f32 0.125, %v66_v48  ;;  %v123_v52 = vmul.f32 %v726_v44, %v726_v44  ;;  %v124_v53 = vmul.f32 %v728_v45, %v728_v45 }
  0x9b   :  { %v736_v54 = vsub.f32 %v19_v8, %v85_v50  ;;  %v738_v55 = vsub.f32 %v27_v9, %v93_v51  ;;  %v155_v56 = vsel %vm33_vm0, %v123_v52, 0.0  ;;  %v158_v59 = vsel %vm33_vm0, %v124_v53, 0.0 }
  0x9c   :  { %135 = vadd.xlane.f32.xlu0 %v134_v49  ;;  %156 = vadd.xlane.f32.xlu1 %v155_v56  ;;  %v45_v57 = vpop.xlane.xlu0 %44  ;;  %v69_v58 = vpop.xlane.xlu1 %68 }
  0x9d   :  { %v86_v60 = vmul.f32 0.125, %v45_v57  ;;  %v94_v61 = vmul.f32 0.125, %v69_v58  ;;  %v117_v62 = vmul.f32 %v736_v54, %v736_v54  ;;  %v125_v63 = vmul.f32 %v738_v55, %v738_v55 }
  0x9f   :  { %v747_v0 = vsub.f32 %v651_v12, %v86_v60  ;;  %v750_v1 = vsub.f32 %v656_v13, %v94_v61  ;;  %v137_v2 = vsel %vm33_vm0, %v117_v62, 0.0  ;;  %v161_v5 = vsel %vm33_vm0, %v125_v63, 0.0 }
  0xa0   :  { %159 = vadd.xlane.f32.xlu1 %v158_v59  ;;  %138 = vadd.xlane.f32.xlu0 %v137_v2  ;;  %v48_v3 = vpop.xlane.xlu0 %47  ;;  %v72_v4 = vpop.xlane.xlu1 %71 }
  0xa1   :  { %v87_v6 = vmul.f32 0.125, %v48_v3  ;;  %v95_v7 = vmul.f32 0.125, %v72_v4  ;;  %v118_v8 = vmul.f32 %v747_v0, %v747_v0  ;;  %v126_v9 = vmul.f32 %v750_v1, %v750_v1 }
  0xa3   :  { %v759_v10 = vsub.f32 %v665_v16, %v87_v6  ;;  %v762_v11 = vsub.f32 %v670_v17, %v95_v7  ;;  %v140_v12 = vsel %vm33_vm0, %v118_v8, 0.0  ;;  %v164_v15 = vsel %vm33_vm0, %v126_v9, 0.0 }
  0xa4   :  { %162 = vadd.xlane.f32.xlu1 %v161_v5  ;;  %141 = vadd.xlane.f32.xlu0 %v140_v12  ;;  %v51_v13 = vpop.xlane.xlu0 %50  ;;  %v75_v14 = vpop.xlane.xlu1 %74 }
  0xa5   :  { %v88_v18 = vmul.f32 0.125, %v51_v13  ;;  %v96_v19 = vmul.f32 0.125, %v75_v14  ;;  %v119_v22 = vmul.f32 %v759_v10, %v759_v10  ;;  %v127_v16 = vmul.f32 %v762_v11, %v762_v11 }
  0xa7   :  { %v771_v23 = vsub.f32 %v679_v20, %v88_v18  ;;  %v774_v17 = vsub.f32 %v684_v21, %v96_v19  ;;  %v143_v26 = vsel %vm33_vm0, %v119_v22, 0.0  ;;  %v167_v31 = vsel %vm33_vm0, %v127_v16, 0.0  ;;  %v814_v19 = vld [vmem:[%s951_s1] ss:$0 sm:$0xff] }
  0xa8   :  { %165 = vadd.xlane.f32.xlu1 %v164_v15  ;;  %144 = vadd.xlane.f32.xlu0 %v143_v26  ;;  %v54_v27 = vpop.xlane.xlu0 %53  ;;  %v78_v30 = vpop.xlane.xlu1 %77 }
  0xa9   :  { %v89_v32 = vmul.f32 0.125, %v54_v27  ;;  %v97_v33 = vmul.f32 0.125, %v78_v30  ;;  %v120_v34 = vmul.f32 %v771_v23, %v771_v23  ;;  %v128_v20 = vmul.f32 %v774_v17, %v774_v17 }
  0xab   :  { %v783_v35 = vsub.f32 %v693_v24, %v89_v32  ;;  %v786_v21 = vsub.f32 %v698_v25, %v97_v33  ;;  %v146_v38 = vsel %vm33_vm0, %v120_v34, 0.0  ;;  %v170_v41 = vsel %vm33_vm0, %v128_v20, 0.0 }
  0xac   :  { %168 = vadd.xlane.f32.xlu1 %v167_v31  ;;  %147 = vadd.xlane.f32.xlu0 %v146_v38  ;;  %v57_v39 = vpop.xlane.xlu0 %56  ;;  %v81_v40 = vpop.xlane.xlu1 %80  ;;  %v820_v31 = vld [vmem:[%s952_s2] ss:$0 sm:$0xff] }
  0xad   :  { %v90_v42 = vmul.f32 0.125, %v57_v39  ;;  %v98_v43 = vmul.f32 0.125, %v81_v40  ;;  %v121_v46 = vmul.f32 %v783_v35, %v783_v35  ;;  %v129_v24 = vmul.f32 %v786_v21, %v786_v21 }
  0xaf   :  { %v795_v47 = vsub.f32 %v707_v28, %v90_v42  ;;  %v798_v25 = vsub.f32 %v712_v29, %v98_v43  ;;  %v149_v48 = vsel %vm33_vm0, %v121_v46, 0.0  ;;  %v173_v49 = vsel %vm33_vm0, %v129_v24, 0.0  ;;  %v289_v29 = vld [vmem:[%s950_s3] sm:$0xff] }
  0xb0   :  { %171 = vadd.xlane.f32.xlu1 %v170_v41  ;;  %150 = vadd.xlane.f32.xlu0 %v149_v48 }
  0xb1   :  { %v122_v50 = vmul.f32 %v795_v47, %v795_v47  ;;  %v130_v51 = vmul.f32 %v798_v25, %v798_v25  ;;  %539 = vmatprep.subr.mxu0 %v289_v29  ;;  %565 = vmatprep.subr.mxu1 %v289_v29 }
  0xb2   :  { %540 = vmatpush3.msra.mxu0 %v289_v29  ;;  %566 = vmatpush3.msra.mxu1 %v289_v29 }
  0xb3   :  { %v152_v52 = vsel %vm33_vm0, %v122_v50, 0.0  ;;  %v176_v28 = vsel %vm33_vm0, %v130_v51, 0.0 }
  0xb4   :  { %174 = vadd.xlane.f32.xlu1 %v173_v49  ;;  %153 = vadd.xlane.f32.xlu0 %v152_v52 }
  0xb8   :  { %177 = vadd.xlane.f32.xlu1 %v176_v28 }
 0x125   :  { %v133_v53 = vpop.xlane.xlu0 %132 }
 0x126   :  { %v179_v56 = vmul.f32 0.125, %v133_v53 }
 0x128   :  { %v195_v57 = vadd.f32 1e-05, %v179_v56 }
 0x129   :  { %v157_v58 = vpop.xlane.xlu1 %156  ;;  %v136_v59 = vpop.xlane.xlu0 %135 }
 0x12a   :  { %567 = vrsqrt.f32 %v195_v57  ;;  %v187_v60 = vmul.f32 0.125, %v157_v58  ;;  %v180_v61 = vmul.f32 0.125, %v136_v59 }
 0x12c   :  { %v203_v62 = vadd.f32 1e-05, %v187_v60  ;;  %v196_v63 = vadd.f32 1e-05, %v180_v61 }
 0x12d   :  { %v160_v2 = vpop.xlane.xlu1 %159  ;;  %v139_v3 = vpop.xlane.xlu0 %138 }
 0x12e   :  { %569 = vrsqrt.f32 %v203_v62  ;;  %v188_v4 = vmul.f32 0.125, %v160_v2  ;;  %v181_v5 = vmul.f32 0.125, %v139_v3 }
 0x12f   :  { %571 = vrsqrt.f32 %v196_v63 }
 0x130   :  { %v204_v6 = vadd.f32 1e-05, %v188_v4  ;;  %v197_v7 = vadd.f32 1e-05, %v181_v5 }
 0x131   :  { %v163_v8 = vpop.xlane.xlu1 %162  ;;  %v142_v9 = vpop.xlane.xlu0 %141 }
 0x132   :  { %573 = vrsqrt.f32 %v204_v6  ;;  %v189_v12 = vmul.f32 0.125, %v163_v8  ;;  %v182_v13 = vmul.f32 0.125, %v142_v9 }
 0x133   :  { %575 = vrsqrt.f32 %v197_v7 }
 0x134   :  { %v568_v14 = vpop.eup %567  ;;  %v205_v15 = vadd.f32 1e-05, %v189_v12  ;;  %v198_v18 = vadd.f32 1e-05, %v182_v13 }
 0x135   :  { %v166_v22 = vpop.xlane.xlu1 %165  ;;  %v145_v16 = vpop.xlane.xlu0 %144  ;;  %v227_v26 = vmul.f32 %v568_v14, %v718_v36 }
 0x136   :  { %577 = vrsqrt.f32 %v205_v15  ;;  %v190_v27 = vmul.f32 0.125, %v166_v22  ;;  %v183_v30 = vmul.f32 0.125, %v145_v16 }
 0x137   :  { %579 = vrsqrt.f32 %v198_v18  ;;  %v250_v32 = vmul.f32 %v814_v19, %v227_v26 }
 0x138   :  { %v570_v33 = vpop.eup %569  ;;  %v206_v34 = vadd.f32 1e-05, %v190_v27  ;;  %v199_v20 = vadd.f32 1e-05, %v183_v30 }
 0x139   :  { %v572_v38 = vpop.eup %571  ;;  %v169_v39 = vpop.xlane.xlu1 %168  ;;  %v273_v41 = vadd.f32 %v820_v31, %v250_v32  ;;  %v235_v36 = vmul.f32 %v570_v33, %v726_v44 }
 0x13a   :  { %v148_v40 = vpop.xlane.xlu0 %147  ;;  %581 = vrsqrt.f32 %v206_v34  ;;  %v191_v42 = vmul.f32 0.125, %v169_v39  ;;  %v228_v46 = vmul.f32 %v572_v38, %v720_v37 }
 0x13b   :  { %v184_v43 = vmul.f32 0.125, %v148_v40  ;;  %583 = vrsqrt.f32 %v199_v20  ;;  %541 = vmatprep.mubr.msk.f32.mxu0 %vm33_vm0, %v273_v41  ;;  %v258_v24 = vmul.f32 %v814_v19, %v235_v36 }
 0x13c   :  { %v574_v48 = vpop.eup %573  ;;  %v207_v49 = vadd.f32 1e-05, %v191_v42  ;;  %v251_v51 = vmul.f32 %v814_v19, %v228_v46 }
 0x13d   :  { %v200_v50 = vadd.f32 1e-05, %v184_v43  ;;  %v576_v52 = vpop.eup %575  ;;  %v172_v28 = vpop.xlane.xlu1 %171  ;;  %v281_v44 = vadd.f32 %v820_v31, %v258_v24  ;;  %v236_v53 = vmul.f32 %v574_v48, %v728_v45 }
 0x13e   :  { %v151_v29 = vpop.xlane.xlu0 %150  ;;  %585 = vrsqrt.f32 %v207_v49  ;;  %v192_v56 = vmul.f32 0.125, %v172_v28  ;;  %v274_v57 = vadd.f32 %v820_v31, %v251_v51  ;;  %v229_v58 = vmul.f32 %v576_v52, %v736_v54 }
 0x13f   :  { %v185_v37 = vmul.f32 0.125, %v151_v29  ;;  %587 = vrsqrt.f32 %v200_v50  ;;  %553 = vmatprep.mubr.msk.f32.mxu1 %vm33_vm0, %v281_v44  ;;  %v259_v59 = vmul.f32 %v814_v19, %v236_v53 }
 0x140   :  { %v578_v60 = vpop.eup %577  ;;  %v208_v61 = vadd.f32 1e-05, %v192_v56  ;;  %542 = vmatmul.mubr.msk.f32.vlgmr.msra.gmra.mrb[0].mxu0 %vm33_vm0, %v274_v57  ;;  %v252_v3 = vmul.f32 %v814_v19, %v229_v58 }
 0x141   :  { %v201_v62 = vadd.f32 1e-05, %v185_v37  ;;  %v580_v63 = vpop.eup %579  ;;  %v175_v2 = vpop.xlane.xlu1 %174  ;;  %v282_v4 = vadd.f32 %v820_v31, %v259_v59  ;;  %v237_v5 = vmul.f32 %v578_v60, %v738_v55 }
 0x142   :  { %v154_v45 = vpop.xlane.xlu0 %153  ;;  %589 = vrsqrt.f32 %v208_v61  ;;  %v193_v6 = vmul.f32 0.125, %v175_v2  ;;  %v230_v54 = vmul.f32 %v580_v63, %v747_v0  ;;  %v275_v8 = vadd.f32 %v820_v31, %v252_v3 }
 0x143   :  { %v186_v7 = vmul.f32 0.125, %v154_v45  ;;  %591 = vrsqrt.f32 %v201_v62  ;;  %554 = vmatmul.mubr.msk.f32.vlgmr.msra.gmra.mrb[0].mxu1 %vm33_vm0, %v282_v4  ;;  %v260_v9 = vmul.f32 %v814_v19, %v237_v5 }
 0x144   :  { %v582_v12 = vpop.eup %581  ;;  %v209_v13 = vadd.f32 1e-05, %v193_v6  ;;  %v253_v15 = vmul.f32 %v814_v19, %v230_v54  ;;  %544 = vmatprep.mubr.msk.f32.mxu0 %vm33_vm0, %v275_v8 }
 0x145   :  { %v202_v14 = vadd.f32 1e-05, %v186_v7  ;;  %v584_v18 = vpop.eup %583  ;;  %v178_v55 = vpop.xlane.xlu1 %177  ;;  %v283_v22 = vadd.f32 %v820_v31, %v260_v9  ;;  %v238_v0 = vmul.f32 %v582_v12, %v750_v1 }
 0x146   :  { %593 = vrsqrt.f32 %v209_v13  ;;  %v194_v16 = vmul.f32 0.125, %v178_v55  ;;  %v276_v26 = vadd.f32 %v820_v31, %v253_v15  ;;  %v231_v27 = vmul.f32 %v584_v18, %v759_v10 }
 0x147   :  { %595 = vrsqrt.f32 %v202_v14  ;;  %556 = vmatprep.mubr.msk.f32.mxu1 %vm33_vm0, %v283_v22  ;;  %v261_v30 = vmul.f32 %v814_v19, %v238_v0 }
 0x148   :  { %v586_v32 = vpop.eup %585  ;;  %v210_v33 = vadd.f32 1e-05, %v194_v16  ;;  %545 = vmatmul.mubr.msk.f32.gmra.mrb[2].mxu0 %vm33_vm0, %v276_v26  ;;  %v254_v34 = vmul.f32 %v814_v19, %v231_v27 }
 0x149   :  { %v588_v20 = vpop.eup %587  ;;  %v284_v1 = vadd.f32 %v820_v31, %v261_v30  ;;  %v239_v38 = vmul.f32 %v586_v32, %v762_v11 }
 0x14a   :  { %597 = vrsqrt.f32 %v210_v33  ;;  %v277_v39 = vadd.f32 %v820_v31, %v254_v34  ;;  %v232_v10 = vmul.f32 %v588_v20, %v771_v23 }
 0x14b   :  { %557 = vmatmul.mubr.msk.f32.gmra.mrb[2].mxu1 %vm33_vm0, %v284_v1  ;;  %v262_v40 = vmul.f32 %v814_v19, %v239_v38 }
 0x14c   :  { %v590_v41 = vpop.eup %589  ;;  %547 = vmatprep.mubr.msk.f32.mxu0 %vm33_vm0, %v277_v39  ;;  %v255_v36 = vmul.f32 %v814_v19, %v232_v10 }
 0x14d   :  { %v592_v42 = vpop.eup %591  ;;  %v285_v43 = vadd.f32 %v820_v31, %v262_v40  ;;  %v240_v46 = vmul.f32 %v590_v41, %v774_v17 }
 0x14e   :  { %v278_v11 = vadd.f32 %v820_v31, %v255_v36  ;;  %v233_v24 = vmul.f32 %v592_v42, %v783_v35 }
 0x14f   :  { %559 = vmatprep.mubr.msk.f32.mxu1 %vm33_vm0, %v285_v43  ;;  %v263_v23 = vmul.f32 %v814_v19, %v240_v46 }
 0x150   :  { %v594_v48 = vpop.eup %593  ;;  %548 = vmatmul.mubr.msk.f32.gmra.mrb[4].mxu0 %vm33_vm0, %v278_v11  ;;  %v256_v49 = vmul.f32 %v814_v19, %v233_v24 }
 0x151   :  { %v596_v50 = vpop.eup %595  ;;  %v286_v51 = vadd.f32 %v820_v31, %v263_v23  ;;  %v241_v52 = vmul.f32 %v594_v48, %v786_v21 }
 0x152   :  { %v279_v17 = vadd.f32 %v820_v31, %v256_v49  ;;  %v234_v28 = vmul.f32 %v596_v50, %v795_v47 }
 0x153   :  { %560 = vmatmul.mubr.msk.f32.gmra.mrb[4].mxu1 %vm33_vm0, %v286_v51  ;;  %v264_v35 = vmul.f32 %v814_v19, %v241_v52 }
 0x154   :  { %v598_v29 = vpop.eup %597  ;;  %550 = vmatprep.mubr.msk.f32.mxu0 %vm33_vm0, %v279_v17  ;;  %v257_v44 = vmul.f32 %v814_v19, %v234_v28 }
 0x155   :  { %v287_v53 = vadd.f32 %v820_v31, %v264_v35  ;;  %v242_v56 = vmul.f32 %v598_v29, %v798_v25 }
 0x156   :  { %v280_v37 = vadd.f32 %v820_v31, %v257_v44 }
 0x157   :  { %562 = vmatprep.mubr.msk.f32.mxu1 %vm33_vm0, %v287_v53  ;;  %v265_v21 = vmul.f32 %v814_v19, %v242_v56 }
 0x158   :  { %551 = vmatmul.mubr.msk.f32.gmra.mrb[6].mxu0 %vm33_vm0, %v280_v37 }
 0x159   :  { %v288_v47 = vadd.f32 %v820_v31, %v265_v21 }
 0x15b   :  { %563 = vmatmul.mubr.msk.f32.gmra.mrb[6].mxu1 %vm33_vm0, %v288_v47 }
 0x213   :  { %v543_v57 = vpop.f32.mrb[0].mxu0 }
 0x214   :  { %485 = vst.msk [vmem:[%s953_s4 + $0x8] sm:$0xff] %vm483_vm1, %v543_v57  ;;  %v404_v25 = vpop.f32.mrb[1].mxu0 }
 0x215   :  { %484 = vst.msk [vmem:[%s953_s4] sm:$0xff] %vm483_vm1, %v404_v25 }
 0x216   :  { %v555_v19 = vpop.f32.mrb[0].mxu1 }
 0x217   :  { %493 = vst.msk [vmem:[%s953_s4 + $0x48] sm:$0xff] %vm483_vm1, %v555_v19  ;;  %v444_v31 = vpop.f32.mrb[1].mxu1 }
 0x218   :  { %492 = vst.msk [vmem:[%s953_s4 + $0x40] sm:$0xff] %vm483_vm1, %v444_v31 }
 0x21b   :  { %v546_v58 = vpop.f32.mrb[2].mxu0 }
 0x21c   :  { %487 = vst.msk [vmem:[%s953_s4 + $0x18] sm:$0xff] %vm483_vm1, %v546_v58  ;;  %v414_v59 = vpop.f32.mrb[3].mxu0 }
 0x21d   :  { %486 = vst.msk [vmem:[%s953_s4 + $0x10] sm:$0xff] %vm483_vm1, %v414_v59 }
 0x21e   :  { %v558_v60 = vpop.f32.mrb[2].mxu1 }
 0x21f   :  { %495 = vst.msk [vmem:[%s953_s4 + $0x58] sm:$0xff] %vm483_vm1, %v558_v60  ;;  %v454_v61 = vpop.f32.mrb[3].mxu1 }
 0x220   :  { %494 = vst.msk [vmem:[%s953_s4 + $0x50] sm:$0xff] %vm483_vm1, %v454_v61 }
 0x223   :  { %v549_v62 = vpop.f32.mrb[4].mxu0 }
 0x224   :  { %489 = vst.msk [vmem:[%s953_s4 + $0x28] sm:$0xff] %vm483_vm1, %v549_v62  ;;  %v424_v63 = vpop.f32.mrb[5].mxu0 }
 0x225   :  { %488 = vst.msk [vmem:[%s953_s4 + $0x20] sm:$0xff] %vm483_vm1, %v424_v63 }
 0x226   :  { %v561_v2 = vpop.f32.mrb[4].mxu1 }
 0x227   :  { %497 = vst.msk [vmem:[%s953_s4 + $0x68] sm:$0xff] %vm483_vm1, %v561_v2  ;;  %v464_v45 = vpop.f32.mrb[5].mxu1 }
 0x228   :  { %496 = vst.msk [vmem:[%s953_s4 + $0x60] sm:$0xff] %vm483_vm1, %v464_v45 }
 0x22b   :  { %v552_v3 = vpop.f32.mrb[6].mxu0 }
 0x22c   :  { %491 = vst.msk [vmem:[%s953_s4 + $0x38] sm:$0xff] %vm483_vm1, %v552_v3  ;;  %v434_v4 = vpop.f32.mrb[7].mxu0 }
 0x22d   :  { %490 = vst.msk [vmem:[%s953_s4 + $0x30] sm:$0xff] %vm483_vm1, %v434_v4 }
 0x22e   :  { %v564_v5 = vpop.f32.mrb[6].mxu1 }
 0x22f   :  { %499 = vst.msk [vmem:[%s953_s4 + $0x78] sm:$0xff] %vm483_vm1, %v564_v5  ;;  %v474_v6 = vpop.f32.mrb[7].mxu1 }
 0x230   :  { %498 = vst.msk [vmem:[%s953_s4 + $0x70] sm:$0xff] %vm483_vm1, %v474_v6 }

// kernel: transformer_block.8
= control target key start
LH: loop header
LB: loop body
LE: loop exit
PB: predicated region body
PF: predicated region fallthrough
CT: control target
= control target key end

     0   :  { %s928_s15 = smov 0   ;;  %s1416_s0 = inlined_call_operand.vmem [shape: f32[2,8,8,32], index: 0, kind: input, shape index: {}]   ;;  %s1417_s1 = inlined_call_operand.vmem [shape: f32[2,8,8,32], index: 1, kind: input, shape index: {}]   ;;  %s1418_s2 = inlined_call_operand.vmem [shape: f32[9,32], index: 2, kind: input, shape index: {}]   ;;  %s1419_s3 = inlined_call_operand.vmem [shape: f32[9,32], index: 3, kind: input, shape index: {}]   ;;  %s1420_s4 = inlined_call_operand.vmem [shape: f32[2,8,8,32], index: 4, kind: output, shape index: {}]  }
   0x1 LB: > { %s867_s16 = sadd.s32 4294967295, %s900_s15   ;;  %p871_p0 = scmp.ge.s32.totalorder %s900_s15, 1  ;;  %s900_s15 = sphi %s928_s15, %s14_s15  }
   0x2   : > { %p172_p1 = scmp.lt.s32.totalorder %s900_s15, 3 }
   0x4   : > { %p173_p2 = pnand %p871_p0, %p172_p1 }
   0x6   : > { %176 = sbr.rel (%p173_p2) target bundleno = 118 (0x76), region = 36 }
   0xd   : > { %vm218_vm0 = vcmask 261120   ;;  %vm221_vm1 = vcmask 253952   ;;  %p938_p3 = scmp.lt.s32.totalorder %s867_s16, 1  ;;  %v277_v0 = vlaneseq  ;;  %v902_v1 = vmov 0.0   ;;  %v981_v3 = vld [vmem:[%s1418_s2] sm:$0xff] }
   0xe   : > { %219 = vst.msk [vmem:[#allocation2] sm:$0xff] %vm218_vm0, %v902_v1  ;;  %220 = vst.msk [vmem:[#allocation2 + $0x8] sm:$0xff] %vm218_vm0, %v902_v1  ;;  %v538_v22 = vld [vmem:[%s1419_s3] sm:$0xff]  ;;  %v1080_v57 = vld [vmem:[%s1418_s2 + $0x8] ss:$0 sm:$0xff] }
   0xf   : > { %223 = vst.msk [vmem:[#allocation2 + $0x18] sm:$0xff] %vm218_vm0, %v902_v1  ;;  %224 = vst.msk [vmem:[#allocation2 + $0x20] sm:$0xff] %vm218_vm0, %v902_v1  ;;  %s1471_s16 = smov (!%p938_p3, %s867_s16), 1  ;;  %v976_v2 = vshrl.u32 %v277_v0, 7 }
  0x10   : > { %226 = vst.msk [vmem:[#allocation2 + $0x30] sm:$0xff] %vm218_vm0, %v902_v1  ;;  %227 = vst.msk [vmem:[#allocation2 + $0x38] sm:$0xff] %vm218_vm0, %v902_v1  ;;  %s983_s20 = sshll.u32 %s1471_s16, 6 }
  0x11   : > { %229 = vst.msk [vmem:[#allocation2 + $0x48] sm:$0xff] %vm218_vm0, %v902_v1  ;;  %230 = vst.msk [vmem:[#allocation2 + $0x50] sm:$0xff] %vm218_vm0, %v902_v1  ;;  %v279_v4 = vsub.s32 0, %v976_v2  ;;  %v307_v5 = vsub.s32 1, %v976_v2  ;;  %s207_s23 = scalar_lea.vmem %s1416_s0, %s983_s20  ;;  %v335_v10 = vsub.s32 2, %v976_v2  ;;  %s1008_s26 = scalar_lea.vmem %s1417_s1, %s983_s20  ;;  %v363_v23 = vsub.s32 3, %v976_v2 }
  0x12   : > { %232 = vst.msk [vmem:[#allocation2 + $0x60] sm:$0xff] %vm218_vm0, %v902_v1  ;;  %233 = vst.msk [vmem:[#allocation2 + $0x68] sm:$0xff] %vm218_vm0, %v902_v1  ;;  %v250_v6 = vld [vmem:[%s207_s23] sm:$0xff]  ;;  %v251_v7 = vld [vmem:[%s207_s23 + $0x8] sm:$0xff]  ;;  %v391_v25 = vsub.s32 4, %v976_v2  ;;  %v419_v26 = vsub.s32 5, %v976_v2  ;;  %s1301_s9 = scalar_lea.vmem %s1420_s4, %s983_s20 }
  0x13   : > { %235 = vst.msk [vmem:[#allocation2 + $0x78] sm:$0xff] %vm218_vm0, %v902_v1  ;;  %236 = vst.msk [vmem:[#allocation2 + $0x80] sm:$0xff] %vm218_vm0, %v902_v1  ;;  %v992_v8 = vrot.slane %v981_v3, %v279_v4  ;;  %v995_v9 = vrot.slane %v981_v3, %v307_v5  ;;  %v252_v11 = vld [vmem:[%s207_s23 + $0x10] sm:$0xff]  ;;  %v253_v12 = vld [vmem:[%s207_s23 + $0x18] sm:$0xff]  ;;  %v1013_v19 = vrot.slane %v981_v3, %v335_v10  ;;  %v448_v27 = vsub.s32 6, %v976_v2 }
  0x14   : > { %238 = vst.msk [vmem:[#allocation2 + $0x90] sm:$0xff] %vm218_vm0, %v902_v1  ;;  %239 = vst.msk [vmem:[#allocation2 + $0x98] sm:$0xff] %vm218_vm0, %v902_v1  ;;  %v254_v13 = vld [vmem:[%s207_s23 + $0x20] sm:$0xff]  ;;  %v255_v14 = vld [vmem:[%s207_s23 + $0x28] sm:$0xff]  ;;  %v476_v31 = vsub.s32 7, %v976_v2  ;;  %v1029_v33 = vrot.slane %v538_v22, %v279_v4  ;;  %v1031_v34 = vrot.slane %v538_v22, %v307_v5  ;;  %v1033_v35 = vrot.slane %v538_v22, %v335_v10 }
  0x15   : > { %241 = vst.msk [vmem:[#allocation2 + $0xa8] sm:$0xff] %vm218_vm0, %v902_v1  ;;  %242 = vst.msk [vmem:[#allocation2 + $0xb0] sm:$0xff] %vm218_vm0, %v902_v1  ;;  %v256_v15 = vld [vmem:[%s207_s23 + $0x30] sm:$0xff]  ;;  %v257_v16 = vld [vmem:[%s207_s23 + $0x38] sm:$0xff]  ;;  %v1056_v48 = vrot.slane %v981_v3, %v363_v23  ;;  %v1059_v49 = vrot.slane %v981_v3, %v391_v25  ;;  %v1062_v50 = vrot.slane %v981_v3, %v419_v26 }
  0x16   : > { %244 = vst.msk [vmem:[#allocation2 + $0xc0] sm:$0xff] %vm218_vm0, %v902_v1  ;;  %245 = vst.msk [vmem:[#allocation2 + $0xc8] sm:$0xff] %vm218_vm0, %v902_v1  ;;  %v269_v17 = vld [vmem:[#allocation2 + $0x7] sm:$0xff]  ;;  %v524_v29 = vld [vmem:[%s1008_s26 + $0x10] sm:$0xff]  ;;  %v1065_v51 = vrot.slane %v981_v3, %v448_v27  ;;  %v1083_v58 = vrot.slane %v981_v3, %v476_v31  ;;  %v1085_v59 = vrot.slane %v538_v22, %v363_v23 }
  0x17   : > { %247 = vst.msk [vmem:[#allocation2 + $0xd8] sm:$0xff] %vm218_vm0, %v902_v1  ;;  %248 = vst.msk [vmem:[#allocation2 + $0xe0] sm:$0xff] %vm218_vm0, %v902_v1  ;;  %v297_v18 = vld [vmem:[#allocation2 + $0x8] sm:$0xff]  ;;  %v281_v20 = vmul.f32 %v992_v8, %v269_v17  ;;  %v525_v30 = vld [vmem:[%s1008_s26 + $0x18] sm:$0xff]  ;;  %v1087_v60 = vrot.slane %v538_v22, %v391_v25  ;;  %v1089_v61 = vrot.slane %v538_v22, %v419_v26 }
  0x18   : > { %222 = vst.msk [vmem:[#allocation2 + $0x10] sm:$0x1] %vm221_vm1, %v902_v1  ;;  %225 = vst.msk [vmem:[#allocation2 + $0x28] sm:$0x1] %vm221_vm1, %v902_v1  ;;  %v309_v21 = vmul.f32 %v995_v9, %v297_v18  ;;  %v523_v28 = vld [vmem:[%s1008_s26 + $0x8] sm:$0xff]  ;;  %v526_v32 = vld [vmem:[%s1008_s26 + $0x20] sm:$0xff]  ;;  %v1100_v2 = vmul.f32 %v1029_v33, %v269_v17  ;;  %v1103_v3 = vmul.f32 %v1031_v34, %v297_v18 }
  0x19   : > { %228 = vst.msk [vmem:[#allocation2 + $0x40] sm:$0x1] %vm221_vm1, %v902_v1  ;;  %231 = vst.msk [vmem:[#allocation2 + $0x58] sm:$0x1] %vm221_vm1, %v902_v1  ;;  %v527_v43 = vld [vmem:[%s1008_s26 + $0x28] sm:$0xff]  ;;  %v528_v52 = vld [vmem:[%s1008_s26 + $0x30] sm:$0xff]  ;;  %v1108_v5 = vrot.slane %v538_v22, %v448_v27 }
  0x1a   : > { %234 = vst.msk [vmem:[#allocation2 + $0x70] sm:$0x1] %vm221_vm1, %v902_v1  ;;  %237 = vst.msk [vmem:[#allocation2 + $0x88] sm:$0x1] %vm221_vm1, %v902_v1  ;;  %v317_v41 = vadd.f32 %v309_v21, %v281_v20  ;;  %v522_v56 = vld [vmem:[%s1008_s26] sm:$0xff] }
  0x1b   : > { %240 = vst.msk [vmem:[#allocation2 + $0xa0] sm:$0x1] %vm221_vm1, %v902_v1  ;;  %243 = vst.msk [vmem:[#allocation2 + $0xb8] sm:$0x1] %vm221_vm1, %v902_v1 }
  0x1c   : > { %246 = vst.msk [vmem:[#allocation2 + $0xd0] sm:$0x1] %vm221_vm1, %v902_v1  ;;  %249 = vst.msk [vmem:[#allocation2 + $0xe8] sm:$0x1] %vm221_vm1, %v902_v1  ;;  %v529_v1 = vld [vmem:[%s1008_s26 + $0x38] sm:$0xff] }
  0x1d   : > { %259 = vst.msk [vmem:[#allocation2 + $0x20] sm:$0xff] %vm218_vm0, %v250_v6  ;;  %260 = vst.msk [vmem:[#allocation2 + $0x38] sm:$0xff] %vm218_vm0, %v251_v7 }
  0x1e   : > { %261 = vst.msk [vmem:[#allocation2 + $0x50] sm:$0xff] %vm218_vm0, %v252_v11  ;;  %262 = vst.msk [vmem:[#allocation2 + $0x68] sm:$0xff] %vm218_vm0, %v253_v12  ;;  %v1035_v36 = vld [vmem:[#allocation2 + $0xdf] sm:$0xff]  ;;  %v1117_v12 = vrot.slane %v538_v22, %v476_v31 }
  0x1f   : > { %263 = vst.msk [vmem:[#allocation2 + $0x80] sm:$0xff] %vm218_vm0, %v254_v13  ;;  %264 = vst.msk [vmem:[#allocation2 + $0x98] sm:$0xff] %vm218_vm0, %v255_v14  ;;  %v325_v24 = vld [vmem:[#allocation2 + $0x9] sm:$0xff]  ;;  %v1037_v37 = vld [vmem:[#allocation2 + $0xe0] sm:$0xff]  ;;  %v1121_v13 = vmul.f32 %v1065_v51, %v1035_v36 }
  0x20   : > { %265 = vst.msk [vmem:[#allocation2 + $0xb0] sm:$0xff] %vm218_vm0, %v256_v15  ;;  %266 = vst.msk [vmem:[#allocation2 + $0xc8] sm:$0xff] %vm218_vm0, %v257_v16  ;;  %v337_v42 = vmul.f32 %v1013_v19, %v325_v24  ;;  %v1106_v4 = vmul.f32 %v1033_v35, %v325_v24  ;;  %v1125_v14 = vmul.f32 %v1083_v58, %v1037_v37 }
  0x21   : > { %1436 = vst [vmem:[#allocation3_spill] sm:$0xff] %v1029_v33  ;;  %1437 = vst [vmem:[#allocation4_spill] sm:$0xff] %v1031_v34 }
  0x22   : > { %1438 = vst [vmem:[#allocation5_spill] sm:$0xff] %v1033_v35  ;;  %1439 = vst [vmem:[#allocation6_spill] sm:$0xff] %v1035_v36  ;;  %v345_v11 = vadd.f32 %v337_v42, %v317_v41 }
  0x23   : > { %1440 = vst [vmem:[#allocation7_spill] sm:$0xff] %v1037_v37  ;;  %v1047_v44 = vld [vmem:[#allocation2 + $0xe1] sm:$0xff]  ;;  %1443 = vst [vmem:[#allocation10_spill] sm:$0xff] %v1121_v13 }
  0x24   : > { %v1039_v38 = vld [vmem:[#allocation2 + $0x37] sm:$0xff]  ;;  %1441 = vst [vmem:[#allocation8_spill] sm:$0xff] %v1047_v44  ;;  %1444 = vst [vmem:[#allocation11_spill] sm:$0xff] %v1125_v14  ;;  %v1144_v22 = vmul.f32 %v1080_v57, %v1047_v44  ;;  %v270_v26 = vld [vmem:[#allocation2 + $0x1f] sm:$0xff] }
  0x25   : > { %v1041_v39 = vld [vmem:[#allocation2 + $0x38] sm:$0xff]  ;;  %v1049_v45 = vld [vmem:[#allocation2 + $0x4f] sm:$0xff]  ;;  %v1069_v53 = vld [vmem:[#allocation2 + $0x67] sm:$0xff]  ;;  %v283_v15 = vmul.f32 %v992_v8, %v1039_v38  ;;  %v282_v31 = vmul.f32 %v992_v8, %v270_v26  ;;  %v365_v41 = vmul.f32 %v1056_v48, %v270_v26 }
  0x26   : > { %v1043_v40 = vld [vmem:[#allocation2 + $0x39] sm:$0xff]  ;;  %v1051_v46 = vld [vmem:[#allocation2 + $0x50] sm:$0xff]  ;;  %v1071_v54 = vld [vmem:[#allocation2 + $0x68] sm:$0xff]  ;;  %v311_v16 = vmul.f32 %v995_v9, %v1041_v39  ;;  %1448 = vst [vmem:[#allocation15_spill] sm:$0xff] %v1144_v22  ;;  %v284_v23 = vmul.f32 %v992_v8, %v1049_v45 }
  0x27   : > { %v1053_v47 = vld [vmem:[#allocation2 + $0x51] sm:$0xff]  ;;  %531 = vst.msk [vmem:[#allocation2 + $0x38] sm:$0xff] %vm218_vm0, %v523_v28  ;;  %v1073_v55 = vld [vmem:[#allocation2 + $0x69] sm:$0xff]  ;;  %v1091_v62 = vld [vmem:[#allocation2 + $0x7f] sm:$0xff]  ;;  %v1133_v17 = vmul.f32 %v1013_v19, %v1043_v40  ;;  %v373_v14 = vadd.f32 %v365_v41, %v345_v11  ;;  %v313_v11 = vmul.f32 %v995_v9, %v1071_v54 }
  0x28   : > { %532 = vst.msk [vmem:[#allocation2 + $0x50] sm:$0xff] %vm218_vm0, %v524_v29  ;;  %v1093_v63 = vld [vmem:[#allocation2 + $0x80] sm:$0xff]  ;;  %533 = vst.msk [vmem:[#allocation2 + $0x68] sm:$0xff] %vm218_vm0, %v525_v30  ;;  %v1110_v6 = vld [vmem:[#allocation2 + $0x97] sm:$0xff]  ;;  %v366_v29 = vmul.f32 %v1056_v48, %v1039_v38  ;;  %v312_v30 = vmul.f32 %v995_v9, %v1051_v46  ;;  %v1163_v37 = vmul.f32 %v1013_v19, %v1053_v47 }
  0x29   : > { %v1095_v0 = vld [vmem:[#allocation2 + $0x81] sm:$0xff]  ;;  %v1112_v7 = vld [vmem:[#allocation2 + $0x98] sm:$0xff]  ;;  %v1135_v18 = vld [vmem:[#allocation2 + $0xaf] sm:$0xff]  ;;  %v287_v24 = vmul.f32 %v992_v8, %v1110_v6 }
  0x2a   : > { %1442 = vst [vmem:[#allocation9_spill] sm:$0xff] %v1112_v7  ;;  %v1114_v10 = vld [vmem:[#allocation2 + $0x99] sm:$0xff]  ;;  %534 = vst.msk [vmem:[#allocation2 + $0x80] sm:$0xff] %vm218_vm0, %v526_v32  ;;  %v1137_v20 = vld [vmem:[#allocation2 + $0xb0] sm:$0xff]  ;;  %v315_v25 = vmul.f32 %v995_v9, %v1112_v7  ;;  %v319_v7 = vadd.f32 %v311_v16, %v283_v15  ;;  %v371_v16 = vmul.f32 %v1056_v48, %v1135_v18 }
  0x2b   : > { %1445 = vst [vmem:[#allocation12_spill] sm:$0xff] %v1135_v18  ;;  %1446 = vst [vmem:[#allocation13_spill] sm:$0xff] %v1137_v20  ;;  %v1139_v21 = vld [vmem:[#allocation2 + $0xb1] sm:$0xff]  ;;  %v298_v27 = vld [vmem:[#allocation2 + $0x20] sm:$0xff]  ;;  %v316_v13 = vmul.f32 %v995_v9, %v1137_v20  ;;  %v343_v35 = vmul.f32 %v1013_v19, %v1114_v10 }
  0x2c   : > { %1447 = vst [vmem:[#allocation14_spill] sm:$0xff] %v1139_v21  ;;  %535 = vst.msk [vmem:[#allocation2 + $0x98] sm:$0xff] %vm218_vm0, %v527_v43  ;;  %v326_v28 = vld [vmem:[#allocation2 + $0x21] sm:$0xff]  ;;  %v310_v32 = vmul.f32 %v995_v9, %v298_v27  ;;  %v416_v44 = vld [vmem:[#allocation2 + $0xc9] sm:$0xff]  ;;  %v393_v22 = vmul.f32 %v1059_v49, %v298_v27  ;;  %v323_v34 = vadd.f32 %v315_v25, %v287_v24 }
  0x2d   : > { %536 = vst.msk [vmem:[#allocation2 + $0xb0] sm:$0xff] %vm218_vm0, %v528_v52  ;;  %530 = vst.msk [vmem:[#allocation2 + $0x20] sm:$0xff] %vm218_vm0, %v522_v56  ;;  %v360_v42 = vld [vmem:[#allocation2 + $0xc7] sm:$0xff]  ;;  %v1167_v52 = vmul.f32 %v1056_v48, %v1049_v45  ;;  %v338_v36 = vmul.f32 %v1013_v19, %v326_v28  ;;  %v288_v56 = vmul.f32 %v992_v8, %v1135_v18 }
  0x2e   : > { %v388_v43 = vld [vmem:[#allocation2 + $0xc8] sm:$0xff]  ;;  %1449 = vst [vmem:[#allocation16_spill] sm:$0xff] %v1163_v37  ;;  %v318_v26 = vadd.f32 %v310_v32, %v282_v31  ;;  %v285_v37 = vmul.f32 %v992_v8, %v1069_v53  ;;  %v401_v27 = vadd.f32 %v393_v22, %v373_v14  ;;  %v1185_v32 = vmul.f32 %v1013_v19, %v1073_v55 }
  0x2f   : > { %1450 = vst [vmem:[#allocation17_spill] sm:$0xff] %v1167_v52  ;;  %537 = vst.msk [vmem:[#allocation2 + $0xc8] sm:$0xff] %vm218_vm0, %v529_v1  ;;  %v421_v1 = vmul.f32 %v1062_v50, %v326_v28  ;;  %v324_v31 = vadd.f32 %v316_v13, %v288_v56  ;;  %v351_v15 = vadd.f32 %v343_v35, %v323_v34 }
  0x30   : > { %v346_v33 = vadd.f32 %v338_v36, %v318_v26  ;;  %v450_v36 = vmul.f32 %v1065_v51, %v1039_v38  ;;  %v344_v14 = vmul.f32 %v1013_v19, %v1139_v21  ;;  %v286_v13 = vmul.f32 %v992_v8, %v1091_v62 }
  0x31   : > { %v429_v52 = vadd.f32 %v421_v1, %v401_v27  ;;  %v314_v22 = vmul.f32 %v995_v9, %v1093_v63  ;;  %v394_v34 = vmul.f32 %v1059_v49, %v1041_v39  ;;  %v379_v35 = vadd.f32 %v371_v16, %v351_v15 }
  0x32   : > { %v374_v41 = vadd.f32 %v366_v29, %v346_v33  ;;  %v352_v25 = vadd.f32 %v344_v14, %v324_v31  ;;  %v372_v33 = vmul.f32 %v1056_v48, %v360_v42  ;;  %v478_v38 = vmul.f32 %v1083_v58, %v1041_v39 }
  0x33   : > { %v458_v24 = vadd.f32 %v450_v36, %v429_v52  ;;  %v1202_v28 = vadd.f32 %v312_v30, %v284_v23  ;;  %v1206_v29 = vmul.f32 %v1056_v48, %v1069_v53  ;;  %v399_v9 = vmul.f32 %v1059_v49, %v1137_v20  ;;  %v1455_v20 = vld [vmem:[#allocation4_spill] sm:$0xff] }
  0x34   : > { %v402_v8 = vadd.f32 %v394_v34, %v374_v41  ;;  %v1210_v26 = vadd.f32 %v313_v11, %v285_v37  ;;  %v1214_v52 = vmul.f32 %v1013_v19, %v1095_v0  ;;  %v506_v39 = vmul.f32 %v1080_v57, %v1043_v40  ;;  %v624_v15 = vld [vmem:[#allocation2 + $0x1f] sm:$0xff] }
  0x35   : > { %v486_v56 = vadd.f32 %v478_v38, %v458_v24  ;;  %v1218_v23 = vadd.f32 %v314_v22, %v286_v13  ;;  %v1222_v30 = vmul.f32 %v1056_v48, %v1091_v62  ;;  %v407_v27 = vadd.f32 %v399_v9, %v379_v35  ;;  %v652_v36 = vld [vmem:[#allocation2 + $0x20] sm:$0xff]  ;;  %v708_v24 = vld [vmem:[#allocation2 + $0x37] sm:$0xff] }
  0x36   : > { %v422_v1 = vmul.f32 %v1062_v50, %v1043_v40  ;;  %v1228_v37 = vmul.f32 %v1056_v48, %v1110_v6  ;;  %v380_v19 = vadd.f32 %v372_v33, %v352_v25  ;;  %v400_v31 = vmul.f32 %v1059_v49, %v388_v43  ;;  %v680_v35 = vld [vmem:[#allocation2 + $0x21] sm:$0xff]  ;;  %v736_v38 = vld [vmem:[#allocation2 + $0x38] sm:$0xff] }
  0x37   : > { %v514_v11 = vadd.f32 %v506_v39, %v486_v56  ;;  %v427_v16 = vmul.f32 %v1062_v50, %v1139_v21  ;;  %v428_v41 = vmul.f32 %v1062_v50, %v416_v44  ;;  %v451_v13 = vmul.f32 %v1065_v51, %v1049_v45 }
  0x38   : > { %1451 = vst [vmem:[#allocation18_spill] sm:$0xff] %v1228_v37  ;;  %v430_v14 = vadd.f32 %v422_v1, %v402_v8  ;;  %v456_v40 = vmul.f32 %v1065_v51, %v360_v42  ;;  %v484_v48 = vmul.f32 %v1083_v58, %v388_v43  ;;  %v1239_v22 = vmul.f32 %v1080_v57, %v416_v44  ;;  %v1248_v42 = vld [vmem:[%s1419_s3 + $0x8] ss:$0 sm:$0xff]  ;;  %v764_v43 = vld [vmem:[#allocation2 + $0x39] sm:$0xff] }
  0x39   : > { %v560_v34 = vadd.f32 %v1100_v2, %v514_v11  ;;  %v435_v25 = vadd.f32 %v427_v16, %v407_v27  ;;  %v636_v33 = vmul.f32 %v1085_v59, %v624_v15  ;;  %v479_v8 = vmul.f32 %v1083_v58, %v1051_v46  ;;  %v1453_v16 = vld [vmem:[#allocation17_spill] sm:$0xff] }
  0x3a   : > { %1452 = vst [vmem:[#allocation19_spill] sm:$0xff] %v1239_v22  ;;  %v459_v9 = vadd.f32 %v451_v13, %v430_v14  ;;  %v408_v45 = vadd.f32 %v400_v31, %v380_v19  ;;  %v664_v2 = vmul.f32 %v1087_v60, %v652_v36  ;;  %v347_v56 = vadd.f32 %v1133_v17, %v319_v7 }
  0x3b   : > { %v588_v44 = vadd.f32 %v1103_v3, %v560_v34  ;;  %v692_v39 = vmul.f32 %v1089_v61, %v680_v35  ;;  %v720_v27 = vmul.f32 %v1108_v5, %v708_v24  ;;  %v507_v19 = vmul.f32 %v1080_v57, %v1053_v47  ;;  %v1454_v34 = vld [vmem:[#allocation3_spill] sm:$0xff] }
  0x3c   : > { %v487_v1 = vadd.f32 %v479_v8, %v459_v9  ;;  %v748_v11 = vmul.f32 %v1117_v12, %v736_v38  ;;  %v375_v14 = vadd.f32 %v1453_v16, %v347_v56  ;;  %v395_v3 = vmul.f32 %v1059_v49, %v1051_v46  ;;  %v1456_v56 = vld [vmem:[#allocation5_spill] sm:$0xff] }
  0x3d   : > { %v616_v31 = vadd.f32 %v1106_v4, %v588_v44  ;;  %v464_v13 = vadd.f32 %v456_v40, %v435_v25  ;;  %v776_v7 = vmul.f32 %v1248_v42, %v764_v43  ;;  %v553_v21 = vmul.f32 %v624_v15, %v1454_v34  ;;  %v709_v25 = vld [vmem:[#allocation2 + $0x4f] sm:$0xff] }
  0x3e   : > { %v515_v17 = vadd.f32 %v507_v19, %v487_v1  ;;  %v1264_v22 = vadd.f32 %v428_v41, %v408_v45  ;;  %v403_v8 = vadd.f32 %v395_v3, %v375_v14  ;;  %v423_v4 = vmul.f32 %v1062_v50, %v1053_v47  ;;  %v1457_v41 = vld [vmem:[#allocation16_spill] sm:$0xff] }
  0x3f   : > { %v644_v9 = vadd.f32 %v636_v33, %v616_v31  ;;  %v581_v18 = vmul.f32 %v652_v36, %v1455_v20  ;;  %v609_v16 = vmul.f32 %v680_v35, %v1456_v56  ;;  %v637_v46 = vmul.f32 %v708_v24, %v1085_v59  ;;  %v737_v35 = vld [vmem:[#allocation2 + $0x50] sm:$0xff] }
  0x40   : > { %v561_v44 = vadd.f32 %v553_v21, %v515_v17  ;;  %v431_v37 = vadd.f32 %v423_v4, %v403_v8  ;;  %v452_v15 = vmul.f32 %v1065_v51, %v1069_v53  ;;  %v348_v33 = vadd.f32 %v1457_v41, %v1202_v28  ;;  %v1280_v19 = vld [vmem:[#allocation2 + $0x51] sm:$0xff] }
  0x41   : > { %v672_v40 = vadd.f32 %v664_v2, %v644_v9  ;;  %v1275_v45 = vadd.f32 %v484_v48, %v464_v13  ;;  %v665_v47 = vmul.f32 %v736_v38, %v1087_v60  ;;  %v480_v21 = vmul.f32 %v1083_v58, %v1071_v54 }
  0x42   : > { %v589_v1 = vadd.f32 %v581_v18, %v561_v44  ;;  %v460_v2 = vadd.f32 %v452_v15, %v431_v37  ;;  %v376_v31 = vadd.f32 %v1206_v29, %v348_v33  ;;  %v396_v53 = vmul.f32 %v1059_v49, %v1071_v54 }
  0x43   : > { %v700_v36 = vadd.f32 %v692_v39, %v672_v40  ;;  %v693_v28 = vmul.f32 %v764_v43, %v1089_v61  ;;  %v721_v18 = vmul.f32 %v1108_v5, %v709_v25  ;;  %v508_v48 = vmul.f32 %v1080_v57, %v1073_v55 }
  0x44   : > { %v617_v14 = vadd.f32 %v609_v16, %v589_v1  ;;  %v488_v39 = vadd.f32 %v480_v21, %v460_v2  ;;  %v404_v13 = vadd.f32 %v396_v53, %v376_v31  ;;  %v424_v37 = vmul.f32 %v1062_v50, %v1073_v55  ;;  %v710_v1 = vld [vmem:[#allocation2 + $0x67] sm:$0xff] }
  0x45   : > { %v728_v3 = vadd.f32 %v720_v27, %v700_v36  ;;  %v749_v29 = vmul.f32 %v1117_v12, %v737_v35  ;;  %v777_v54 = vmul.f32 %v1248_v42, %v1280_v19  ;;  %v554_v9 = vmul.f32 %v708_v24, %v1454_v34  ;;  %v766_v31 = vld [vmem:[#allocation2 + $0x69] sm:$0xff] }
  0x46   : > { %v645_v17 = vadd.f32 %v637_v46, %v617_v14  ;;  %v516_v4 = vadd.f32 %v508_v48, %v488_v39  ;;  %v432_v44 = vadd.f32 %v424_v37, %v404_v13  ;;  %v453_v16 = vmul.f32 %v1065_v51, %v1091_v62 }
  0x47   : > { %v756_v8 = vadd.f32 %v748_v11, %v728_v3  ;;  %v582_v27 = vmul.f32 %v736_v38, %v1455_v20  ;;  %v610_v46 = vmul.f32 %v764_v43, %v1456_v56  ;;  %v349_v24 = vadd.f32 %v1185_v32, %v1210_v26  ;;  %v738_v26 = vld [vmem:[#allocation2 + $0x68] sm:$0xff] }
  0x48   : > { %v673_v55 = vadd.f32 %v665_v47, %v645_v17  ;;  %v562_v40 = vadd.f32 %v554_v9, %v516_v4  ;;  %v461_v15 = vadd.f32 %v453_v16, %v432_v44  ;;  %v481_v62 = vmul.f32 %v1083_v58, %v1093_v63  ;;  %v1458_v44 = vld [vmem:[#allocation9_spill] sm:$0xff] }
  0x49   : > { %v784_v11 = vadd.f32 %v776_v7, %v756_v8  ;;  %v638_v33 = vmul.f32 %v709_v25, %v1085_v59  ;;  %v377_v21 = vadd.f32 %v1222_v30, %v349_v24  ;;  %v397_v38 = vmul.f32 %v1059_v49, %v1093_v63  ;;  %v739_v24 = vld [vmem:[#allocation2 + $0x80] sm:$0xff] }
  0x4a   : > { %v701_v41 = vadd.f32 %v693_v28, %v673_v55  ;;  %v590_v43 = vadd.f32 %v582_v27, %v562_v40  ;;  %v666_v32 = vmul.f32 %v737_v35, %v1087_v60  ;;  %v489_v7 = vadd.f32 %v481_v62, %v461_v15 }
  0x4b   : > { %792 = vst.msk [vmem:[%s1301_s9] sm:$0xff] %vm218_vm0, %v784_v11  ;;  %v509_v47 = vmul.f32 %v1080_v57, %v1095_v0  ;;  %v694_v2 = vmul.f32 %v1280_v19, %v1089_v61  ;;  %v405_v53 = vadd.f32 %v397_v38, %v377_v21  ;;  %v425_v30 = vmul.f32 %v1062_v50, %v1095_v0  ;;  %v1459_v11 = vld [vmem:[#allocation18_spill] sm:$0xff] }
  0x4c   : > { %v729_v36 = vadd.f32 %v721_v18, %v701_v41  ;;  %v618_v63 = vadd.f32 %v610_v46, %v590_v43  ;;  %v722_v14 = vmul.f32 %v1108_v5, %v710_v1  ;;  %v555_v48 = vmul.f32 %v709_v25, %v1454_v34  ;;  %v711_v46 = vld [vmem:[#allocation2 + $0x7f] sm:$0xff] }
  0x4d   : > { %v517_v28 = vadd.f32 %v509_v47, %v489_v7  ;;  %v750_v39 = vmul.f32 %v1117_v12, %v738_v26  ;;  %v433_v13 = vadd.f32 %v425_v30, %v405_v53  ;;  %v454_v18 = vmul.f32 %v1065_v51, %v1110_v6  ;;  %v1460_v30 = vld [vmem:[#allocation12_spill] sm:$0xff] }
  0x4e   : > { %v757_v3 = vadd.f32 %v749_v29, %v729_v36  ;;  %v646_v37 = vadd.f32 %v638_v33, %v618_v63  ;;  %v778_v17 = vmul.f32 %v1248_v42, %v766_v31  ;;  %v583_v0 = vmul.f32 %v737_v35, %v1455_v20 }
  0x4f   : > { %v563_v9 = vadd.f32 %v555_v48, %v517_v28  ;;  %v462_v4 = vadd.f32 %v454_v18, %v433_v13  ;;  %v482_v16 = vmul.f32 %v1083_v58, %v1458_v44  ;;  %v350_v25 = vadd.f32 %v1214_v52, %v1218_v23 }
  0x50   : > { %v785_v8 = vadd.f32 %v777_v54, %v757_v3  ;;  %v674_v29 = vadd.f32 %v666_v32, %v646_v37  ;;  %v611_v27 = vmul.f32 %v1280_v19, %v1456_v56  ;;  %v639_v6 = vmul.f32 %v710_v1, %v1085_v59  ;;  %v740_v3 = vld [vmem:[#allocation2 + $0x98] sm:$0xff]  ;;  %v1462_v37 = vld [vmem:[#allocation19_spill] sm:$0xff] }
  0x51   : > { %v591_v55 = vadd.f32 %v583_v0, %v563_v9  ;;  %v490_v35 = vadd.f32 %v482_v16, %v462_v4  ;;  %v510_v54 = vmul.f32 %v1080_v57, %v1114_v10  ;;  %v378_v40 = vadd.f32 %v1459_v11, %v350_v25  ;;  %v1463_v4 = vld [vmem:[#allocation14_spill] sm:$0xff] }
  0x52   : > { %793 = vst.msk [vmem:[%s1301_s9 + $0x8] sm:$0xff] %vm218_vm0, %v785_v8  ;;  %v398_v52 = vmul.f32 %v1059_v49, %v1458_v44  ;;  %v702_v23 = vadd.f32 %v694_v2, %v674_v29  ;;  %v667_v62 = vmul.f32 %v738_v26, %v1087_v60  ;;  %v695_v19 = vmul.f32 %v766_v31, %v1089_v61  ;;  %v712_v49 = vld [vmem:[#allocation2 + $0x97] sm:$0xff] }
  0x53   : > { %v619_v15 = vadd.f32 %v611_v27, %v591_v55  ;;  %v518_v41 = vadd.f32 %v510_v54, %v490_v35  ;;  %v556_v33 = vmul.f32 %v710_v1, %v1454_v34  ;;  %v426_v38 = vmul.f32 %v1062_v50, %v1114_v10  ;;  %v1461_v50 = vld [vmem:[#allocation13_spill] sm:$0xff]  ;;  %v713_v27 = vld [vmem:[#allocation2 + $0xaf] sm:$0xff] }
  0x54   : > { %v406_v21 = vadd.f32 %v398_v52, %v378_v40  ;;  %v730_v43 = vadd.f32 %v722_v14, %v702_v23  ;;  %v723_v7 = vmul.f32 %v1108_v5, %v711_v46  ;;  %v751_v47 = vmul.f32 %v1117_v12, %v739_v24  ;;  %v767_v14 = vld [vmem:[#allocation2 + $0x81] sm:$0xff]  ;;  %v741_v23 = vld [vmem:[#allocation2 + $0xb0] sm:$0xff] }
  0x55   : > { %v647_v32 = vadd.f32 %v639_v6, %v619_v15  ;;  %v564_v36 = vadd.f32 %v556_v33, %v518_v41  ;;  %v584_v2 = vmul.f32 %v738_v26, %v1455_v20  ;;  %v455_v63 = vmul.f32 %v1065_v51, %v1460_v30  ;;  %v1464_v15 = vld [vmem:[#allocation10_spill] sm:$0xff] }
  0x56   : > { %v434_v53 = vadd.f32 %v426_v38, %v406_v21  ;;  %v758_v28 = vadd.f32 %v750_v39, %v730_v43  ;;  %v612_v48 = vmul.f32 %v766_v31, %v1456_v56  ;;  %v483_v10 = vmul.f32 %v1083_v58, %v1461_v50  ;;  %v768_v39 = vld [vmem:[#allocation2 + $0x99] sm:$0xff] }
  0x57   : > { %v675_v1 = vadd.f32 %v667_v62, %v647_v32  ;;  %v592_v13 = vadd.f32 %v584_v2, %v564_v36  ;;  %v520_v9 = vadd.f32 %v1462_v37, %v1275_v45  ;;  %v558_v26 = vmul.f32 %v712_v49, %v1454_v34  ;;  %v769_v32 = vld [vmem:[#allocation2 + $0xb1] sm:$0xff] }
  0x58   : > { %v463_v18 = vadd.f32 %v455_v63, %v434_v53  ;;  %v786_v0 = vadd.f32 %v778_v17, %v758_v28  ;;  %v640_v51 = vmul.f32 %v711_v46, %v1085_v59  ;;  %v511_v31 = vmul.f32 %v1080_v57, %v1463_v4  ;;  %v714_v63 = vld [vmem:[#allocation2 + $0xc7] sm:$0xff]  ;;  %v1466_v28 = vld [vmem:[#allocation15_spill] sm:$0xff] }
  0x59   : > { %v703_v8 = vadd.f32 %v695_v19, %v675_v1  ;;  %v620_v44 = vadd.f32 %v612_v48, %v592_v13  ;;  %v566_v25 = vadd.f32 %v558_v26, %v520_v9  ;;  %v586_v58 = vmul.f32 %v740_v3, %v1455_v20  ;;  %v742_v9 = vld [vmem:[#allocation2 + $0xc8] sm:$0xff] }
  0x5a   : > { %v491_v16 = vadd.f32 %v483_v10, %v463_v18  ;;  %794 = vst.msk [vmem:[%s1301_s9 + $0x10] sm:$0xff] %vm218_vm0, %v786_v0  ;;  %v779_v45 = vmul.f32 %v1248_v42, %v767_v14  ;;  %v668_v55 = vmul.f32 %v739_v24, %v1087_v60  ;;  %v557_v17 = vmul.f32 %v711_v46, %v1454_v34 }
  0x5b   : > { %v731_v29 = vadd.f32 %v723_v7, %v703_v8  ;;  %v648_v6 = vadd.f32 %v640_v51, %v620_v44  ;;  %v594_v54 = vadd.f32 %v586_v58, %v566_v25  ;;  %v614_v57 = vmul.f32 %v768_v39, %v1456_v56  ;;  %v1465_v7 = vld [vmem:[#allocation11_spill] sm:$0xff] }
  0x5c   : > { %v519_v35 = vadd.f32 %v511_v31, %v491_v16  ;;  %v696_v40 = vmul.f32 %v767_v14, %v1089_v61  ;;  %v585_v52 = vmul.f32 %v739_v24, %v1455_v20  ;;  %v465_v62 = vadd.f32 %v1464_v15, %v1264_v22  ;;  %v770_v31 = vld [vmem:[#allocation2 + $0xc9] sm:$0xff] }
  0x5d   : > { %v759_v11 = vadd.f32 %v751_v47, %v731_v29  ;;  %v676_v19 = vadd.f32 %v668_v55, %v648_v6  ;;  %v622_v33 = vadd.f32 %v614_v57, %v594_v54  ;;  %v642_v46 = vmul.f32 %v713_v27, %v1085_v59 }
  0x5e   : > { %v565_v41 = vadd.f32 %v557_v17, %v519_v35  ;;  %v724_v38 = vmul.f32 %v1108_v5, %v712_v49  ;;  %v613_v43 = vmul.f32 %v767_v14, %v1456_v56  ;;  %v493_v47 = vadd.f32 %v1465_v7, %v465_v62  ;;  %v1467_v62 = vld [vmem:[#allocation6_spill] sm:$0xff] }
  0x5f   : > { %v787_v21 = vadd.f32 %v779_v45, %v759_v11  ;;  %v704_v36 = vadd.f32 %v696_v40, %v676_v19  ;;  %v650_v2 = vadd.f32 %v642_v46, %v622_v33  ;;  %v670_v53 = vmul.f32 %v741_v23, %v1087_v60 }
  0x60   : > { %v593_v24 = vadd.f32 %v585_v52, %v565_v41  ;;  %v752_v22 = vmul.f32 %v1117_v12, %v740_v3  ;;  %v641_v30 = vmul.f32 %v712_v49, %v1085_v59  ;;  %v521_v1 = vadd.f32 %v1466_v28, %v493_v47 }
  0x61   : > { %795 = vst.msk [vmem:[%s1301_s9 + $0x18] sm:$0xff] %vm218_vm0, %v787_v21  ;;  %v559_v48 = vmul.f32 %v713_v27, %v1454_v34  ;;  %v732_v50 = vadd.f32 %v724_v38, %v704_v36  ;;  %v678_v14 = vadd.f32 %v670_v53, %v650_v2  ;;  %v698_v13 = vmul.f32 %v769_v32, %v1089_v61  ;;  %v1469_v21 = vld [vmem:[#allocation8_spill] sm:$0xff] }
  0x62   : > { %v621_v10 = vadd.f32 %v613_v43, %v593_v24  ;;  %v780_v18 = vmul.f32 %v1248_v42, %v768_v39  ;;  %v669_v37 = vmul.f32 %v740_v3, %v1087_v60  ;;  %v587_v0 = vmul.f32 %v741_v23, %v1455_v20 }
  0x63   : > { %v567_v26 = vadd.f32 %v559_v48, %v521_v1  ;;  %v760_v49 = vadd.f32 %v752_v22, %v732_v50  ;;  %v706_v51 = vadd.f32 %v698_v13, %v678_v14  ;;  %v726_v4 = vmul.f32 %v1108_v5, %v714_v63 }
  0x64   : > { %v649_v8 = vadd.f32 %v641_v30, %v621_v10  ;;  %v697_v34 = vmul.f32 %v768_v39, %v1089_v61  ;;  %v615_v16 = vmul.f32 %v769_v32, %v1456_v56  ;;  %v754_v3 = vmul.f32 %v1117_v12, %v742_v9 }
  0x65   : > { %v595_v44 = vadd.f32 %v587_v0, %v567_v26  ;;  %v788_v25 = vadd.f32 %v780_v18, %v760_v49  ;;  %v734_v29 = vadd.f32 %v726_v4, %v706_v51  ;;  %v643_v20 = vmul.f32 %v714_v63, %v1085_v59 }
  0x66   : > { %v677_v58 = vadd.f32 %v669_v37, %v649_v8  ;;  %v725_v17 = vmul.f32 %v1108_v5, %v713_v27  ;;  %v782_v39 = vmul.f32 %v1248_v42, %v770_v31  ;;  %v671_v56 = vmul.f32 %v742_v9, %v1087_v60  ;;  %v1468_v60 = vld [vmem:[#allocation7_spill] sm:$0xff] }
  0x67   : > { %v623_v45 = vadd.f32 %v615_v16, %v595_v44  ;;  %796 = vst.msk [vmem:[%s1301_s9 + $0x20] sm:$0xff] %vm218_vm0, %v788_v25  ;;  %v762_v6 = vadd.f32 %v754_v3, %v734_v29  ;;  %v753_v57 = vmul.f32 %v1117_v12, %v741_v23  ;;  %v699_v59 = vmul.f32 %v770_v31, %v1089_v61 }
  0x68   : > { %v705_v55 = vadd.f32 %v697_v34, %v677_v58  ;;  %v781_v15 = vmul.f32 %v1248_v42, %v769_v32  ;;  %v727_v19 = vmul.f32 %v1108_v5, %v1467_v62  ;;  %v755_v46 = vmul.f32 %v1117_v12, %v1468_v60 }
  0x69   : > { %v651_v35 = vadd.f32 %v643_v20, %v623_v45  ;;  %v790_v11 = vadd.f32 %v782_v39, %v762_v6  ;;  %v783_v61 = vmul.f32 %v1248_v42, %v1469_v21 }
  0x6a   : > { %v733_v54 = vadd.f32 %v725_v17, %v705_v55 }
  0x6b   : > { %v679_v40 = vadd.f32 %v671_v56, %v651_v35  ;;  %798 = vst.msk [vmem:[%s1301_s9 + $0x30] sm:$0xff] %vm218_vm0, %v790_v11 }
  0x6c   : > { %v761_v52 = vadd.f32 %v753_v57, %v733_v54 }
  0x6d   : > { %v707_v27 = vadd.f32 %v699_v59, %v679_v40 }
  0x6e   : > { %v789_v41 = vadd.f32 %v781_v15, %v761_v52 }
  0x6f   : > { %v735_v33 = vadd.f32 %v727_v19, %v707_v27 }
  0x70   : > { %797 = vst.msk [vmem:[%s1301_s9 + $0x28] sm:$0xff] %vm218_vm0, %v789_v41 }
  0x71   : > { %v763_v23 = vadd.f32 %v755_v46, %v735_v33 }
  0x73   : > { %v791_v38 = vadd.f32 %v783_v61, %v763_v23 }
  0x75   : > { %799 = vst.msk [vmem:[%s1301_s9 + $0x38] sm:$0xff] %vm218_vm0, %v791_v38 }
  0x76 PF: > { %s14_s15 = sadd.s32 1, %s900_s15  }
  0x77   : > { %p11_p4 = scmp.ge.s32.totalorder %s14_s15, 4  }
  0x79   :  { %13 = sbr.rel (!%p11_p4) target bundleno = 1 (0x1), region = 71 }

// kernel: transformer_block.7
= control target key start
LH: loop header
LB: loop body
LE: loop exit
PB: predicated region body
PF: predicated region fallthrough
CT: control target
= control target key end

     0   :  { %15 = vsyncpa [#allocation3], 0  ;;  %s2427_s30 = smov 0   ;;  %s2823_s0 = inlined_call_operand.vmem [shape: f32[2], index: 0, kind: input, shape index: {}]   ;;  %s2824_s1 = inlined_call_operand.vmem [shape: f32[2,64,24], index: 1, kind: input, shape index: {}]   ;;  %s2825_s2 = inlined_call_operand.vmem [shape: f32[1,8], index: 2, kind: input, shape index: {}]   ;;  %s2826_s3 = inlined_call_operand.vmem [shape: f32[1,8], index: 3, kind: input, shape index: {}]   ;;  %s2827_s4 = inlined_call_operand.vmem [shape: f32[8,8], index: 4, kind: input, shape index: {}]   ;;  %s2828_s5 = inlined_call_operand.vmem [shape: f32[8,32], index: 5, kind: input, shape index: {}]   ;;  %s2829_s6 = inlined_call_operand.vmem [shape: f32[8,32], index: 6, kind: input, shape index: {}]   ;;  %s2830_s7 = inlined_call_operand.vmem [shape: f32[2,64,8], index: 7, kind: output, shape index: {0}]   ;;  %s2831_s8 = inlined_call_operand.vmem [shape: f32[2,64,32], index: 8, kind: output, shape index: {1}]   ;;  %s2832_s9 = inlined_call_operand.vmem [shape: f32[2,64,32], index: 9, kind: output, shape index: {2}]  }
   0x1 LB: > { %s1936_s10 = sadd.s32 4294967295, %s2366_s30   ;;  %p1938_p0 = scmp.ge.s32.totalorder %s2366_s30, 1  ;;  %s2366_s30 = sphi %s2427_s30, %s21_s30  }
   0x2   : > { %p256_p1 = scmp.lt.s32.totalorder %s2366_s30, 3  ;;  %s269_s13 = sshll.u32 %s2823_s0, 4  ;;  %s270_s13 = int_to_ptr.vmem [resolvable:$true] %s269_s13 }
   0x3   : > { %p2250_p3 = scmp.eq.s32.totalorder %s1936_s10, 0  ;;  %s2341_s15 = scalar_lea.vmem %s270_s13, 16 }
   0x4   : > { %p2438_p2 = pnand %p1938_p0, %p256_p1  ;;  %p2342_p6 = scmp.ne.s32.totalorder %s270_s13, %s2341_s15 }
   0x5   : > { %p2349_p10 = scmp.lt.s32.totalorder %s270_s13, %s270_s13  ;;  %p2350_p11 = scmp.lt.s32.totalorder %s2341_s15, %s2341_s15 }
   0x6   : > { %p2246_p4 = pneg %p2438_p2 }
   0x7   : > { %p2351_p12 = por %p2350_p11, %p2349_p10 }
   0x8   : > { %p2247_p5 = pnand %p2250_p3, %p2246_p4 }
   0xa   : > { %p2343_p7 = pneg %p2247_p5 }
   0xc   : > { %p2344_p8 = pnand %p2343_p7, %p2342_p6 }
   0xe   : > { %p2345_p9 = pneg %p2344_p8 }
  0x10   : > { %p2352_p13 = pnand %p2351_p12, %p2345_p9 }
  0x12   : > { %2355 = shalt.err (!%p2352_p13)
}
  0x13   : > { %s2368_s16 = smov [#allocation2]   ;;  %305 = sbr.rel (%p2438_p2) target bundleno = 2328 (0x918), region = 48 }
  0x14   : > { %2249 = dma.vmem_to_smem (!%p2247_p5), %s270_s13, 16, %s2368_s16, [#allocation3]  }
  0x1a   : > { %2361 = dma.done.wait (%p2250_p3), [#allocation3], 16  }
  0x1b   : > { %2363 = vsyncadd (%p2250_p3), [#allocation3], 4294967280 }
  0x1c   : > { %311 = sfence }
  0x1d   : > { %p352_p0 = scmp.lt.s32.totalorder %s1936_s10, 1  ;;  %vm421_vm0 = vcmask 97344   ;;  %vm754_vm1 = vcmask 64544   ;;  %vm389_vm2 = vcmask 31744   ;;  %vm786_vm3 = vcmask 130144   ;;  %s2370_s21 = smov 120  }
  0x1e   : > { %vm2371_vm4 = vmmov 0   ;;  %vm517_vm5 = vcmask 523264   ;;  %s2373_s22 = smov 124   ;;  %s2374_s23 = smov 112   ;;  %vm594_vm6 = vcmask 27648   ;;  %vm1167_vm7 = vcmask 1043456  }
  0x1f   : > { %s2835_s10 = smov (!%p352_p0, %s1936_s10), 1  ;;  %s591_s24 = sld [smem:[#allocation2]]  ;;  %vm1406_vm8 = vcmask 64512   ;;  %vm1680_vm9 = vcmask 261120  }
  0x20   : > { %s2449_s17 = sshll.u32 %s2835_s10, 6  ;;  %s2375_s25 = smov 116  }
  0x21   : > { %s356_s20 = scalar_lea.vmem %s2824_s1, %s2449_s17  ;;  %s2376_s26 = smov 108  }
  0x22   : > { %v2455_v0 = vld [vmem:[%s356_s20] sm:$0xff]  ;;  %v2457_v1 = vld [vmem:[%s356_s20 + $0x8] sm:$0xff]  ;;  %v2459_v2 = vld [vmem:[%s356_s20 + $0x10] sm:$0xff]  ;;  %s1962_s27 = sld [smem:[#allocation2 + $0x1]] }
  0x23   : > { %v2461_v3 = vld [vmem:[%s356_s20 + $0x18] sm:$0xff]  ;;  %v381_v4 = vmul.f32 %v2455_v0, %v2455_v0  ;;  %v382_v5 = vmul.f32 %v2457_v1, %v2457_v1  ;;  %v383_v6 = vmul.f32 %v2459_v2, %v2459_v2  ;;  %v2469_v7 = vld [vmem:[%s356_s20 + $0x20] sm:$0xff]  ;;  %v2473_v9 = vld [vmem:[%s356_s20 + $0x28] sm:$0xff] }
  0x24   : > { %v384_v8 = vmul.f32 %v2461_v3, %v2461_v3  ;;  %v2476_v11 = vld [vmem:[%s356_s20 + $0x30] sm:$0xff]  ;;  %v385_v12 = vmul.f32 %v2469_v7, %v2469_v7  ;;  %v2482_v15 = vld [vmem:[%s356_s20 + $0x38] sm:$0xff]  ;;  %v386_v17 = vmul.f32 %v2473_v9, %v2473_v9 }
  0x25   : > { %v422_v10 = vsel %vm421_vm0, %v381_v4, 0.0  ;;  %v423_v13 = vsel %vm421_vm0, %v382_v5, 0.0  ;;  %v425_v14 = vsel %vm421_vm0, %v383_v6, 0.0  ;;  %v755_v19 = vsel %vm754_vm1, %v381_v4, 0.0 }
  0x26   : > { %v424_v16 = vadd.f32 %v423_v13, %v422_v10  ;;  %v427_v18 = vsel %vm421_vm0, %v384_v8, 0.0  ;;  %v756_v20 = vsel %vm754_vm1, %v382_v5, 0.0  ;;  %v387_v21 = vmul.f32 %v2476_v11, %v2476_v11 }
  0x27   : > { %v757_v23 = vadd.f32 %v756_v20, %v755_v19  ;;  %v758_v24 = vsel %vm754_vm1, %v383_v6, 0.0  ;;  %v388_v25 = vmul.f32 %v2482_v15, %v2482_v15  ;;  %v391_v26 = vsel %vm389_vm2, %v382_v5, 0.0 }
  0x28   : > { %v426_v22 = vadd.f32 %v425_v14, %v424_v16  ;;  %v429_v27 = vsel %vm421_vm0, %v385_v12, 0.0  ;;  %v760_v28 = vsel %vm754_vm1, %v384_v8, 0.0  ;;  %v787_v31 = vsel %vm786_vm3, %v381_v4, 0.0 }
  0x29   : > { %v759_v30 = vadd.f32 %v758_v24, %v757_v23  ;;  %v788_v32 = vsel %vm786_vm3, %v382_v5, 0.0  ;;  %v431_v33 = vsel %vm421_vm0, %v386_v17, 0.0  ;;  %v762_v34 = vsel %vm754_vm1, %v385_v12, 0.0 }
  0x2a   : > { %v428_v29 = vadd.f32 %v427_v18, %v426_v22  ;;  %v789_v35 = vadd.f32 %v788_v32, %v787_v31  ;;  %v790_v36 = vsel %vm786_vm3, %v383_v6, 0.0  ;;  %v393_v37 = vsel %vm389_vm2, %v383_v6, 0.0 }
  0x2b   : > { %v761_v39 = vadd.f32 %v760_v28, %v759_v30  ;;  %v792_v40 = vsel %vm786_vm3, %v384_v8, 0.0  ;;  %v433_v41 = vsel %vm421_vm0, %v387_v21, 0.0  ;;  %v764_v42 = vsel %vm754_vm1, %v386_v17, 0.0 }
  0x2c   : > { %v430_v38 = vadd.f32 %v429_v27, %v428_v29  ;;  %v791_v43 = vadd.f32 %v790_v36, %v789_v35  ;;  %v390_v44 = vsel %vm389_vm2, %v381_v4, 0.0  ;;  %v794_v47 = vsel %vm786_vm3, %v385_v12, 0.0 }
  0x2d   : > { %v763_v46 = vadd.f32 %v762_v34, %v761_v39  ;;  %v392_v48 = vadd.f32 %v391_v26, %v390_v44  ;;  %v395_v49 = vsel %vm389_vm2, %v384_v8, 0.0  ;;  %v435_v50 = vsel %vm421_vm0, %v388_v25, 0.0 }
  0x2e   : > { %v432_v45 = vadd.f32 %v431_v33, %v430_v38  ;;  %v766_v51 = vsel %vm754_vm1, %v387_v21, 0.0  ;;  %v793_v52 = vadd.f32 %v792_v40, %v791_v43  ;;  %v796_v55 = vsel %vm786_vm3, %v386_v17, 0.0 }
  0x2f   : > { %v765_v54 = vadd.f32 %v764_v42, %v763_v46  ;;  %v394_v56 = vadd.f32 %v393_v37, %v392_v48  ;;  %v397_v57 = vsel %vm389_vm2, %v385_v12, 0.0  ;;  %v768_v58 = vsel %vm754_vm1, %v388_v25, 0.0 }
  0x30   : > { %v434_v53 = vadd.f32 %v433_v41, %v432_v45  ;;  %v795_v59 = vadd.f32 %v794_v47, %v793_v52  ;;  %v798_v62 = vsel %vm786_vm3, %v387_v21, 0.0  ;;  %v800_v8 = vsel %vm786_vm3, %v388_v25, 0.0 }
  0x31   : > { %v767_v61 = vadd.f32 %v766_v51, %v765_v54  ;;  %v396_v63 = vadd.f32 %v395_v49, %v394_v56  ;;  %v399_v13 = vsel %vm389_vm2, %v386_v17, 0.0  ;;  %v401_v20 = vsel %vm389_vm2, %v387_v21, 0.0 }
  0x32   : > { %v436_v60 = vadd.f32 %v435_v50, %v434_v53  ;;  %v797_v4 = vadd.f32 %v796_v55, %v795_v59  ;;  %v403_v26 = vsel %vm389_vm2, %v388_v25, 0.0  ;;  %v2369_v31 = vmov 0.0|0.0  }
  0x33   : > { %v2515_v6 = vadd.f32 %v768_v58, %v767_v61  ;;  %v398_v10 = vadd.f32 %v397_v57, %v396_v63  ;;  %2208 = vmatprep.subr.bf16.mxu0 %v2369_v31  ;;  %v2372_v46 = vmov 0.0  }
  0x34   : > { %v437_v5 = vrot.slane %v436_v60, 4  ;;  %v799_v14 = vadd.f32 %v798_v62, %v797_v4  ;;  %2102 = vmatprep.mubr.msk.f32.mxu0 %vm2371_vm4, %v2372_v46 }
  0x35   : > { %v400_v19 = vadd.f32 %v399_v13, %v398_v10 }
  0x36   : > { %v438_v16 = vadd.f32 %v437_v5, %v436_v60  ;;  %v2519_v12 = vadd.f32 %v800_v8, %v799_v14 }
  0x37   : > { %v402_v24 = vadd.f32 %v401_v20, %v400_v19 }
  0x38   : > { %v439_v18 = vrot.slane %v438_v16, 2 }
  0x39   : > { %v404_v29 = vadd.f32 %v403_v26, %v402_v24 }
  0x3a   : > { %v440_v22 = vadd.f32 %v439_v18, %v438_v16 }
  0x3b   : > { %v405_v30 = vrot.slane %v404_v29, 4 }
  0x3c   : > { %v441_v23 = vrot.slane %v440_v22, 1 }
  0x3d   : > { %v406_v17 = vadd.f32 %v405_v30, %v404_v29 }
  0x3e   : > { %v442_v27 = vadd.f32 %v441_v23, %v440_v22  ;;  %v770_v23 = vrot.slane %v2515_v6, 4 }
  0x3f   : > { %v407_v33 = vrot.slane %v406_v17, 2 }
  0x40   : > { %v443_v28 = vmax.f32 %v442_v27, 1e-24  ;;  %v771_v24 = vadd.f32 %v770_v23, %v2515_v6 }
  0x41   : > { %v408_v43 = vadd.f32 %v407_v33, %v406_v17 }
  0x42   : > { %2309 = vrsqrt.f32 %v443_v28  ;;  %v772_v26 = vrot.slane %v771_v24, 2 }
  0x43   : > { %v409_v45 = vrot.slane %v408_v43, 1 }
  0x44   : > { %v773_v27 = vadd.f32 %v772_v26, %v771_v24 }
  0x45   : > { %v410_v47 = vadd.f32 %v409_v45, %v408_v43 }
  0x46   : > { %v774_v28 = vrot.slane %v773_v27, 1 }
  0x47   : > { %v411_v48 = vmax.f32 %v410_v47, 1e-24 }
  0x48   : > { %v775_v29 = vadd.f32 %v774_v28, %v773_v27 }
  0x49   : > { %2311 = vrsqrt.f32 %v411_v48 }
  0x4a   : > { %v776_v30 = vmax.f32 %v775_v29, 1e-24 }
  0x4c   : > { %v2310_v32 = vpop.eup %2309  ;;  %2313 = vrsqrt.f32 %v776_v30 }
  0x4d   : > { %v445_v34 = vmul.f32 %v2310_v32, %v2455_v0  ;;  %v446_v21 = vmul.f32 %v2310_v32, %v2457_v1  ;;  %v447_v35 = vmul.f32 %v2310_v32, %v2459_v2  ;;  %v448_v36 = vmul.f32 %v2310_v32, %v2461_v3 }
  0x4e   : > { %v449_v25 = vmul.f32 %v2310_v32, %v2469_v7  ;;  %v450_v37 = vmul.f32 %v2310_v32, %v2473_v9  ;;  %v451_v38 = vmul.f32 %v2310_v32, %v2476_v11  ;;  %v452_v39 = vmul.f32 %v2310_v32, %v2482_v15 }
  0x4f   : > { %v2269_v40 = vpack.i.bf16 %v446_v21, %v445_v34  ;;  %v2274_v42 = vpack.i.bf16 %v448_v36, %v447_v35  ;;  %v802_v21 = vrot.slane %v2519_v12, 4 }
  0x50   : > { %v2279_v41 = vpack.i.bf16 %v450_v37, %v449_v25  ;;  %v2284_v44 = vpack.i.bf16 %v452_v39, %v451_v38  ;;  %v592_v37 = vstv %s591_s24  ;;  %s366_s24 = scalar_lea.vmem %s2831_s8, %s2449_s17 }
  0x51   : > { %2270 = vrot.lane.b32.xlu0 %v2269_v40, %s2370_s21  ;;  %v803_v35 = vadd.f32 %v802_v21, %v2519_v12 }
  0x52   : > { %2280 = vrot.lane.b32.xlu1 %v2279_v41, %s2370_s21 }
  0x53   : > { %v2312_v49 = vpop.eup %2311  ;;  %v804_v36 = vrot.slane %v803_v35, 2 }
  0x54   : > { %v413_v50 = vmul.f32 %v2312_v49, %v2455_v0  ;;  %v414_v51 = vmul.f32 %v2312_v49, %v2457_v1  ;;  %v415_v52 = vmul.f32 %v2312_v49, %v2459_v2  ;;  %v416_v53 = vmul.f32 %v2312_v49, %v2461_v3 }
  0x55   : > { %2275 = vrot.lane.b32.xlu0 %v2274_v42, %s2370_s21  ;;  %v417_v54 = vmul.f32 %v2312_v49, %v2469_v7  ;;  %v418_v55 = vmul.f32 %v2312_v49, %v2473_v9  ;;  %v419_v56 = vmul.f32 %v2312_v49, %v2476_v11  ;;  %v420_v57 = vmul.f32 %v2312_v49, %v2482_v15 }
  0x56   : > { %2285 = vrot.lane.b32.xlu1 %v2284_v44, %s2370_s21  ;;  %v2314_v17 = vpop.eup %2313  ;;  %v805_v25 = vadd.f32 %v804_v36, %v803_v35  ;;  %s2756_s21 = scalar_lea.vmem %s2830_s7, %s2449_s17 }
  0x57   : > { %v779_v32 = vmul.f32 %v2314_v17, %v2457_v1  ;;  %v781_v33 = vmul.f32 %v2314_v17, %v2461_v3  ;;  %v782_v34 = vmul.f32 %v2314_v17, %v2469_v7  ;;  %v784_v6 = vmul.f32 %v2314_v17, %v2476_v11 }
  0x58   : > { %v806_v38 = vrot.slane %v805_v25, 1  ;;  %v778_v45 = vmul.f32 %v2314_v17, %v2455_v0  ;;  %v780_v12 = vmul.f32 %v2314_v17, %v2459_v2 }
  0x5a   : > { %v807_v42 = vadd.f32 %v806_v38, %v805_v25 }
  0x5c   : > { %v808_v44 = vmax.f32 %v807_v42, 1e-24 }
  0x5e   : > { %2315 = vrsqrt.f32 %v808_v44 }
  0x68   : > { %v2316_v47 = vpop.eup %2315 }
  0x69   : > { %v812_v48 = vmul.f32 %v2316_v47, %v2459_v2  ;;  %v813_v49 = vmul.f32 %v2316_v47, %v2461_v3 }
  0x73   : > { %453 = vxpose.xlu0.b32.start [1/8] (short) (narrow) %v413_v50, 8  ;;  %v2294_v50 = vpack.i.bf16 %v813_v49, %v812_v48 }
  0x77   : > { %454 = vxpose.xlu0.b32.cont [2/8] (short) (narrow) %v414_v51, 8  ;;  %v783_v51 = vmul.f32 %v2314_v17, %v2473_v9 }
  0x7b   : > { %455 = vxpose.xlu0.b32.cont [3/8] (short) (narrow) %v415_v52, 8  ;;  %v785_v52 = vmul.f32 %v2314_v17, %v2482_v15 }
  0x7f   : > { %456 = vxpose.xlu0.b32.cont [4/8] (short) (narrow) %v416_v53, 8  ;;  %v810_v53 = vmul.f32 %v2316_v47, %v2455_v0 }
  0x83   : > { %457 = vxpose.xlu0.b32.cont [5/8] (short) (narrow) %v417_v54, 8  ;;  %v811_v54 = vmul.f32 %v2316_v47, %v2457_v1 }
  0x87   : > { %458 = vxpose.xlu0.b32.cont [6/8] (short) (narrow) %v418_v55, 8  ;;  %v2289_v55 = vpack.i.bf16 %v811_v54, %v810_v53 }
  0x8b   : > { %459 = vxpose.xlu0.b32.cont [7/8] (short) (narrow) %v419_v56, 8  ;;  %v816_v56 = vmul.f32 %v2316_v47, %v2476_v11 }
  0x8f   : > { %460 = vxpose.xlu0.b32.end [8/8] (short) (narrow) %v420_v57, 8  ;;  %v817_v57 = vmul.f32 %v2316_v47, %v2482_v15 }
  0xb8   : > { %828 = vrot.lane.b32.xlu0 %v779_v32, %s2373_s22 }
  0xbc   : > { %832 = vrot.lane.b32.xlu0 %v781_v33, %s2373_s22 }
  0xc0   : > { %834 = vrot.lane.b32.xlu0 %v782_v34, %s2373_s22 }
  0xc3   : > { %v2271_v58 = vpop.permute.xlu0 %2270 }
  0xc4   : > { %v2273_v59 = vunpack.i.h.bf16 %v2271_v58  ;;  %v2272_v60 = vunpack.i.l.bf16 %v2271_v58  ;;  %v2281_v61 = vpop.permute.xlu1 %2280  ;;  %838 = vrot.lane.b32.xlu0 %v784_v6, %s2373_s22  ;;  %v2304_v58 = vpack.i.bf16 %v817_v57, %v816_v56 }
  0xc5   : > { %v2283_v8 = vunpack.i.h.bf16 %v2281_v61  ;;  %v2282_v10 = vunpack.i.l.bf16 %v2281_v61 }
  0xc6   : > { %v2209_v62 = vpack.c.bf16 %v2273_v59, %v2272_v60 }
  0xc7   : > { %v2276_v63 = vpop.permute.xlu0 %2275  ;;  %v2215_v16 = vpack.c.bf16 %v2283_v8, %v2282_v10 }
  0xc8   : > { %v2278_v4 = vunpack.i.h.bf16 %v2276_v63  ;;  %v2277_v5 = vunpack.i.l.bf16 %v2276_v63  ;;  %2210 = vmatpush3.bf16.msra.mxu0 %v2209_v62  ;;  %v2286_v13 = vpop.permute.xlu1 %2285  ;;  %614 = vrot.lane.b32.xlu0 %v2455_v0, %s2374_s23 }
  0xc9   : > { %2211 = vmatprep.subr.bf16.mxu0 %v2369_v31  ;;  %v2288_v18 = vunpack.i.h.bf16 %v2286_v13  ;;  %v2287_v19 = vunpack.i.l.bf16 %v2286_v13 }
  0xca   : > { %v2212_v14 = vpack.c.bf16 %v2278_v4, %v2277_v5 }
  0xcb   : > { %v2218_v20 = vpack.c.bf16 %v2288_v18, %v2287_v19  ;;  %v814_v19 = vmul.f32 %v2316_v47, %v2469_v7 }
  0xcc   : > { %2213 = vmatpush3.bf16.msra.mxu0 %v2212_v14  ;;  %616 = vrot.lane.b32.xlu0 %v2457_v1, %s2374_s23 }
  0xcd   : > { %2214 = vmatprep.subr.bf16.mxu0 %v2369_v31 }
  0xd0   : > { %2216 = vmatpush3.bf16.msra.mxu0 %v2215_v16  ;;  %2295 = vrot.lane.b32.xlu0 %v2294_v50, %s2375_s25 }
  0xd1   : > { %2217 = vmatprep.subr.bf16.mxu0 %v2369_v31 }
  0xd4   : > { %2219 = vmatpush3.bf16.msra.mxu0 %v2218_v20  ;;  %622 = vrot.lane.b32.xlu0 %v2469_v7, %s2374_s23  ;;  %v815_v20 = vmul.f32 %v2316_v47, %v2473_v9 }
  0xd8   : > { %624 = vrot.lane.b32.xlu0 %v2473_v9, %s2374_s23 }
  0xdc   : > { %2305 = vrot.lane.b32.xlu0 %v2304_v58, %s2375_s25 }
  0xf3   : > { %v469_v22 = vpop.trf.xlu0 }
  0xf4   : > { %2103 = vmatmul.mubr.msk.f32.vlgmr.msra.gmra.mrb[0].mxu0 %vm517_vm5, %v469_v22  ;;  %v2299_v22 = vpack.i.bf16 %v815_v20, %v814_v19 }
 0x12a   : > { %v829_v59 = vpop.permute.xlu0 %828 }
 0x12e   : > { %v833_v60 = vpop.permute.xlu0 %832 }
 0x132   : > { %v835_v61 = vpop.permute.xlu0 %834 }
 0x136   : > { %v839_v62 = vpop.permute.xlu0 %838 }
 0x13a   : > { %v615_v63 = vpop.permute.xlu0 %614 }
 0x13b   : > { %2107 = vmatprep.mubr.msk.f32.mxu1 %vm389_vm2, %v615_v63 }
 0x13e   : > { %v617_v28 = vpop.permute.xlu0 %616 }
 0x142   : > { %v2296_v30 = vpop.permute.xlu0 %2295 }
 0x143   : > { %v2298_v25 = vunpack.i.h.bf16 %v2296_v30 }
 0x146   : > { %v623_v17 = vpop.permute.xlu0 %622 }
 0x14a   : > { %v625_v35 = vpop.permute.xlu0 %624 }
 0x14e   : > { %v2306_v42 = vpop.permute.xlu0 %2305 }
 0x14f   : > { %v2308_v44 = vunpack.i.h.bf16 %v2306_v42 }
 0x1c7   : > { %v587_v39 = vpop.f32.mrb[0].mxu0 }
 0x1c8   : > { %v593_v40 = vmul.f32 %v592_v37, %v587_v39  ;;  %v2104_v41 = vpop.f32.mrb[1].mxu0  ;;  %v2297_v37 = vunpack.i.l.bf16 %v2296_v30 }
 0x1ca   : > { %v595_v43 = vsel %vm594_vm6, %v593_v40, -inf }
 0x1cb   : > { %596 = vmax.xlane.f32.xlu1 %v595_v43 }
 0x1dc   : > { %826 = vrot.lane.b32.xlu1 %v778_v45, %s2373_s22  ;;  %v2307_v45 = vunpack.i.l.bf16 %v2306_v42 }
 0x1e0   : > { %830 = vrot.lane.b32.xlu1 %v780_v12, %s2373_s22  ;;  %v2230_v12 = vpack.c.bf16 %v2308_v44, %v2307_v45 }
 0x1e4   : > { %836 = vrot.lane.b32.xlu1 %v783_v51, %s2373_s22 }
 0x1e8   : > { %840 = vrot.lane.b32.xlu1 %v785_v52, %s2373_s22 }
 0x1ec   : > { %2290 = vrot.lane.b32.xlu1 %v2289_v55, %s2375_s25  ;;  %v988_v55 = vstv %s1962_s27  ;;  %s371_s27 = scalar_lea.vmem %s2832_s9, %s2449_s17 }
 0x1f0   : > { %618 = vrot.lane.b32.xlu1 %v2459_v2, %s2374_s23 }
 0x1f4   : > { %620 = vrot.lane.b32.xlu1 %v2461_v3, %s2374_s23 }
 0x258   : > { %v597_v4 = vpop.xlane.xlu1 %596 }
 0x259   : > { %v598_v5 = vsub.f32 %v593_v40, %v597_v4  ;;  %v2224_v40 = vpack.c.bf16 %v2298_v25, %v2297_v37 }
 0x25b   : > { %v599_v8 = vmul.f32 1.442695, %v598_v5 }
 0x25c   : > { %v827_v10 = vpop.permute.xlu1 %826 }
 0x25d   : > { %2317 = vpow2.f32 %v599_v8  ;;  %850 = vxpose.xlu0.b32.start [1/8] (short) (narrow) %v827_v10, 8  ;;  %v380_v10 = vld [vmem:[%s2827_s4] sm:$0xff] }
 0x260   : > { %v831_v13 = vpop.permute.xlu1 %830 }
 0x261   : > { %851 = vxpose.xlu0.b32.cont [2/8] (short) (narrow) %v829_v59, 8 }
 0x264   : > { %v837_v18 = vpop.permute.xlu1 %836 }
 0x265   : > { %852 = vxpose.xlu0.b32.cont [3/8] (short) (narrow) %v831_v13, 8 }
 0x267   : > { %v2318_v14 = vpop.eup %2317 }
 0x268   : > { %v601_v16 = vsel %vm594_vm6, %v2318_v14, 0.0  ;;  %v841_v23 = vpop.permute.xlu1 %840 }
 0x269   : > { %602 = vadd.xlane.f32.xlu1 %v601_v16  ;;  %853 = vxpose.xlu0.b32.cont [4/8] (short) (narrow) %v833_v60, 8 }
 0x26c   : > { %v2291_v24 = vpop.permute.xlu1 %2290 }
 0x26d   : > { %854 = vxpose.xlu0.b32.cont [5/8] (short) (narrow) %v835_v61, 8  ;;  %v2293_v34 = vunpack.i.h.bf16 %v2291_v24  ;;  %v2292_v6 = vunpack.i.l.bf16 %v2291_v24 }
 0x26f   : > { %v2221_v36 = vpack.c.bf16 %v2293_v34, %v2292_v6 }
 0x270   : > { %v619_v26 = vpop.permute.xlu1 %618 }
 0x271   : > { %855 = vxpose.xlu0.b32.cont [6/8] (short) (narrow) %v837_v18, 8 }
 0x274   : > { %v621_v27 = vpop.permute.xlu1 %620 }
 0x275   : > { %856 = vxpose.xlu0.b32.cont [7/8] (short) (narrow) %v839_v62, 8 }
 0x279   : > { %857 = vxpose.xlu0.b32.end [8/8] (short) (narrow) %v841_v23, 8 }
 0x27a   : > { %2300 = vrot.lane.b32.xlu1 %v2299_v22, %s2375_s25 }
 0x27e   : > { %626 = vrot.lane.b32.xlu1 %v2476_v11, %s2374_s23 }
 0x282   : > { %628 = vrot.lane.b32.xlu1 %v2482_v15, %s2374_s23 }
 0x2a2   : > { %1003 = vrot.lane.b32.xlu0 %v2457_v1, %s2376_s26 }
 0x2dd   : > { %v866_v48 = vpop.trf.xlu0 }
 0x2f6   : > { %v603_v29 = vpop.xlane.xlu1 %602 }
 0x2f7   : > { %2319 = vrcp.f32 %v603_v29 }
 0x2fa   : > { %v2301_v21 = vpop.permute.xlu1 %2300 }
 0x2fb   : > { %v2303_v38 = vunpack.i.h.bf16 %v2301_v21  ;;  %v2302_v39 = vunpack.i.l.bf16 %v2301_v21 }
 0x2fd   : > { %v2227_v43 = vpack.c.bf16 %v2303_v38, %v2302_v39 }
 0x2fe   : > { %v627_v41 = vpop.permute.xlu1 %626 }
 0x301   : > { %v2320_v32 = vpop.eup %2319 }
 0x302   : > { %v605_v33 = vmul.f32 %v2320_v32, %v2318_v14  ;;  %v629_v47 = vpop.permute.xlu1 %628  ;;  %v1142_v14 = vrot.slane %v380_v10, 4 }
 0x304   : > { %2105 = vmatprep.subr.msk.mxu1 %vm389_vm2, %v605_v33 }
 0x305   : > { %2106 = vmatpush3.xpose.msk.msra.mxu1 %vm389_vm2, %v605_v33 }
 0x306   : > { %2220 = vmatprep.subr.bf16.mxu1 %v2369_v31 }
 0x308   : > { %2108 = vmatmul.mubr.msk.f32.vlgmr.msra.gmra.mrb[0].mxu1 %vm389_vm2, %v617_v28 }
 0x309   : > { %2110 = vmatprep.mubr.msk.f32.mxu1 %vm389_vm2, %v619_v26  ;;  %2222 = vmatpush3.bf16.msra.mxu1 %v2221_v36 }
 0x30a   : > { %2223 = vmatprep.subr.bf16.mxu1 %v2369_v31 }
 0x30c   : > { %2111 = vmatmul.mubr.msk.f32.gmra.mrb[2].mxu1 %vm389_vm2, %v621_v27 }
 0x30d   : > { %2113 = vmatprep.mubr.msk.f32.mxu1 %vm389_vm2, %v623_v17  ;;  %2225 = vmatpush3.bf16.msra.mxu1 %v2224_v40 }
 0x30e   : > { %2226 = vmatprep.subr.bf16.mxu1 %v2369_v31 }
 0x310   : > { %2114 = vmatmul.mubr.msk.f32.gmra.mrb[4].mxu1 %vm389_vm2, %v625_v35 }
 0x311   : > { %2116 = vmatprep.mubr.msk.f32.mxu1 %vm389_vm2, %v627_v41  ;;  %2228 = vmatpush3.bf16.msra.mxu1 %v2227_v43 }
 0x312   : > { %2229 = vmatprep.subr.bf16.mxu1 %v2369_v31 }
 0x314   : > { %2117 = vmatmul.mubr.msk.f32.gmra.mrb[6].mxu1 %vm389_vm2, %v629_v47 }
 0x315   : > { %2231 = vmatpush3.bf16.msra.mxu1 %v2230_v12  ;;  %2135 = vmatprep.mubr.msk.f32.mxu1 %vm2371_vm4, %v2372_v46 }
 0x318   : > { %2136 = vmatmul.mubr.msk.f32.vlgmr.msra.gmra.mrb[8].mxu1 %vm517_vm5, %v866_v48 }
 0x3db   : > { %v2615_v49 = vpop.f32.mrb[0].mxu1 }
 0x3dc   : > { %v2617_v50 = vpop.f32.mrb[1].mxu1 }
 0x3df   : > { %v2619_v51 = vpop.f32.mrb[2].mxu1 }
 0x3e0   : > { %v2621_v31 = vpop.f32.mrb[3].mxu1 }
 0x3e3   : > { %v2623_v52 = vpop.f32.mrb[4].mxu1 }
 0x3e4   : > { %v2625_v53 = vpop.f32.mrb[5].mxu1 }
 0x3e7   : > { %v2627_v46 = vpop.f32.mrb[6].mxu1 }
 0x3e8   : > { %v2629_v54 = vpop.f32.mrb[7].mxu1 }
 0x3eb   : > { %v983_v56 = vpop.f32.mrb[8].mxu1 }
 0x3ec   : > { %v989_v1 = vmul.f32 %v988_v55, %v983_v56  ;;  %v2137_v57 = vpop.f32.mrb[9].mxu1 }
 0x3ee   : > { %v990_v58 = vsel %vm594_vm6, %v989_v1, -inf }
 0x3ef   : > { %991 = vmax.xlane.f32.xlu1 %v990_v58 }
 0x400   : > { %1001 = vrot.lane.b32.xlu1 %v2455_v0, %s2376_s26 }
 0x404   : > { %1005 = vrot.lane.b32.xlu1 %v2459_v2, %s2376_s26 }
 0x408   : > { %1007 = vrot.lane.b32.xlu1 %v2461_v3, %s2376_s26 }
 0x40c   : > { %1009 = vrot.lane.b32.xlu1 %v2469_v7, %s2376_s26 }
 0x47c   : > { %v992_v59 = vpop.xlane.xlu1 %991 }
 0x47d   : > { %v993_v60 = vsub.f32 %v989_v1, %v992_v59 }
 0x47f   : > { %v994_v61 = vmul.f32 1.442695, %v993_v60 }
 0x480   : > { %v1002_v62 = vpop.permute.xlu1 %1001 }
 0x481   : > { %2321 = vpow2.f32 %v994_v61  ;;  %2140 = vmatprep.mubr.msk.f32.mxu0 %vm389_vm2, %v1002_v62 }
 0x484   : > { %v1006_v0 = vpop.permute.xlu1 %1005 }
 0x488   : > { %v1008_v2 = vpop.permute.xlu1 %1007 }
 0x48b   : > { %v2322_v63 = vpop.eup %2321 }
 0x48c   : > { %v996_v4 = vsel %vm594_vm6, %v2322_v63, 0.0  ;;  %v1010_v3 = vpop.permute.xlu1 %1009 }
 0x48d   : > { %997 = vadd.xlane.f32.xlu1 %v996_v4 }
 0x49e   : > { %1011 = vrot.lane.b32.xlu1 %v2473_v9, %s2376_s26 }
 0x4a2   : > { %1013 = vrot.lane.b32.xlu1 %v2476_v11, %s2376_s26  ;;  %v1004_v11 = vpop.permute.xlu0 %1003 }
 0x4a6   : > { %1015 = vrot.lane.b32.xlu1 %v2482_v15, %s2376_s26 }
 0x51a   : > { %v998_v7 = vpop.xlane.xlu1 %997 }
 0x51b   : > { %2323 = vrcp.f32 %v998_v7 }
 0x51e   : > { %v1012_v5 = vpop.permute.xlu1 %1011 }
 0x522   : > { %v1014_v8 = vpop.permute.xlu1 %1013 }
 0x523   : > { %2149 = vmatprep.mubr.msk.f32.mxu1 %vm389_vm2, %v1014_v8 }
 0x525   : > { %v2324_v9 = vpop.eup %2323 }
 0x526   : > { %v1000_v13 = vmul.f32 %v2324_v9, %v2322_v63  ;;  %v1016_v15 = vpop.permute.xlu1 %1015 }
 0x528   : > { %2138 = vmatprep.subr.msk.mxu0 %vm389_vm2, %v1000_v13  ;;  %2232 = vmatprep.subr.msk.mxu1 %vm389_vm2, %v1000_v13 }
 0x529   : > { %2139 = vmatpush3.xpose.msk.msra.mxu0 %vm389_vm2, %v1000_v13  ;;  %2233 = vmatpush3.xpose.msk.msra.mxu1 %vm389_vm2, %v1000_v13 }
 0x52a   : > { %2152 = vmatprep.subr.msk.mxu1 %vm1167_vm7, %v1142_v14 }
 0x52c   : > { %2141 = vmatmul.mubr.msk.f32.vlgmr.msra.gmra.mrb[2].mxu0 %vm389_vm2, %v1004_v11  ;;  %2150 = vmatmul.mubr.msk.f32.vlgmr.msra.gmra.mrb[10].mxu1 %vm389_vm2, %v1016_v15 }
 0x52d   : > { %2143 = vmatprep.mubr.msk.f32.mxu0 %vm389_vm2, %v1006_v0  ;;  %2153 = vmatpush3.msk.msra.mxu1 %vm1167_vm7, %v1142_v14 }
 0x52e   : > { %2166 = vmatprep.subr.msk.mxu1 %vm1167_vm7, %v380_v10 }
 0x530   : > { %2144 = vmatmul.mubr.msk.f32.gmra.mrb[4].mxu0 %vm389_vm2, %v1008_v2 }
 0x531   : > { %2146 = vmatprep.mubr.msk.f32.mxu0 %vm389_vm2, %v1010_v3 }
 0x534   : > { %2147 = vmatmul.mubr.msk.f32.gmra.mrb[6].mxu0 %vm389_vm2, %v1012_v5 }
 0x5ff   : > { %v2142_v16 = vpop.f32.mrb[2].mxu0  ;;  %v2151_v18 = vpop.f32.mrb[10].mxu1 }
 0x600   : > { %v1102_v19 = vpop.f32.mrb[3].mxu0  ;;  %v1132_v20 = vpop.f32.mrb[11].mxu1 }
 0x601   : > { %2154 = vmatprep.mubr.msk.f32.mxu1 %vm389_vm2, %v1102_v19 }
 0x602   : > { %2155 = vmatmul.mubr.msk.f32.vlgmr.msra.gmra.mrb[12].mxu1 %vm389_vm2, %v2142_v16  ;;  %v1550_v16 = vld [vmem:[%s2828_s5] sm:$0xff] }
 0x603   : > { %v2145_v22 = vpop.f32.mrb[4].mxu0  ;;  %2167 = vmatpush3.msk.msra.mxu1 %vm1167_vm7, %v380_v10  ;;  %2180 = vmatprep.subr.mxu0 %v1550_v16 }
 0x604   : > { %v1112_v23 = vpop.f32.mrb[5].mxu0  ;;  %2181 = vmatpush3.msra.mxu0 %v1550_v16 }
 0x605   : > { %2157 = vmatprep.mubr.msk.f32.mxu1 %vm389_vm2, %v1112_v23 }
 0x606   : > { %2158 = vmatmul.mubr.msk.f32.gmra.mrb[14].mxu1 %vm389_vm2, %v2145_v22 }
 0x607   : > { %v2148_v24 = vpop.f32.mrb[6].mxu0 }
 0x608   : > { %v1122_v26 = vpop.f32.mrb[7].mxu0 }
 0x609   : > { %2160 = vmatprep.mubr.msk.f32.mxu1 %vm389_vm2, %v1122_v26 }
 0x60a   : > { %2161 = vmatmul.mubr.msk.f32.gmra.mrb[16].mxu1 %vm389_vm2, %v2148_v24 }
 0x60b   : > { %2163 = vmatprep.mubr.msk.f32.mxu1 %vm389_vm2, %v1132_v20 }
 0x60e   : > { %2164 = vmatmul.mubr.msk.f32.gmra.mrb[18].mxu1 %vm389_vm2, %v2151_v18  ;;  %v1689_v18 = vld [vmem:[%s2829_s6] sm:$0xff] }
 0x60f   : > { %2168 = vmatprep.mubr.msk.f32.mxu1 %vm389_vm2, %v2617_v50  ;;  %2194 = vmatprep.subr.mxu0 %v1689_v18 }
 0x612   : > { %2169 = vmatmul.mubr.msk.f32.vlgmr.msra.gmra.mrb[12].mxu1 %vm389_vm2, %v2615_v49 }
 0x613   : > { %2171 = vmatprep.mubr.msk.f32.mxu1 %vm389_vm2, %v2621_v31 }
 0x616   : > { %2172 = vmatmul.mubr.msk.f32.gmra.mrb[14].mxu1 %vm389_vm2, %v2619_v51 }
 0x617   : > { %2174 = vmatprep.mubr.msk.f32.mxu1 %vm389_vm2, %v2625_v53 }
 0x61a   : > { %2175 = vmatmul.mubr.msk.f32.gmra.mrb[16].mxu1 %vm389_vm2, %v2623_v52 }
 0x61b   : > { %2177 = vmatprep.mubr.msk.f32.mxu1 %vm389_vm2, %v2629_v54 }
 0x61e   : > { %2178 = vmatmul.mubr.msk.f32.gmra.mrb[18].mxu1 %vm389_vm2, %v2627_v46 }
 0x6e5   : > { %v2170_v27 = vpop.f32.mrb[12].mxu1 }
 0x6e6   : > { %v1367_v28 = vpop.f32.mrb[13].mxu1  ;;  %v1410_v29 = vsel %vm1406_vm8, %v2170_v27, 0.0 }
 0x6e7   : > { %1411 = vadd.xlane.f32.xlu0 %v1410_v29  ;;  %v1407_v30 = vsel %vm1406_vm8, %v1367_v28, 0.0 }
 0x6e8   : > { %1408 = vadd.xlane.f32.xlu1 %v1407_v30 }
 0x6e9   : > { %v2173_v17 = vpop.f32.mrb[14].mxu1 }
 0x6ea   : > { %v1377_v32 = vpop.f32.mrb[15].mxu1  ;;  %v1416_v33 = vsel %vm1406_vm8, %v2173_v17, 0.0 }
 0x6eb   : > { %v1413_v35 = vsel %vm1406_vm8, %v1377_v32, 0.0 }
 0x6ec   : > { %1417 = vadd.xlane.f32.xlu1 %v1416_v33 }
 0x6ed   : > { %v2176_v34 = vpop.f32.mrb[16].mxu1 }
 0x6ee   : > { %v1387_v6 = vpop.f32.mrb[17].mxu1  ;;  %v1422_v21 = vsel %vm1406_vm8, %v2176_v34, 0.0 }
 0x6ef   : > { %1423 = vadd.xlane.f32.xlu0 %v1422_v21  ;;  %v1419_v38 = vsel %vm1406_vm8, %v1387_v6, 0.0 }
 0x6f0   : > { %1414 = vadd.xlane.f32.xlu1 %v1413_v35 }
 0x6f1   : > { %v2179_v36 = vpop.f32.mrb[18].mxu1 }
 0x6f2   : > { %v1397_v25 = vpop.f32.mrb[19].mxu1  ;;  %v1428_v37 = vsel %vm1406_vm8, %v2179_v36, 0.0 }
 0x6f3   : > { %1429 = vadd.xlane.f32.xlu0 %v1428_v37  ;;  %v1425_v39 = vsel %vm1406_vm8, %v1397_v25, 0.0 }
 0x6f4   : > { %1420 = vadd.xlane.f32.xlu1 %v1419_v38  ;;  %v1990_v38 = vld [vmem:[%s2825_s2] ss:$0 sm:$0xff] }
 0x6f8   : > { %1426 = vadd.xlane.f32.xlu1 %v1425_v39 }
 0x774   : > { %v1412_v40 = vpop.xlane.xlu0 %1411 }
 0x775   : > { %v1433_v41 = vmul.f32 0.125, %v1412_v40  ;;  %v1409_v42 = vpop.xlane.xlu1 %1408 }
 0x776   : > { %v1432_v43 = vmul.f32 0.125, %v1409_v42 }
 0x777   : > { %v2698_v44 = vsub.f32 %v2170_v27, %v1433_v41 }
 0x778   : > { %v2700_v45 = vsub.f32 %v1367_v28, %v1432_v43  ;;  %v1991_v43 = vld [vmem:[%s2826_s3] ss:$0 sm:$0xff] }
 0x779   : > { %v1418_v47 = vpop.xlane.xlu1 %1417  ;;  %v1449_v12 = vmul.f32 %v2698_v44, %v2698_v44 }
 0x77a   : > { %v1435_v48 = vmul.f32 0.125, %v1418_v47  ;;  %v1448_v49 = vmul.f32 %v2700_v45, %v2700_v45 }
 0x77b   : > { %v1459_v50 = vsel %vm1406_vm8, %v1449_v12, 0.0 }
 0x77c   : > { %v2707_v51 = vsub.f32 %v2173_v17, %v1435_v48  ;;  %v1424_v31 = vpop.xlane.xlu0 %1423  ;;  %1460 = vadd.xlane.f32.xlu0 %v1459_v50  ;;  %v1456_v52 = vsel %vm1406_vm8, %v1448_v49, 0.0 }
 0x77d   : > { %v1437_v53 = vmul.f32 0.125, %v1424_v31  ;;  %v1415_v46 = vpop.xlane.xlu1 %1414  ;;  %1457 = vadd.xlane.f32.xlu1 %v1456_v52 }
 0x77e   : > { %v1434_v54 = vmul.f32 0.125, %v1415_v46  ;;  %v1451_v55 = vmul.f32 %v2707_v51, %v2707_v51 }
 0x77f   : > { %v2712_v56 = vsub.f32 %v2176_v34, %v1437_v53 }
 0x780   : > { %v2714_v1 = vsub.f32 %v1377_v32, %v1434_v54  ;;  %v1430_v57 = vpop.xlane.xlu0 %1429  ;;  %v1465_v58 = vsel %vm1406_vm8, %v1451_v55, 0.0 }
 0x781   : > { %v1439_v59 = vmul.f32 0.125, %v1430_v57  ;;  %v1421_v60 = vpop.xlane.xlu1 %1420  ;;  %1466 = vadd.xlane.f32.xlu0 %v1465_v58  ;;  %v1453_v61 = vmul.f32 %v2712_v56, %v2712_v56 }
 0x782   : > { %v1436_v62 = vmul.f32 0.125, %v1421_v60  ;;  %v1450_v63 = vmul.f32 %v2714_v1, %v2714_v1 }
 0x783   : > { %v2721_v4 = vsub.f32 %v2179_v36, %v1439_v59  ;;  %v1471_v0 = vsel %vm1406_vm8, %v1453_v61, 0.0 }
 0x784   : > { %v2724_v2 = vsub.f32 %v1387_v6, %v1436_v62  ;;  %v1462_v3 = vsel %vm1406_vm8, %v1450_v63, 0.0 }
 0x785   : > { %1472 = vadd.xlane.f32.xlu0 %v1471_v0  ;;  %1463 = vadd.xlane.f32.xlu1 %v1462_v3  ;;  %v1427_v7 = vpop.xlane.xlu1 %1426  ;;  %v1455_v5 = vmul.f32 %v2721_v4, %v2721_v4 }
 0x786   : > { %v1438_v8 = vmul.f32 0.125, %v1427_v7  ;;  %v1452_v10 = vmul.f32 %v2724_v2, %v2724_v2 }
 0x787   : > { %v1477_v9 = vsel %vm1406_vm8, %v1455_v5, 0.0 }
 0x788   : > { %v2732_v13 = vsub.f32 %v1397_v25, %v1438_v8  ;;  %v1468_v14 = vsel %vm1406_vm8, %v1452_v10, 0.0 }
 0x789   : > { %1478 = vadd.xlane.f32.xlu0 %v1477_v9  ;;  %1469 = vadd.xlane.f32.xlu1 %v1468_v14 }
 0x78a   : > { %v1454_v11 = vmul.f32 %v2732_v13, %v2732_v13 }
 0x78c   : > { %v1474_v15 = vsel %vm1406_vm8, %v1454_v11, 0.0 }
 0x78d   : > { %1475 = vadd.xlane.f32.xlu1 %v1474_v15 }
 0x809   : > { %v1461_v19 = vpop.xlane.xlu0 %1460 }
 0x80a   : > { %v1481_v20 = vmul.f32 0.125, %v1461_v19  ;;  %v1458_v22 = vpop.xlane.xlu1 %1457 }
 0x80b   : > { %v1480_v23 = vmul.f32 0.125, %v1458_v22 }
 0x80c   : > { %v1489_v24 = vadd.f32 1e-05, %v1481_v20 }
 0x80d   : > { %v1488_v26 = vadd.f32 1e-05, %v1480_v23 }
 0x80e   : > { %2325 = vrsqrt.f32 %v1489_v24  ;;  %v1467_v27 = vpop.xlane.xlu0 %1466 }
 0x80f   : > { %2327 = vrsqrt.f32 %v1488_v26  ;;  %v1483_v28 = vmul.f32 0.125, %v1467_v27 }
 0x811   : > { %v1491_v29 = vadd.f32 1e-05, %v1483_v28 }
 0x812   : > { %v1473_v30 = vpop.xlane.xlu0 %1472  ;;  %v1464_v17 = vpop.xlane.xlu1 %1463 }
 0x813   : > { %2329 = vrsqrt.f32 %v1491_v29  ;;  %v1485_v32 = vmul.f32 0.125, %v1473_v30  ;;  %v1482_v33 = vmul.f32 0.125, %v1464_v17 }
 0x815   : > { %v1493_v34 = vadd.f32 1e-05, %v1485_v32  ;;  %v1490_v6 = vadd.f32 1e-05, %v1482_v33 }
 0x816   : > { %v1479_v21 = vpop.xlane.xlu0 %1478  ;;  %v1470_v35 = vpop.xlane.xlu1 %1469 }
 0x817   : > { %2331 = vrsqrt.f32 %v1493_v34  ;;  %v1487_v36 = vmul.f32 0.125, %v1479_v21  ;;  %v1484_v25 = vmul.f32 0.125, %v1470_v35 }
 0x818   : > { %v2326_v37 = vpop.eup %2325  ;;  %2333 = vrsqrt.f32 %v1490_v6 }
 0x819   : > { %v2328_v39 = vpop.eup %2327  ;;  %v1505_v40 = vmul.f32 %v2326_v37, %v2698_v44  ;;  %v1495_v41 = vadd.f32 1e-05, %v1487_v36  ;;  %v1492_v42 = vadd.f32 1e-05, %v1484_v25 }
 0x81a   : > { %v1476_v47 = vpop.xlane.xlu1 %1475  ;;  %v1504_v12 = vmul.f32 %v2328_v39, %v2700_v45 }
 0x81b   : > { %v1520_v48 = vmul.f32 %v1990_v38, %v1505_v40  ;;  %2335 = vrsqrt.f32 %v1495_v41  ;;  %v1486_v49 = vmul.f32 0.125, %v1476_v47 }
 0x81c   : > { %2337 = vrsqrt.f32 %v1492_v42  ;;  %v1519_v44 = vmul.f32 %v1990_v38, %v1504_v12 }
 0x81d   : > { %v2330_v50 = vpop.eup %2329  ;;  %v1535_v31 = vadd.f32 %v1991_v43, %v1520_v48  ;;  %v1494_v52 = vadd.f32 1e-05, %v1486_v49 }
 0x81e   : > { %v1534_v53 = vadd.f32 %v1991_v43, %v1519_v44  ;;  %v1507_v46 = vmul.f32 %v2330_v50, %v2707_v51 }
 0x81f   : > { %1543 = vst.msk [vmem:[%s2756_s21 + $0x8] sm:$0xff] %vm1406_vm8, %v1535_v31  ;;  %2339 = vrsqrt.f32 %v1494_v52 }
 0x820   : > { %1542 = vst.msk [vmem:[%s2756_s21] sm:$0xff] %vm1406_vm8, %v1534_v53  ;;  %2182 = vmatprep.mubr.msk.f32.mxu0 %vm1406_vm8, %v1534_v53  ;;  %v1522_v45 = vmul.f32 %v1990_v38, %v1507_v46 }
 0x821   : > { %v2332_v54 = vpop.eup %2331  ;;  %2183 = vmatmul.mubr.msk.f32.vlgmr.msra.gmra.mrb[8].mxu0 %vm1406_vm8, %v1535_v31 }
 0x822   : > { %v2334_v55 = vpop.eup %2333  ;;  %2195 = vmatpush3.msra.mxu0 %v1689_v18  ;;  %v1537_v57 = vadd.f32 %v1991_v43, %v1522_v45  ;;  %v1509_v58 = vmul.f32 %v2332_v54, %v2712_v56 }
 0x823   : > { %v1506_v51 = vmul.f32 %v2334_v55, %v2714_v1 }
 0x824   : > { %1545 = vst.msk [vmem:[%s2756_s21 + $0x18] sm:$0xff] %vm1406_vm8, %v1537_v57  ;;  %v1524_v59 = vmul.f32 %v1990_v38, %v1509_v58 }
 0x825   : > { %v2336_v60 = vpop.eup %2335  ;;  %v1521_v61 = vmul.f32 %v1990_v38, %v1506_v51 }
 0x826   : > { %v2338_v62 = vpop.eup %2337  ;;  %v1539_v63 = vadd.f32 %v1991_v43, %v1524_v59  ;;  %v1511_v0 = vmul.f32 %v2336_v60, %v2721_v4 }
 0x827   : > { %v1536_v3 = vadd.f32 %v1991_v43, %v1521_v61  ;;  %v1508_v7 = vmul.f32 %v2338_v62, %v2724_v2 }
 0x828   : > { %1547 = vst.msk [vmem:[%s2756_s21 + $0x28] sm:$0xff] %vm1406_vm8, %v1539_v63  ;;  %v1526_v56 = vmul.f32 %v1990_v38, %v1511_v0 }
 0x829   : > { %v2340_v5 = vpop.eup %2339  ;;  %1544 = vst.msk [vmem:[%s2756_s21 + $0x10] sm:$0xff] %vm1406_vm8, %v1536_v3  ;;  %2185 = vmatprep.mubr.msk.f32.mxu0 %vm1406_vm8, %v1536_v3  ;;  %v1523_v1 = vmul.f32 %v1990_v38, %v1508_v7 }
 0x82a   : > { %2186 = vmatmul.mubr.msk.f32.gmra.mrb[10].mxu0 %vm1406_vm8, %v1537_v57  ;;  %v1510_v8 = vmul.f32 %v2340_v5, %v2732_v13  ;;  %v1541_v10 = vadd.f32 %v1991_v43, %v1526_v56 }
 0x82b   : > { %v1538_v9 = vadd.f32 %v1991_v43, %v1523_v1 }
 0x82c   : > { %v1525_v4 = vmul.f32 %v1990_v38, %v1510_v8  ;;  %1549 = vst.msk [vmem:[%s2756_s21 + $0x38] sm:$0xff] %vm1406_vm8, %v1541_v10 }
 0x82d   : > { %1546 = vst.msk [vmem:[%s2756_s21 + $0x20] sm:$0xff] %vm1406_vm8, %v1538_v9  ;;  %2188 = vmatprep.mubr.msk.f32.mxu0 %vm1406_vm8, %v1538_v9 }
 0x82e   : > { %2189 = vmatmul.mubr.msk.f32.gmra.mrb[12].mxu0 %vm1406_vm8, %v1539_v63  ;;  %v1540_v2 = vadd.f32 %v1991_v43, %v1525_v4 }
 0x830   : > { %1548 = vst.msk [vmem:[%s2756_s21 + $0x30] sm:$0xff] %vm1406_vm8, %v1540_v2  ;;  %2191 = vmatprep.mubr.msk.f32.mxu0 %vm1406_vm8, %v1540_v2 }
 0x832   : > { %2192 = vmatmul.mubr.msk.f32.gmra.mrb[14].mxu0 %vm1406_vm8, %v1541_v10 }
 0x833   : > { %2196 = vmatprep.mubr.msk.f32.mxu0 %vm1406_vm8, %v1534_v53 }
 0x836   : > { %2197 = vmatmul.mubr.msk.f32.vlgmr.msra.gmra.mrb[16].mxu0 %vm1406_vm8, %v1535_v31 }
 0x837   : > { %2199 = vmatprep.mubr.msk.f32.mxu0 %vm1406_vm8, %v1536_v3 }
 0x83a   : > { %2200 = vmatmul.mubr.msk.f32.gmra.mrb[18].mxu0 %vm1406_vm8, %v1537_v57 }
 0x83b   : > { %2202 = vmatprep.mubr.msk.f32.mxu0 %vm1406_vm8, %v1538_v9 }
 0x83e   : > { %2203 = vmatmul.mubr.msk.f32.gmra.mrb[20].mxu0 %vm1406_vm8, %v1539_v63 }
 0x83f   : > { %2205 = vmatprep.mubr.msk.f32.mxu0 %vm1406_vm8, %v1540_v2 }
 0x842   : > { %2206 = vmatmul.mubr.msk.f32.gmra.mrb[22].mxu0 %vm1406_vm8, %v1541_v10 }
 0x8f4   : > { %v2184_v13 = vpop.f32.mrb[8].mxu0 }
 0x8f5   : > { %1682 = vst.msk [vmem:[%s366_s24 + $0x8] sm:$0xff] %vm1680_vm9, %v2184_v13  ;;  %v1641_v14 = vpop.f32.mrb[9].mxu0 }
 0x8f6   : > { %1681 = vst.msk [vmem:[%s366_s24] sm:$0xff] %vm1680_vm9, %v1641_v14 }
 0x8fd   : > { %v2187_v11 = vpop.f32.mrb[10].mxu0 }
 0x8fe   : > { %1684 = vst.msk [vmem:[%s366_s24 + $0x18] sm:$0xff] %vm1680_vm9, %v2187_v11  ;;  %v1651_v15 = vpop.f32.mrb[11].mxu0 }
 0x8ff   : > { %1683 = vst.msk [vmem:[%s366_s24 + $0x10] sm:$0xff] %vm1680_vm9, %v1651_v15 }
 0x901   : > { %v2190_v16 = vpop.f32.mrb[12].mxu0 }
 0x902   : > { %1686 = vst.msk [vmem:[%s366_s24 + $0x28] sm:$0xff] %vm1680_vm9, %v2190_v16  ;;  %v1661_v18 = vpop.f32.mrb[13].mxu0 }
 0x903   : > { %1685 = vst.msk [vmem:[%s366_s24 + $0x20] sm:$0xff] %vm1680_vm9, %v1661_v18 }
 0x905   : > { %v2193_v19 = vpop.f32.mrb[14].mxu0 }
 0x906   : > { %1688 = vst.msk [vmem:[%s366_s24 + $0x38] sm:$0xff] %vm1680_vm9, %v2193_v19  ;;  %v1671_v20 = vpop.f32.mrb[15].mxu0 }
 0x907   : > { %1687 = vst.msk [vmem:[%s366_s24 + $0x30] sm:$0xff] %vm1680_vm9, %v1671_v20 }
 0x909   : > { %v2198_v22 = vpop.f32.mrb[16].mxu0 }
 0x90a   : > { %1796 = vst.msk [vmem:[%s371_s27 + $0x8] sm:$0xff] %vm1680_vm9, %v2198_v22  ;;  %v1756_v23 = vpop.f32.mrb[17].mxu0 }
 0x90b   : > { %1795 = vst.msk [vmem:[%s371_s27] sm:$0xff] %vm1680_vm9, %v1756_v23 }
 0x90d   : > { %v2201_v24 = vpop.f32.mrb[18].mxu0 }
 0x90e   : > { %1798 = vst.msk [vmem:[%s371_s27 + $0x18] sm:$0xff] %vm1680_vm9, %v2201_v24  ;;  %v1766_v26 = vpop.f32.mrb[19].mxu0 }
 0x90f   : > { %1797 = vst.msk [vmem:[%s371_s27 + $0x10] sm:$0xff] %vm1680_vm9, %v1766_v26 }
 0x911   : > { %v2204_v27 = vpop.f32.mrb[20].mxu0 }
 0x912   : > { %1800 = vst.msk [vmem:[%s371_s27 + $0x28] sm:$0xff] %vm1680_vm9, %v2204_v27  ;;  %v1776_v28 = vpop.f32.mrb[21].mxu0 }
 0x913   : > { %1799 = vst.msk [vmem:[%s371_s27 + $0x20] sm:$0xff] %vm1680_vm9, %v1776_v28 }
 0x915   : > { %v2207_v29 = vpop.f32.mrb[22].mxu0 }
 0x916   : > { %1802 = vst.msk [vmem:[%s371_s27 + $0x38] sm:$0xff] %vm1680_vm9, %v2207_v29  ;;  %v1786_v30 = vpop.f32.mrb[23].mxu0 }
 0x917   : > { %1801 = vst.msk [vmem:[%s371_s27 + $0x30] sm:$0xff] %vm1680_vm9, %v1786_v30 }
 0x918 PF: > { %s21_s30 = sadd.s32 1, %s2366_s30  }
 0x919   : > { %p18_p1 = scmp.ge.s32.totalorder %s21_s30, 4  }
 0x91b   :  { %20 = sbr.rel (!%p18_p1) target bundleno = 1 (0x1), region = 107 }
 0x922   :  { %1856 = vsyncpa [#allocation3], 1 }
 0x923   :  { %1858 = vsyncpa [#allocation3 + $0x1], 1 }

// kernel: transformer_block.9
= control target key start
LH: loop header
LB: loop body
LE: loop exit
PB: predicated region body
PF: predicated region fallthrough
CT: control target
= control target key end

     0   :  { %s942_s16 = smov 16   ;;  %s1573_s0 = inlined_call_operand.vmem [shape: f32[128,32], index: 0, kind: input, shape index: {}]   ;;  %s1574_s1 = inlined_call_operand.vmem [shape: f32[16,8], index: 1, kind: input, shape index: {}]   ;;  %s1575_s2 = inlined_call_operand.vmem [shape: f32[128,8], index: 2, kind: input, shape index: {}]   ;;  %s1576_s3 = inlined_call_operand.vmem [shape: f32[128,8], index: 3, kind: output, shape index: {}]  }
   0x1   :  { %v14_v0 = vld [vmem:[%s1573_s0] sm:$0xff]  ;;  %v15_v1 = vld [vmem:[%s1573_s0 + $0x8] sm:$0xff]  ;;  %v984_v4 = vld [vmem:[%s1573_s0 + $0x10] sm:$0xff] }
   0x2   :  { %478 = vrot.lane.b32.xlu0 %v14_v0, %s942_s16  ;;  %480 = vrot.lane.b32.xlu1 %v15_v1, %s942_s16  ;;  %v22_v2 = vld [vmem:[%s1573_s0 + $0x40] sm:$0xff]  ;;  %v23_v3 = vld [vmem:[%s1573_s0 + $0x48] sm:$0xff]  ;;  %v1037_v12 = vmul.f32 0.70710677, %v14_v0  ;;  %v1049_v15 = vmul.f32 0.70710677, %v15_v1 }
   0x3   :  { %v989_v5 = vld [vmem:[%s1573_s0 + $0x50] sm:$0xff]  ;;  %v998_v6 = vld [vmem:[%s1573_s0 + $0x18] sm:$0xff]  ;;  %v1012_v8 = vld [vmem:[%s1573_s0 + $0x20] sm:$0xff]  ;;  %v1066_v19 = vmul.f32 0.70710677, %v22_v2  ;;  %v1083_v35 = vmul.f32 0.5, %v14_v0 }
   0x4   :  { %v1003_v7 = vld [vmem:[%s1573_s0 + $0x58] sm:$0xff]  ;;  %v1017_v9 = vld [vmem:[%s1573_s0 + $0x60] sm:$0xff]  ;;  %v1026_v10 = vld [vmem:[%s1573_s0 + $0x28] sm:$0xff]  ;;  %v94_v16 = vand.u32 2147483647, %v1037_v12  ;;  %v1085_v37 = vmul.f32 0.5, %v15_v1 }
   0x5   :  { %1593 = vst [vmem:[#allocation2_spill] sm:$0xff] %v1026_v10  ;;  %v1031_v11 = vld [vmem:[%s1573_s0 + $0x68] sm:$0xff]  ;;  %v1042_v13 = vld [vmem:[%s1573_s0 + $0x30] sm:$0xff]  ;;  %v1059_v17 = vld [vmem:[%s1573_s0 + $0x38] sm:$0xff]  ;;  %v95_v20 = vand.u32 2147483647, %v1049_v15 }
   0x6   :  { %494 = vrot.lane.b32.xlu0 %v22_v2, %s942_s16  ;;  %496 = vrot.lane.b32.xlu1 %v23_v3, %s942_s16  ;;  %1594 = vst [vmem:[#allocation3_spill] sm:$0xff] %v1031_v11  ;;  %1595 = vst [vmem:[#allocation4_spill] sm:$0xff] %v1042_v13  ;;  %v1047_v14 = vld [vmem:[%s1573_s0 + $0x70] sm:$0xff]  ;;  %v1064_v18 = vld [vmem:[%s1573_s0 + $0x78] sm:$0xff]  ;;  %v110_v21 = vmul.f32 0.3275911, %v94_v16 }
   0x7   :  { %1596 = vst [vmem:[#allocation5_spill] sm:$0xff] %v1047_v14  ;;  %1597 = vst [vmem:[#allocation6_spill] sm:$0xff] %v1059_v17  ;;  %v318_v22 = vsub.f32 0.0, %v94_v16  ;;  %v319_v23 = vsub.f32 0.0, %v95_v20  ;;  %v102_v24 = vand.u32 2147483647, %v1066_v19 }
   0x8   :  { %1598 = vst [vmem:[#allocation7_spill] sm:$0xff] %v1064_v18  ;;  %v1074_v25 = vmul.f32 0.70710677, %v23_v3  ;;  %v111_v26 = vmul.f32 0.3275911, %v95_v20  ;;  %v126_v28 = vadd.f32 1.0, %v110_v21 }
   0x9   :  { %v326_v27 = vsub.f32 0.0, %v102_v24  ;;  %v334_v29 = vmul.f32 %v318_v22, %v94_v16  ;;  %v1077_v30 = vmul.f32 0.70710677, %v984_v4  ;;  %v335_v31 = vmul.f32 %v319_v23, %v95_v20  ;;  %1599 = vst [vmem:[#allocation8_spill] sm:$0xff] %v1085_v37 }
   0xa   :  { %482 = vrot.lane.b32.xlu0 %v984_v4, %s942_s16  ;;  %498 = vrot.lane.b32.xlu1 %v989_v5, %s942_s16  ;;  %v118_v32 = vmul.f32 0.3275911, %v102_v24  ;;  %v103_v33 = vand.u32 2147483647, %v1074_v25  ;;  %v1081_v34 = vmul.f32 0.70710677, %v989_v5  ;;  %878 = vrcp.f32 %v126_v28 }
   0xb   :  { %v127_v36 = vadd.f32 1.0, %v111_v26  ;;  %v342_v38 = vmul.f32 %v326_v27, %v102_v24  ;;  %v1088_v40 = vmul.f32 0.70710677, %v998_v6  ;;  %v350_v41 = vmul.f32 1.442695, %v334_v29 }
   0xc   :  { %v327_v39 = vsub.f32 0.0, %v103_v33  ;;  %v1090_v42 = vmul.f32 0.5, %v22_v2  ;;  %v96_v43 = vand.u32 2147483647, %v1077_v30  ;;  %v352_v44 = vmul.f32 1.442695, %v335_v31 }
   0xd   :  { %v134_v45 = vadd.f32 1.0, %v118_v32  ;;  %v1093_v46 = vmul.f32 0.5, %v23_v3  ;;  %v104_v47 = vand.u32 2147483647, %v1081_v34  ;;  %880 = vrcp.f32 %v127_v36 }
   0xe   :  { %484 = vrot.lane.b32.xlu0 %v998_v6, %s942_s16  ;;  %500 = vrot.lane.b32.xlu1 %v1003_v7, %s942_s16  ;;  %1600 = vst [vmem:[#allocation9_spill] sm:$0xff] %v1090_v42  ;;  %v119_v48 = vmul.f32 0.3275911, %v103_v33  ;;  %v320_v49 = vsub.f32 0.0, %v96_v43  ;;  %v1097_v50 = vmul.f32 0.70710677, %v1003_v7  ;;  %v343_v52 = vmul.f32 %v327_v39, %v103_v33 }
   0xf   :  { %1601 = vst [vmem:[#allocation10_spill] sm:$0xff] %v1093_v46  ;;  %v366_v51 = vmul.f32 1.442695, %v342_v38  ;;  %v328_v53 = vsub.f32 0.0, %v104_v47  ;;  %v97_v54 = vand.u32 2147483647, %v1088_v40  ;;  %882 = vpow2.f32 %v350_v41 }
  0x10   :  { %v1101_v55 = vmul.f32 0.5, %v984_v4  ;;  %v112_v56 = vmul.f32 0.3275911, %v96_v43  ;;  %v1104_v57 = vmul.f32 0.70710677, %v1012_v8  ;;  %884 = vpow2.f32 %v352_v44 }
  0x11   :  { %v120_v58 = vmul.f32 0.3275911, %v104_v47  ;;  %v321_v59 = vsub.f32 0.0, %v97_v54  ;;  %v1107_v60 = vmul.f32 0.70710677, %v1017_v9  ;;  %886 = vrcp.f32 %v134_v45 }
  0x12   :  { %486 = vrot.lane.b32.xlu0 %v1012_v8, %s942_s16  ;;  %502 = vrot.lane.b32.xlu1 %v1017_v9, %s942_s16  ;;  %1602 = vst [vmem:[#allocation11_spill] sm:$0xff] %v1101_v55  ;;  %v135_v61 = vadd.f32 1.0, %v119_v48  ;;  %v336_v62 = vmul.f32 %v320_v49, %v96_v43  ;;  %v105_v63 = vand.u32 2147483647, %v1097_v50  ;;  %888 = vpow2.f32 %v366_v51 }
  0x13   :  { %v368_v0 = vmul.f32 1.442695, %v343_v52  ;;  %v1111_v1 = vmul.f32 0.5, %v989_v5  ;;  %v344_v2 = vmul.f32 %v328_v53, %v104_v47  ;;  %v128_v3 = vadd.f32 1.0, %v112_v56 }
  0x14   :  { %v113_v4 = vmul.f32 0.3275911, %v97_v54  ;;  %v329_v16 = vsub.f32 0.0, %v105_v63  ;;  %v98_v20 = vand.u32 2147483647, %v1104_v57  ;;  %v136_v21 = vadd.f32 1.0, %v120_v58  ;;  %v1118_v26 = vpop.eup %878 }
  0x15   :  { %1603 = vst [vmem:[#allocation12_spill] sm:$0xff] %v1111_v1  ;;  %v337_v22 = vmul.f32 %v321_v59, %v97_v54  ;;  %v106_v23 = vand.u32 2147483647, %v1107_v60  ;;  %v1116_v24 = vmul.f32 0.70710677, %v1026_v10  ;;  %890 = vrcp.f32 %v135_v61 }
  0x16   :  { %488 = vrot.lane.b32.xlu0 %v1026_v10, %s942_s16  ;;  %504 = vrot.lane.b32.xlu1 %v1031_v11, %s942_s16  ;;  %v354_v27 = vmul.f32 1.442695, %v336_v62  ;;  %v121_v28 = vmul.f32 0.3275911, %v105_v63  ;;  %v322_v5 = vsub.f32 0.0, %v98_v20  ;;  %892 = vpow2.f32 %v368_v0 }
  0x17   :  { %v370_v29 = vmul.f32 1.442695, %v344_v2  ;;  %v330_v31 = vsub.f32 0.0, %v106_v23  ;;  %v1121_v32 = vmul.f32 0.70710677, %v1031_v11  ;;  %v1123_v33 = vpop.eup %880  ;;  %894 = vrcp.f32 %v128_v3 }
  0x18   :  { %v129_v36 = vadd.f32 1.0, %v113_v4  ;;  %v345_v38 = vmul.f32 %v329_v16, %v105_v63  ;;  %v114_v39 = vmul.f32 0.3275911, %v98_v20  ;;  %896 = vrcp.f32 %v136_v21 }
  0x19   :  { %v356_v41 = vmul.f32 1.442695, %v337_v22  ;;  %v99_v43 = vand.u32 2147483647, %v1116_v24  ;;  %v174_v44 = vmul.f32 1.0614054, %v1118_v26  ;;  %v1127_v45 = vpop.eup %882  ;;  %898 = vpow2.f32 %v354_v27 }
  0x1a   :  { %490 = vrot.lane.b32.xlu0 %v1042_v13, %s942_s16  ;;  %506 = vrot.lane.b32.xlu1 %v1047_v14, %s942_s16  ;;  %v137_v47 = vadd.f32 1.0, %v121_v28  ;;  %v338_v48 = vmul.f32 %v322_v5, %v98_v20  ;;  %v122_v49 = vmul.f32 0.3275911, %v106_v23  ;;  %v1129_v51 = vpop.eup %884  ;;  %900 = vpow2.f32 %v370_v29 }
  0x1b   :  { %v346_v52 = vmul.f32 %v330_v31, %v106_v23  ;;  %v323_v53 = vsub.f32 0.0, %v99_v43  ;;  %v107_v54 = vand.u32 2147483647, %v1121_v32  ;;  %v1132_v56 = vpop.eup %886  ;;  %902 = vrcp.f32 %v129_v36 }
  0x1c   :  { %v372_v58 = vmul.f32 1.442695, %v345_v38  ;;  %v130_v59 = vadd.f32 1.0, %v114_v39  ;;  %v1135_v61 = vmul.f32 0.70710677, %v1042_v13  ;;  %v1137_v62 = vpop.eup %888  ;;  %904 = vpow2.f32 %v356_v41 }
  0x1d   :  { %v115_v63 = vmul.f32 0.3275911, %v99_v43  ;;  %v1140_v0 = vmul.f32 0.70710677, %v1047_v14  ;;  %v190_v2 = vadd.f32 -1.4531521, %v174_v44  ;;  %906 = vrcp.f32 %v137_v47 }
  0x1e   :  { %492 = vrot.lane.b32.xlu0 %v1059_v17, %s942_s16  ;;  %508 = vrot.lane.b32.xlu1 %v1064_v18, %s942_s16  ;;  %1604 = vst [vmem:[#allocation13_spill] sm:$0xff] %v1135_v61  ;;  %v1143_v3 = vmul.f32 0.5, %v998_v6  ;;  %v358_v4 = vmul.f32 1.442695, %v338_v48  ;;  %v138_v16 = vadd.f32 1.0, %v122_v49  ;;  %v339_v21 = vmul.f32 %v323_v53, %v99_v43 }
  0x1f   :  { %1605 = vst [vmem:[#allocation14_spill] sm:$0xff] %v1140_v0  ;;  %v374_v20 = vmul.f32 1.442695, %v346_v52  ;;  %v123_v22 = vmul.f32 0.3275911, %v107_v54  ;;  %v331_v23 = vsub.f32 0.0, %v107_v54  ;;  %v1145_v27 = vpop.eup %890  ;;  %908 = vpow2.f32 %v372_v58 }
  0x20   :  { %1606 = vst [vmem:[#allocation15_spill] sm:$0xff] %v1143_v3  ;;  %vm62_vm0 = vcmp.ge.f32.partialorder %v1037_v12, 0.0  ;;  %v100_v28 = vand.u32 2147483647, %v1135_v61  ;;  %v1150_v5 = vmul.f32 0.70710677, %v1059_v17  ;;  %v1153_v29 = vpop.eup %892  ;;  %910 = vrcp.f32 %v130_v59 }
  0x21   :  { %v175_v6 = vmul.f32 1.0614054, %v1123_v33  ;;  %v131_v31 = vadd.f32 1.0, %v115_v63  ;;  %v108_v36 = vand.u32 2147483647, %v1140_v0  ;;  %v206_v38 = vmul.f32 %v1118_v26, %v190_v2  ;;  %v1157_v39 = vpop.eup %894 }
  0x22   :  { %1607 = vst [vmem:[#allocation16_spill] sm:$0xff] %v1150_v5  ;;  %912 = vrcp.f32 %v138_v16  ;;  %v324_v41 = vsub.f32 0.0, %v100_v28  ;;  %v1160_v43 = vmul.f32 0.70710677, %v1064_v18  ;;  %v182_v44 = vmul.f32 1.0614054, %v1132_v56  ;;  %v1163_v47 = vpop.eup %896 }
  0x23   :  { %v1166_v48 = vmul.f32 0.5, %v1003_v7  ;;  %914 = vpow2.f32 %v358_v4  ;;  %v360_v49 = vmul.f32 1.442695, %v339_v21  ;;  %v347_v52 = vmul.f32 %v331_v23, %v107_v54  ;;  %v1168_v53 = vpop.eup %898 }
  0x24   :  { %1608 = vst [vmem:[#allocation17_spill] sm:$0xff] %v1160_v43  ;;  %916 = vpow2.f32 %v374_v20  ;;  %v139_v58 = vadd.f32 1.0, %v123_v22  ;;  %v1171_v59 = vand.u32 2147483647, %v1150_v5  ;;  %v191_v63 = vadd.f32 -1.4531521, %v175_v6  ;;  %v1173_v2 = vpop.eup %900 }
  0x25   :  { %1609 = vst [vmem:[#allocation18_spill] sm:$0xff] %v1166_v48  ;;  %918 = vrcp.f32 %v131_v31  ;;  %v116_v16 = vmul.f32 0.3275911, %v100_v28  ;;  %v124_v18 = vmul.f32 0.3275911, %v108_v36  ;;  %v1175_v14 = vpop.eup %902  ;;  %v340_v7 = vmul.f32 %v324_v41, %v100_v28 }
  0x26   :  { %v222_v17 = vadd.f32 1.4214138, %v206_v38  ;;  %v332_v4 = vsub.f32 0.0, %v108_v36  ;;  %v109_v54 = vand.u32 2147483647, %v1160_v43  ;;  %v1178_v23 = vpop.eup %904  ;;  %vm63_vm1 = vcmp.ge.f32.partialorder %v1049_v15, 0.0 }
  0x27   :  { %v198_v21 = vadd.f32 -1.4531521, %v182_v44  ;;  %vm70_vm2 = vcmp.ge.f32.partialorder %v1066_v19, 0.0  ;;  %v1183_v20 = vmul.f32 0.5, %v1012_v8  ;;  %920 = vpow2.f32 %v360_v49  ;;  %v1186_v31 = vpop.eup %906 }
  0x28   :  { %v376_v22 = vmul.f32 1.442695, %v347_v52  ;;  %v183_v6 = vmul.f32 1.0614054, %v1145_v27  ;;  %v1189_v28 = vmul.f32 0.5, %v1017_v9  ;;  %922 = vrcp.f32 %v139_v58 }
  0x29   :  { %1610 = vst [vmem:[#allocation19_spill] sm:$0xff] %v1183_v20  ;;  %v117_v38 = vmul.f32 0.3275911, %v1171_v59  ;;  %v207_v41 = vmul.f32 %v1123_v33, %v191_v63  ;;  %v132_v44 = vadd.f32 1.0, %v116_v16  ;;  %v140_v13 = vadd.f32 1.0, %v124_v18  ;;  %v1195_v49 = vpop.eup %908 }
  0x2a   :  { %1611 = vst [vmem:[#allocation20_spill] sm:$0xff] %v1189_v28  ;;  %v238_v11 = vmul.f32 %v1118_v26, %v222_v17  ;;  %v176_v8 = vmul.f32 1.0614054, %v1157_v39  ;;  %v362_v52 = vmul.f32 1.442695, %v340_v7  ;;  %v348_v20 = vmul.f32 %v332_v4, %v108_v36  ;;  %v1198_v9 = vpop.eup %910 }
  0x2b   :  { %v125_v43 = vmul.f32 0.3275911, %v109_v54  ;;  %v214_v10 = vmul.f32 %v1132_v56, %v198_v21  ;;  %vm71_vm3 = vcmp.ge.f32.partialorder %v1074_v25, 0.0  ;;  %vm64_vm4 = vcmp.ge.f32.partialorder %v1077_v30, 0.0 }
  0x2c   :  { %924 = vpow2.f32 %v376_v22  ;;  %v1585_v58 = vmov -1.0   ;;  %v199_v18 = vadd.f32 -1.4531521, %v183_v6  ;;  %v184_v63 = vmul.f32 1.0614054, %v1163_v47  ;;  %v1208_v36 = vpop.eup %912 }
  0x2d   :  { %v1205_v17 = vsel %vm62_vm0, 1.0, %v1585_v58  ;;  %v133_v16 = vadd.f32 1.0, %v117_v38  ;;  %v325_v7 = vsub.f32 0.0, %v1171_v59  ;;  %v333_v4 = vsub.f32 0.0, %v109_v54  ;;  %v1211_v28 = vpop.eup %914 }
  0x2e   :  { %v223_v21 = vadd.f32 1.4214138, %v207_v41  ;;  %vm72_vm5 = vcmp.ge.f32.partialorder %v1081_v34, 0.0  ;;  %vm65_vm6 = vcmp.ge.f32.partialorder %v1088_v40, 0.0  ;;  %926 = vrcp.f32 %v132_v44  ;;  %v1216_v58 = vpop.eup %916 }
  0x2f   :  { %v254_v12 = vadd.f32 -0.28449672, %v238_v11  ;;  %v192_v22 = vadd.f32 -1.4531521, %v176_v8  ;;  %v177_v6 = vmul.f32 1.0614054, %v1175_v14  ;;  %928 = vpow2.f32 %v362_v52  ;;  %v1218_v3 = vpop.eup %918 }
  0x30   :  { %1612 = vst [vmem:[#allocation21_spill] sm:$0xff] %v1216_v58  ;;  %v378_v48 = vmul.f32 1.442695, %v348_v20  ;;  %v141_v38 = vadd.f32 1.0, %v125_v43  ;;  %v230_v5 = vadd.f32 1.4214138, %v214_v10  ;;  %930 = vrcp.f32 %v140_v13 }
  0x31   :  { %vm73_vm7 = vcmp.ge.f32.partialorder %v1097_v50, 0.0  ;;  %v215_v41 = vmul.f32 %v1145_v27, %v199_v18  ;;  %v200_v0 = vadd.f32 -1.4531521, %v184_v63  ;;  %v185_v44 = vmul.f32 1.0614054, %v1186_v31  ;;  %v1225_v52 = vpop.eup %920 }
  0x32   :  { %932 = vrcp.f32 %v133_v16  ;;  %v341_v11 = vmul.f32 %v325_v7, %v1171_v59  ;;  %v349_v8 = vmul.f32 %v333_v4, %v109_v54  ;;  %v239_v1 = vmul.f32 %v1123_v33, %v223_v21  ;;  %1613 = vst [vmem:[#allocation22_spill] sm:$0xff] %v1225_v52  ;;  %v1230_v55 = vpop.eup %922 }
  0x33   :  { %v270_v10 = vmul.f32 %v1118_v26, %v254_v12  ;;  %v208_v43 = vmul.f32 %v1157_v39, %v192_v22  ;;  %v193_v20 = vadd.f32 -1.4531521, %v177_v6  ;;  %v178_v13 = vmul.f32 1.0614054, %v1198_v9 }
  0x34   :  { %934 = vrcp.f32 %v141_v38  ;;  %v1614_v18 = vmov -1.0   ;;  %v246_v54 = vmul.f32 %v1132_v56, %v230_v5  ;;  %v231_v16 = vadd.f32 1.4214138, %v215_v41 }
  0x35   :  { %v1235_v63 = vsel %vm63_vm1, 1.0, %v1614_v18  ;;  %v1240_v59 = vsel %vm70_vm2, 1.0, %v1614_v18  ;;  %v216_v7 = vmul.f32 %v1163_v47, %v200_v0  ;;  %v201_v4 = vadd.f32 -1.4531521, %v185_v44 }
  0x36   :  { %v186_v21 = vmul.f32 1.0614054, %v1208_v36  ;;  %936 = vpow2.f32 %v378_v48  ;;  %v364_v12 = vmul.f32 1.442695, %v341_v11  ;;  %v1245_v22 = vmul.f32 1.442695, %v349_v8  ;;  %v1247_v6 = vpop.eup %924 }
  0x37   :  { %v255_v15 = vadd.f32 -0.28449672, %v239_v1  ;;  %1615 = vst [vmem:[#allocation23_spill] sm:$0xff] %v1247_v6  ;;  %v286_v38 = vadd.f32 0.2548296, %v270_v10  ;;  %v209_v19 = vmul.f32 %v1175_v14, %v193_v20  ;;  %v1253_v0 = vsel %vm71_vm3, 1.0, %v1614_v18 }
  0x38   :  { %v224_v61 = vadd.f32 1.4214138, %v208_v43  ;;  %v194_v46 = vadd.f32 -1.4531521, %v178_v13  ;;  %v262_v52 = vadd.f32 -0.28449672, %v246_v54  ;;  %v1261_v48 = vpop.eup %926  ;;  %v247_v41 = vmul.f32 %v1145_v27, %v231_v16 }
  0x39   :  { %v1258_v5 = vsel %vm64_vm4, 1.0, %v1614_v18  ;;  %v179_v1 = vmul.f32 1.0614054, %v1218_v3  ;;  %v232_v44 = vadd.f32 1.4214138, %v216_v7  ;;  %v217_v11 = vmul.f32 %v1186_v31, %v201_v4  ;;  %v1265_v10 = vpop.eup %928 }
  0x3a   :  { %v202_v8 = vadd.f32 -1.4531521, %v186_v21  ;;  %1616 = vst [vmem:[#allocation24_spill] sm:$0xff] %v1265_v10  ;;  %v271_v25 = vmul.f32 %v1123_v33, %v255_v15  ;;  %v1271_v30 = vsel %vm72_vm5, 1.0, %v1614_v18  ;;  %v1276_v43 = vsel %vm65_vm6, 1.0, %v1614_v18  ;;  %v1279_v13 = vpop.eup %930 }
  0x3b   :  { %1617 = vst [vmem:[#allocation25_spill] sm:$0xff] %v1271_v30  ;;  %1618 = vst [vmem:[#allocation26_spill] sm:$0xff] %v1276_v43  ;;  %v187_v20 = vmul.f32 1.0614054, %v1230_v55  ;;  %v302_v54 = vmul.f32 %v1118_v26, %v286_v38  ;;  %v240_v16 = vmul.f32 %v1157_v39, %v224_v61  ;;  %v225_v7 = vadd.f32 1.4214138, %v209_v19 }
  0x3c   :  { %v210_v4 = vmul.f32 %v1198_v9, %v194_v46  ;;  %v1284_v21 = vpop.eup %932  ;;  %v278_v34 = vmul.f32 %v1132_v56, %v262_v52  ;;  %v1290_v40 = vsel %vm73_vm7, 1.0, %v1614_v18  ;;  %v195_v15 = vadd.f32 -1.4531521, %v179_v1 }
  0x3d   :  { %1619 = vst [vmem:[#allocation27_spill] sm:$0xff] %v1290_v40  ;;  %v180_v10 = vmul.f32 1.0614054, %v1261_v48  ;;  %v263_v6 = vadd.f32 -0.28449672, %v247_v41  ;;  %v248_v26 = vmul.f32 %v1163_v47, %v232_v44  ;;  %v218_v61 = vmul.f32 %v1208_v36, %v202_v8 }
  0x3e   :  { %v233_v38 = vadd.f32 1.4214138, %v217_v11  ;;  %v1295_v19 = vpop.eup %934  ;;  %938 = vpow2.f32 %v364_v12  ;;  %v287_v46 = vadd.f32 0.2548296, %v271_v25  ;;  %v203_v43 = vadd.f32 -1.4531521, %v187_v20 }
  0x3f   :  { %v188_v52 = vmul.f32 1.0614054, %v1279_v13  ;;  %v382_v50 = vmul.f32 %v1127_v45, %v302_v54  ;;  %v256_v42 = vadd.f32 -0.28449672, %v240_v16  ;;  %v241_v1 = vmul.f32 %v1175_v14, %v225_v7 }
  0x40   :  { %v226_v40 = vadd.f32 1.4214138, %v210_v4  ;;  %v1300_v58 = vpop.eup %936  ;;  %v294_v41 = vadd.f32 0.2548296, %v278_v34  ;;  %v211_v44 = vmul.f32 %v1218_v3, %v195_v15  ;;  %v196_v11 = vadd.f32 -1.4531521, %v180_v10 }
  0x41   :  { %1620 = vst [vmem:[#allocation28_spill] sm:$0xff] %v1300_v58  ;;  %v181_v8 = vmul.f32 1.0614054, %v1284_v21  ;;  %v279_v12 = vmul.f32 %v1145_v27, %v263_v6  ;;  %v264_v25 = vadd.f32 -0.28449672, %v248_v26  ;;  %v249_v20 = vmul.f32 %v1186_v31, %v233_v38 }
  0x42   :  { %v234_v30 = vadd.f32 1.4214138, %v218_v61  ;;  %v303_v45 = vmul.f32 %v1123_v33, %v287_v46  ;;  %v219_v54 = vmul.f32 %v1230_v55, %v203_v43  ;;  %v204_v16 = vadd.f32 -1.4531521, %v188_v52 }
  0x43   :  { %v189_v7 = vmul.f32 1.0614054, %v1295_v19  ;;  %v398_v4 = vsub.f32 1.0, %v382_v50  ;;  %v272_v34 = vmul.f32 %v1157_v39, %v256_v42  ;;  %v257_v15 = vadd.f32 -0.28449672, %v241_v1 }
  0x44   :  { %v242_v10 = vmul.f32 %v1198_v9, %v226_v40  ;;  %v310_v58 = vmul.f32 %v1132_v56, %v294_v41  ;;  %v227_v6 = vadd.f32 1.4214138, %v211_v44  ;;  %v212_v26 = vmul.f32 %v1261_v48, %v196_v11 }
  0x45   :  { %v197_v38 = vadd.f32 -1.4531521, %v181_v8  ;;  %v295_v61 = vadd.f32 0.2548296, %v279_v12  ;;  %v280_v33 = vmul.f32 %v1163_v47, %v264_v25  ;;  %v265_v46 = vadd.f32 -0.28449672, %v249_v20 }
  0x46   :  { %v250_v43 = vmul.f32 %v1208_v36, %v234_v30  ;;  %v383_v52 = vmul.f32 %v1129_v51, %v303_v45  ;;  %v235_v50 = vadd.f32 1.4214138, %v219_v54  ;;  %v220_v42 = vmul.f32 %v1279_v13, %v204_v16 }
  0x47   :  { %v205_v1 = vadd.f32 -1.4531521, %v189_v7  ;;  %v414_v40 = vmul.f32 %v398_v4, %v1205_v17  ;;  %v288_v37 = vadd.f32 0.2548296, %v272_v34  ;;  %v273_v56 = vmul.f32 %v1175_v14, %v257_v15 }
  0x48   :  { %v258_v41 = vadd.f32 -0.28449672, %v242_v10  ;;  %v1319_v44 = vpop.eup %938  ;;  %v390_v11 = vmul.f32 %v1137_v62, %v310_v58  ;;  %v243_v8 = vmul.f32 %v1218_v3, %v227_v6  ;;  %v228_v12 = vadd.f32 1.4214138, %v212_v26 }
  0x49   :  { %v213_v30 = vmul.f32 %v1284_v21, %v197_v38  ;;  %v311_v51 = vmul.f32 %v1145_v27, %v295_v61  ;;  %v296_v25 = vadd.f32 0.2548296, %v280_v33  ;;  %v281_v20 = vmul.f32 %v1186_v31, %v265_v46 }
  0x4a   :  { %v266_v45 = vadd.f32 -0.28449672, %v250_v43  ;;  %v399_v17 = vsub.f32 1.0, %v383_v52  ;;  %v251_v54 = vmul.f32 %v1230_v55, %v235_v50  ;;  %v236_v16 = vadd.f32 1.4214138, %v220_v42  ;;  %v542_v43 = vld [vmem:[%s1574_s1] sm:$0xff] }
  0x4b   :  { %v221_v7 = vmul.f32 %v1295_v19, %v205_v1  ;;  %v430_v4 = vadd.f32 1.0, %v414_v40  ;;  %v304_v62 = vmul.f32 %v1157_v39, %v288_v37  ;;  %v289_v58 = vadd.f32 0.2548296, %v273_v56  ;;  %v543_v52 = vld [vmem:[%s1574_s1 + $0x8] sm:$0xff]  ;;  %s944_s1 = smov 112  }
  0x4c   :  { %v274_v34 = vmul.f32 %v1198_v9, %v258_v41  ;;  %vm66_vm8 = vcmp.ge.f32.partialorder %v1104_v57, 0.0  ;;  %v406_v15 = vsub.f32 1.0, %v390_v11  ;;  %v259_v27 = vadd.f32 -0.28449672, %v243_v8 }
  0x4d   :  { %v244_v10 = vmul.f32 %v1261_v48, %v228_v12  ;;  %v229_v6 = vadd.f32 1.4214138, %v213_v30  ;;  %v391_v26 = vmul.f32 %v1153_v29, %v311_v51  ;;  %v312_v38 = vmul.f32 %v1163_v47, %v296_v25 }
  0x4e   :  { %v297_v61 = vadd.f32 0.2548296, %v281_v20  ;;  %v282_v33 = vmul.f32 %v1208_v36, %v266_v45  ;;  %940 = vpow2.f32 %v1245_v22  ;;  %v267_v37 = vadd.f32 -0.28449672, %v251_v54 }
  0x4f   :  { %v252_v39 = vmul.f32 %v1279_v13, %v236_v16  ;;  %v237_v46 = vadd.f32 1.4214138, %v221_v7  ;;  %v384_v29 = vmul.f32 %v1168_v53, %v304_v62  ;;  %v305_v47 = vmul.f32 %v1175_v14, %v289_v58 }
  0x50   :  { %v290_v50 = vadd.f32 0.2548296, %v274_v34  ;;  %v869_v42 = vpack.c.bf16 %v543_v52, %v542_v43  ;;  %vm74_vm9 = vcmp.ge.f32.partialorder %v1107_v60, 0.0  ;;  %v415_v22 = vmul.f32 %v399_v17, %v1235_v63 }
  0x51   :  { %v275_v1 = vmul.f32 %v1218_v3, %v259_v27  ;;  %v260_v40 = vadd.f32 -0.28449672, %v244_v10  ;;  %v245_v56 = vmul.f32 %v1284_v21, %v229_v6  ;;  %v407_v41 = vsub.f32 1.0, %v391_v26 }
  0x52   :  { %v392_v11 = vmul.f32 %v1173_v2, %v312_v38  ;;  %v313_v8 = vmul.f32 %v1186_v31, %v297_v61  ;;  %v298_v12 = vadd.f32 0.2548296, %v282_v33  ;;  %870 = vmatprep.subr.bf16.mxu0 %v869_v42  ;;  %873 = vmatprep.subr.bf16.mxu1 %v869_v42  ;;  %v422_v14 = vmul.f32 %v406_v15, %v1240_v59 }
  0x53   :  { %v283_v53 = vmul.f32 %v1230_v55, %v267_v37  ;;  %v268_v30 = vadd.f32 -0.28449672, %v252_v39  ;;  %v253_v63 = vmul.f32 %v1295_v19, %v237_v46  ;;  %872 = vmatpush3.bf16.msra.mxu0 %v869_v42  ;;  %874 = vmatpush3.bf16.msra.mxu1 %v869_v42  ;;  %v446_v51 = vmul.f32 %v430_v4, %v1083_v35  ;;  %v1623_v37 = vld [vmem:[#allocation21_spill] sm:$0xff] }
  0x54   :  { %v400_v25 = vsub.f32 1.0, %v384_v29  ;;  %v385_v20 = vmul.f32 %v1178_v23, %v305_v47  ;;  %v306_v2 = vmul.f32 %v1198_v9, %v290_v50  ;;  %v431_v31 = vadd.f32 1.0, %v415_v22  ;;  %v1624_v39 = vld [vmem:[#allocation9_spill] sm:$0xff] }
  0x55   :  { %v291_v45 = vadd.f32 0.2548296, %v275_v1  ;;  %v276_v17 = vmul.f32 %v1261_v48, %v260_v40  ;;  %v261_v54 = vadd.f32 -0.28449672, %v245_v56  ;;  %v423_v59 = vmul.f32 %v407_v41, %v1253_v0  ;;  %v1626_v56 = vld [vmem:[#allocation22_spill] sm:$0xff] }
  0x56   :  { %v408_v16 = vsub.f32 1.0, %v392_v11  ;;  %v393_v7 = vmul.f32 %v1195_v49, %v313_v8  ;;  %v314_v62 = vmul.f32 %v1208_v36, %v298_v12  ;;  %vm67_vm10 = vcmp.ge.f32.partialorder %v1116_v24, 0.0  ;;  %v1621_v49 = vld [vmem:[#allocation8_spill] sm:$0xff] }
  0x57   :  { %v438_v35 = vadd.f32 1.0, %v422_v14  ;;  %v299_v4 = vadd.f32 0.2548296, %v283_v53  ;;  %v284_v23 = vmul.f32 %v1279_v13, %v268_v30  ;;  %v269_v58 = vadd.f32 -0.28449672, %v253_v63  ;;  %v1628_v53 = vld [vmem:[#allocation27_spill] sm:$0xff] }
  0x58   :  { %v416_v9 = vmul.f32 %v400_v25, %v1258_v5  ;;  %v401_v34 = vsub.f32 1.0, %v385_v20  ;;  %v82_v15 = vsel %vm66_vm8, 1.0, %v1614_v18  ;;  %v386_v0 = vmul.f32 %v1211_v28, %v306_v2  ;;  %v1368_v27 = vpop.eup %940  ;;  %v1622_v5 = vld [vmem:[#allocation25_spill] sm:$0xff]  ;;  %v1629_v20 = vld [vmem:[#allocation23_spill] sm:$0xff] }
  0x59   :  { %vm75_vm11 = vcmp.ge.f32.partialorder %v1121_v32, 0.0  ;;  %v447_v36 = vmul.f32 %v431_v31, %v1621_v49  ;;  %v307_v10 = vmul.f32 %v1218_v3, %v291_v45  ;;  %v292_v6 = vadd.f32 0.2548296, %v276_v17  ;;  %v1625_v3 = vld [vmem:[#allocation26_spill] sm:$0xff]  ;;  %v1630_v31 = vld [vmem:[#allocation13_spill] sm:$0xff]  ;;  %v1631_v17 = vld [vmem:[#allocation11_spill] sm:$0xff] }
  0x5a   :  { %v277_v26 = vmul.f32 %v1284_v21, %v261_v54  ;;  %v439_v38 = vadd.f32 1.0, %v423_v59  ;;  %v424_v61 = vmul.f32 %v408_v16, %v1622_v5  ;;  %v409_v33 = vsub.f32 1.0, %v393_v7  ;;  %v1636_v5 = vld [vmem:[#allocation15_spill] sm:$0xff] }
  0x5b   :  { %v394_v57 = vmul.f32 %v1623_v37, %v314_v62  ;;  %v454_v46 = vmul.f32 %v438_v35, %v1624_v39  ;;  %v315_v28 = vmul.f32 %v1230_v55, %v299_v4  ;;  %v300_v43 = vadd.f32 0.2548296, %v284_v23  ;;  %v1627_v55 = vld [vmem:[#allocation10_spill] sm:$0xff]  ;;  %v1632_v35 = vld [vmem:[#allocation24_spill] sm:$0xff] }
  0x5c   :  { %v285_v52 = vmul.f32 %v1295_v19, %v269_v58  ;;  %v432_v50 = vadd.f32 1.0, %v416_v9  ;;  %v417_v42 = vmul.f32 %v401_v34, %v1625_v3  ;;  %v402_v22 = vsub.f32 1.0, %v386_v0  ;;  %v1633_v58 = vld [vmem:[#allocation12_spill] sm:$0xff] }
  0x5d   :  { %v90_v1 = vsel %vm74_vm9, 1.0, %v1614_v18  ;;  %v387_v41 = vmul.f32 %v1626_v56, %v307_v10  ;;  %v308_v11 = vmul.f32 %v1261_v48, %v292_v6  ;;  %v293_v8 = vadd.f32 0.2548296, %v277_v26  ;;  %v1635_v26 = vld [vmem:[#allocation14_spill] sm:$0xff]  ;;  %v1641_v56 = vld [vmem:[#allocation19_spill] sm:$0xff] }
  0x5e   :  { %v455_v12 = vmul.f32 %v439_v38, %v1627_v55  ;;  %v440_v14 = vadd.f32 1.0, %v424_v61  ;;  %v425_v30 = vmul.f32 %v409_v33, %v1628_v53  ;;  %v410_v63 = vsub.f32 1.0, %v394_v57  ;;  %v1642_v53 = vld [vmem:[#allocation3_spill] sm:$0xff] }
  0x5f   :  { %v395_v2 = vmul.f32 %v1629_v20, %v315_v28  ;;  %v316_v60 = vmul.f32 %v1279_v13, %v300_v43  ;;  %vm68_vm12 = vcmp.ge.f32.partialorder %v1630_v31, 0.0  ;;  %v448_v54 = vmul.f32 %v432_v50, %v1631_v17  ;;  %v1637_v28 = vld [vmem:[#allocation16_spill] sm:$0xff]  ;;  %v1638_v43 = vld [vmem:[#allocation18_spill] sm:$0xff] }
  0x60   :  { %v433_v59 = vadd.f32 1.0, %v417_v42  ;;  %v418_v16 = vmul.f32 %v402_v22, %v82_v15  ;;  %v403_v62 = vsub.f32 1.0, %v387_v41  ;;  %v388_v4 = vmul.f32 %v1632_v35, %v308_v11  ;;  %v1639_v42 = vld [vmem:[#allocation2_spill] sm:$0xff]  ;;  %v1640_v22 = vld [vmem:[#allocation17_spill] sm:$0xff]  ;;  %v1644_v31 = vld [vmem:[#allocation4_spill] sm:$0xff] }
  0x61   :  { %v309_v23 = vmul.f32 %v1284_v21, %v293_v8  ;;  %v456_v9 = vmul.f32 %v440_v14, %v1633_v58  ;;  %v441_v34 = vadd.f32 1.0, %v425_v30  ;;  %v426_v0 = vmul.f32 %v410_v63, %v90_v1  ;;  %v1643_v63 = vld [vmem:[#allocation20_spill] sm:$0xff]  ;;  %v1645_v35 = vld [vmem:[#allocation5_spill] sm:$0xff] }
  0x62   :  { %v83_v13 = vsel %vm67_vm10, 1.0, %v1614_v18  ;;  %v411_v15 = vsub.f32 1.0, %v395_v2  ;;  %vm76_vm13 = vcmp.ge.f32.partialorder %v1635_v26, 0.0  ;;  %v449_v61 = vmul.f32 %v433_v59, %v1636_v5 }
  0x63   :  { %v434_v33 = vadd.f32 1.0, %v418_v16  ;;  %v91_v24 = vsel %vm75_vm11, 1.0, %v1614_v18  ;;  %v419_v57 = vmul.f32 %v403_v62, %v83_v13  ;;  %v404_v39 = vsub.f32 1.0, %v388_v4 }
  0x64   :  { %vm69_vm14 = vcmp.ge.f32.partialorder %v1637_v28, 0.0  ;;  %v427_v32 = vmul.f32 %v411_v15, %v91_v24  ;;  %vm77_vm15 = vcmp.ge.f32.partialorder %v1640_v22, 0.0  ;;  %v92_v11 = vsel %vm76_vm13, 1.0, %v1614_v18 }
  0x65   :  { %v450_v41 = vmul.f32 %v434_v33, %v1641_v56  ;;  %v435_v55 = vadd.f32 1.0, %v419_v57  ;;  %v43_v30 = vmul.f32 0.5, %v1642_v53  ;;  %v44_v4 = vmul.f32 0.5, %v1645_v35 }
  0x66   :  { %v443_v2 = vadd.f32 1.0, %v427_v32  ;;  %vm608_vm0 = vcmask 130048   ;;  %vm786_vm1 = vcmask 64512  }
  0x68   :  { %v459_v58 = vmul.f32 %v443_v2, %v43_v30 }
  0x74   :  { %v479_v29 = vpop.permute.xlu0 %478  ;;  %v481_v47 = vpop.permute.xlu1 %480 }
  0x75   :  { %v526_v40 = vmul.f32 %v479_v29, %v446_v51  ;;  %v527_v25 = vmul.f32 %v481_v47, %v447_v36  ;;  %v301_v51 = vadd.f32 0.2548296, %v285_v52  ;;  %v1634_v36 = vld [vmem:[#allocation28_spill] sm:$0xff]  ;;  %v442_v52 = vadd.f32 1.0, %v426_v0 }
  0x76   :  { %v396_v10 = vmul.f32 %v1634_v36, %v316_v60  ;;  %v84_v29 = vsel %vm68_vm12, 1.0, %v1614_v18 }
  0x77   :  { %576 = vrot.lane.b32.xlu0 %v526_v40, %s944_s1  ;;  %v317_v6 = vmul.f32 %v1295_v19, %v301_v51  ;;  %v457_v19 = vmul.f32 %v441_v34, %v1638_v43 }
  0x78   :  { %v495_v45 = vpop.permute.xlu0 %494  ;;  %v497_v48 = vpop.permute.xlu1 %496  ;;  %v412_v50 = vsub.f32 1.0, %v396_v10 }
  0x79   :  { %v534_v7 = vmul.f32 %v495_v45, %v454_v46  ;;  %v535_v49 = vmul.f32 %v497_v48, %v455_v12  ;;  %v389_v46 = vmul.f32 %v1319_v44, %v309_v23  ;;  %v397_v3 = vmul.f32 %v1368_v27, %v317_v6  ;;  %v1647_v6 = vld [vmem:[#allocation7_spill] sm:$0xff] }
  0x7a   :  { %v35_v44 = vmul.f32 0.5, %v1639_v42  ;;  %v420_v12 = vmul.f32 %v404_v39, %v84_v29  ;;  %v458_v27 = vmul.f32 %v442_v52, %v1643_v63  ;;  %v428_v60 = vmul.f32 %v412_v50, %v92_v11 }
  0x7b   :  { %592 = vrot.lane.b32.xlu1 %v534_v7, %s944_s1  ;;  %578 = vrot.lane.b32.xlu0 %v527_v25, %s944_s1  ;;  %v405_v14 = vsub.f32 1.0, %v389_v46  ;;  %v85_v25 = vsel %vm69_vm14, 1.0, %v1614_v18  ;;  %v413_v51 = vsub.f32 1.0, %v397_v3  ;;  %v36_v45 = vmul.f32 0.5, %v1644_v31 }
  0x7c   :  { %v483_v21 = vpop.permute.xlu0 %482  ;;  %v499_v38 = vpop.permute.xlu1 %498  ;;  %v451_v16 = vmul.f32 %v435_v55, %v35_v44  ;;  %v436_v7 = vadd.f32 1.0, %v420_v12  ;;  %v45_v26 = vmul.f32 0.5, %v1647_v6  ;;  %v545_v12 = vld [vmem:[%s1575_s2 + $0x8] sm:$0xff] }
  0x7d   :  { %v528_v37 = vmul.f32 %v483_v21, %v448_v54  ;;  %v536_v47 = vmul.f32 %v499_v38, %v456_v9  ;;  %v93_v54 = vsel %vm77_vm15, 1.0, %v1614_v18  ;;  %v421_v62 = vmul.f32 %v405_v14, %v85_v25  ;;  %v544_v14 = vld [vmem:[%s1575_s2] sm:$0xff]  ;;  %v553_v25 = vld [vmem:[%s1575_s2 + $0x48] sm:$0xff] }
  0x7e   :  { %v444_v9 = vadd.f32 1.0, %v428_v60  ;;  %v429_v34 = vmul.f32 %v413_v51, %v93_v54  ;;  %v452_v18 = vmul.f32 %v436_v7, %v36_v45  ;;  %v547_v45 = vld [vmem:[%s1575_s2 + $0x18] sm:$0xff] }
  0x7f   :  { %594 = vrot.lane.b32.xlu1 %v535_v49, %s944_s1  ;;  %580 = vrot.lane.b32.xlu0 %v528_v37, %s944_s1  ;;  %v1646_v49 = vld [vmem:[#allocation6_spill] sm:$0xff]  ;;  %v437_v10 = vadd.f32 1.0, %v421_v62  ;;  %v555_v7 = vld [vmem:[%s1575_s2 + $0x58] sm:$0xff]  ;;  %v554_v62 = vld [vmem:[%s1575_s2 + $0x50] sm:$0xff] }
  0x80   :  { %v485_v1 = vpop.permute.xlu0 %484  ;;  %v501_v40 = vpop.permute.xlu1 %500  ;;  %v37_v15 = vmul.f32 0.5, %v1646_v49  ;;  %v460_v38 = vmul.f32 %v444_v9, %v44_v4  ;;  %v445_v5 = vadd.f32 1.0, %v429_v34  ;;  %v549_v9 = vld [vmem:[%s1575_s2 + $0x28] sm:$0xff]  ;;  %v548_v34 = vld [vmem:[%s1575_s2 + $0x20] sm:$0xff] }
  0x81   :  { %v529_v8 = vmul.f32 %v485_v1, %v449_v61  ;;  %v537_v20 = vmul.f32 %v501_v40, %v457_v19 }
  0x82   :  { %v453_v37 = vmul.f32 %v437_v10, %v37_v15  ;;  %v461_v39 = vmul.f32 %v445_v5, %v45_v26  ;;  %v550_v5 = vld [vmem:[%s1575_s2 + $0x30] sm:$0xff] }
  0x83   :  { %596 = vrot.lane.b32.xlu1 %v536_v47, %s944_s1  ;;  %582 = vrot.lane.b32.xlu0 %v529_v8, %s944_s1 }
  0x84   :  { %v487_v48 = vpop.permute.xlu0 %486  ;;  %v503_v17 = vpop.permute.xlu1 %502 }
  0x85   :  { %v530_v59 = vmul.f32 %v487_v48, %v450_v41  ;;  %v538_v23 = vmul.f32 %v503_v17, %v458_v27  ;;  %v546_v48 = vld [vmem:[%s1575_s2 + $0x10] sm:$0xff] }
  0x87   :  { %598 = vrot.lane.b32.xlu1 %v537_v20, %s944_s1  ;;  %584 = vrot.lane.b32.xlu0 %v530_v59, %s944_s1  ;;  %v552_v20 = vld [vmem:[%s1575_s2 + $0x40] sm:$0xff] }
  0x88   :  { %v489_v0 = vpop.permute.xlu0 %488  ;;  %v505_v13 = vpop.permute.xlu1 %504 }
  0x89   :  { %v531_v36 = vmul.f32 %v489_v0, %v451_v16  ;;  %v539_v21 = vmul.f32 %v505_v13, %v459_v58 }
  0x8b   :  { %600 = vrot.lane.b32.xlu1 %v538_v23, %s944_s1  ;;  %586 = vrot.lane.b32.xlu0 %v531_v36, %s944_s1  ;;  %v557_v36 = vld [vmem:[%s1575_s2 + $0x68] sm:$0xff] }
  0x8c   :  { %v491_v61 = vpop.permute.xlu0 %490  ;;  %v507_v33 = vpop.permute.xlu1 %506 }
  0x8d   :  { %v532_v24 = vmul.f32 %v491_v61, %v452_v18  ;;  %v540_v57 = vmul.f32 %v507_v33, %v460_v38  ;;  %v556_v18 = vld [vmem:[%s1575_s2 + $0x60] sm:$0xff]  ;;  %v551_v38 = vld [vmem:[%s1575_s2 + $0x38] sm:$0xff] }
  0x8f   :  { %602 = vrot.lane.b32.xlu1 %v539_v21, %s944_s1  ;;  %588 = vrot.lane.b32.xlu0 %v532_v24, %s944_s1 }
  0x90   :  { %v493_v46 = vpop.permute.xlu0 %492  ;;  %v509_v28 = vpop.permute.xlu1 %508 }
  0x91   :  { %v533_v43 = vmul.f32 %v493_v46, %v453_v37  ;;  %v541_v19 = vmul.f32 %v509_v28, %v461_v39  ;;  %v558_v39 = vld [vmem:[%s1575_s2 + $0x70] sm:$0xff] }
  0x93   :  { %604 = vrot.lane.b32.xlu1 %v540_v57, %s944_s1  ;;  %590 = vrot.lane.b32.xlu0 %v533_v43, %s944_s1  ;;  %v559_v57 = vld [vmem:[%s1575_s2 + $0x78] sm:$0xff] }
  0x97   :  { %606 = vrot.lane.b32.xlu1 %v541_v19, %s944_s1 }
  0xe9   :  { %v577_v52 = vpop.permute.xlu0 %576 }
  0xea   :  { %845 = vmatprep.mubr.msk.f32.mxu0 %vm608_vm0, %v577_v52 }
  0xed   :  { %v593_v29 = vpop.permute.xlu1 %592  ;;  %v579_v47 = vpop.permute.xlu0 %578 }
  0xee   :  { %846 = vmatmul.mubr.msk.f32.vlgmr.msra.gmra.mrb[0].mxu0 %vm608_vm0, %v579_v47  ;;  %857 = vmatprep.mubr.msk.f32.mxu1 %vm608_vm0, %v593_v29 }
  0xf1   :  { %v595_v32 = vpop.permute.xlu1 %594  ;;  %v581_v50 = vpop.permute.xlu0 %580 }
  0xf2   :  { %858 = vmatmul.mubr.msk.f32.vlgmr.msra.gmra.mrb[0].mxu1 %vm608_vm0, %v595_v32  ;;  %848 = vmatprep.mubr.msk.f32.mxu0 %vm608_vm0, %v581_v50 }
  0xf5   :  { %v597_v3 = vpop.permute.xlu1 %596  ;;  %v583_v42 = vpop.permute.xlu0 %582 }
  0xf6   :  { %860 = vmatprep.mubr.msk.f32.mxu1 %vm608_vm0, %v597_v3  ;;  %849 = vmatmul.mubr.msk.f32.gmra.mrb[2].mxu0 %vm608_vm0, %v583_v42 }
  0xf9   :  { %v599_v44 = vpop.permute.xlu1 %598  ;;  %v585_v22 = vpop.permute.xlu0 %584 }
  0xfa   :  { %861 = vmatmul.mubr.msk.f32.gmra.mrb[2].mxu1 %vm608_vm0, %v599_v44  ;;  %851 = vmatprep.mubr.msk.f32.mxu0 %vm608_vm0, %v585_v22 }
  0xfd   :  { %v601_v1 = vpop.permute.xlu1 %600  ;;  %v587_v40 = vpop.permute.xlu0 %586 }
  0xfe   :  { %863 = vmatprep.mubr.msk.f32.mxu1 %vm608_vm0, %v601_v1  ;;  %852 = vmatmul.mubr.msk.f32.gmra.mrb[4].mxu0 %vm608_vm0, %v587_v40 }
 0x101   :  { %v603_v56 = vpop.permute.xlu1 %602  ;;  %v589_v41 = vpop.permute.xlu0 %588 }
 0x102   :  { %864 = vmatmul.mubr.msk.f32.gmra.mrb[4].mxu1 %vm608_vm0, %v603_v56  ;;  %854 = vmatprep.mubr.msk.f32.mxu0 %vm608_vm0, %v589_v41 }
 0x105   :  { %v605_v11 = vpop.permute.xlu1 %604  ;;  %v591_v8 = vpop.permute.xlu0 %590 }
 0x106   :  { %866 = vmatprep.mubr.msk.f32.mxu1 %vm608_vm0, %v605_v11  ;;  %855 = vmatmul.mubr.msk.f32.gmra.mrb[6].mxu0 %vm608_vm0, %v591_v8 }
 0x109   :  { %v607_v55 = vpop.permute.xlu1 %606 }
 0x10a   :  { %867 = vmatmul.mubr.msk.f32.gmra.mrb[6].mxu1 %vm608_vm0, %v607_v55 }
 0x1c1   :  { %v847_v53 = vpop.f32.mrb[0].mxu0 }
 0x1c2   :  { %v713_v30 = vadd.f32 %v847_v53, %v545_v12  ;;  %v707_v63 = vpop.f32.mrb[1].mxu0 }
 0x1c3   :  { %v708_v27 = vadd.f32 %v707_v63, %v544_v14 }
 0x1c4   :  { %788 = vst.msk [vmem:[%s1576_s3 + $0x8] sm:$0xff] %vm786_vm1, %v713_v30 }
 0x1c5   :  { %787 = vst.msk [vmem:[%s1576_s3] sm:$0xff] %vm786_vm1, %v708_v27  ;;  %v859_v2 = vpop.f32.mrb[0].mxu1 }
 0x1c6   :  { %v753_v60 = vadd.f32 %v859_v2, %v553_v25  ;;  %v747_v51 = vpop.f32.mrb[1].mxu1 }
 0x1c7   :  { %v748_v31 = vadd.f32 %v747_v51, %v552_v20 }
 0x1c8   :  { %796 = vst.msk [vmem:[%s1576_s3 + $0x48] sm:$0xff] %vm786_vm1, %v753_v60 }
 0x1c9   :  { %795 = vst.msk [vmem:[%s1576_s3 + $0x40] sm:$0xff] %vm786_vm1, %v748_v31  ;;  %v850_v17 = vpop.f32.mrb[2].mxu0 }
 0x1ca   :  { %v723_v54 = vadd.f32 %v850_v17, %v547_v45  ;;  %v717_v59 = vpop.f32.mrb[3].mxu0 }
 0x1cb   :  { %v718_v16 = vadd.f32 %v717_v59, %v546_v48 }
 0x1cc   :  { %790 = vst.msk [vmem:[%s1576_s3 + $0x18] sm:$0xff] %vm786_vm1, %v723_v54 }
 0x1cd   :  { %789 = vst.msk [vmem:[%s1576_s3 + $0x10] sm:$0xff] %vm786_vm1, %v718_v16  ;;  %v862_v35 = vpop.f32.mrb[2].mxu1 }
 0x1ce   :  { %v763_v4 = vadd.f32 %v862_v35, %v555_v7  ;;  %v757_v23 = vpop.f32.mrb[3].mxu1 }
 0x1cf   :  { %v758_v58 = vadd.f32 %v757_v23, %v554_v62 }
 0x1d0   :  { %798 = vst.msk [vmem:[%s1576_s3 + $0x58] sm:$0xff] %vm786_vm1, %v763_v4 }
 0x1d1   :  { %797 = vst.msk [vmem:[%s1576_s3 + $0x50] sm:$0xff] %vm786_vm1, %v758_v58  ;;  %v853_v0 = vpop.f32.mrb[4].mxu0 }
 0x1d2   :  { %v733_v13 = vadd.f32 %v853_v0, %v549_v9  ;;  %v727_v49 = vpop.f32.mrb[5].mxu0 }
 0x1d3   :  { %v728_v15 = vadd.f32 %v727_v49, %v548_v34 }
 0x1d4   :  { %792 = vst.msk [vmem:[%s1576_s3 + $0x28] sm:$0xff] %vm786_vm1, %v733_v13 }
 0x1d5   :  { %791 = vst.msk [vmem:[%s1576_s3 + $0x20] sm:$0xff] %vm786_vm1, %v728_v15  ;;  %v865_v10 = vpop.f32.mrb[4].mxu1 }
 0x1d6   :  { %v773_v6 = vadd.f32 %v865_v10, %v557_v36  ;;  %v767_v26 = vpop.f32.mrb[5].mxu1 }
 0x1d7   :  { %v768_v21 = vadd.f32 %v767_v26, %v556_v18 }
 0x1d8   :  { %800 = vst.msk [vmem:[%s1576_s3 + $0x68] sm:$0xff] %vm786_vm1, %v773_v6 }
 0x1d9   :  { %799 = vst.msk [vmem:[%s1576_s3 + $0x60] sm:$0xff] %vm786_vm1, %v768_v21  ;;  %v856_v61 = vpop.f32.mrb[6].mxu0 }
 0x1da   :  { %v743_v33 = vadd.f32 %v856_v61, %v551_v38  ;;  %v737_v24 = vpop.f32.mrb[7].mxu0 }
 0x1db   :  { %v738_v37 = vadd.f32 %v737_v24, %v550_v5 }
 0x1dc   :  { %794 = vst.msk [vmem:[%s1576_s3 + $0x38] sm:$0xff] %vm786_vm1, %v743_v33 }
 0x1dd   :  { %793 = vst.msk [vmem:[%s1576_s3 + $0x30] sm:$0xff] %vm786_vm1, %v738_v37  ;;  %v868_v46 = vpop.f32.mrb[6].mxu1 }
 0x1de   :  { %v783_v28 = vadd.f32 %v868_v46, %v559_v57  ;;  %v777_v43 = vpop.f32.mrb[7].mxu1 }
 0x1df   :  { %v778_v19 = vadd.f32 %v777_v43, %v558_v39 }
 0x1e0   :  { %802 = vst.msk [vmem:[%s1576_s3 + $0x78] sm:$0xff] %vm786_vm1, %v783_v28 }
 0x1e1   :  { %801 = vst.msk [vmem:[%s1576_s3 + $0x70] sm:$0xff] %vm786_vm1, %v778_v19 }

</bundles_post_ra>
